<compile_context>
chip_gen: v5e
topology: v5e:2x2
jax: 0.10.0
libtpu: 0.0.40
codegen_flags: <defaults>
</compile_context>

<pallas_src>
import functools

import jax
import jax.numpy as jnp
from jax.experimental import pallas as pl
from jax.experimental.pallas import tpu as pltpu


# ------------------------------ Fused kernel --------------------------------

def _trunk_kernel(a_ref, w1_ref, b1_ref, wl_ref, bl_ref, o_ref, *,
                  pool_h, pool_w):
    """conv1(7x7/s2)+BN+ReLU -> maxpool(3x3/s2/p1) -> layer1 (2 BasicBlocks).

    a_ref:  (1, 4*hw, K)  f32  parity-grouped im2col rows for one image
    w1_ref: (K, C)        f32  conv1 weight, BN scale folded in, K zero-padded
    b1_ref: (1, C)        f32  conv1 folded BN bias
    wl_ref: (36, C, C)    f32  layer1 3x3 weights (conv*9 + kh*3+kw, Cin, Cout)
    bl_ref: (4, C)        f32  layer1 folded BN biases (one row per conv)
    o_ref:  (1, hw, C)    f32  pooled-resolution output, hw = pool_h*pool_w
    """
    hw = pool_h * pool_w
    c = o_ref.shape[2]

    # ---- conv1 GEMM + bias + ReLU (BN scale already folded into w1) -------
    y = jnp.dot(a_ref[0], w1_ref[...], preferred_element_type=jnp.float32)
    y = jnp.maximum(y + b1_ref[...], 0.0)       # (4*hw, C): [EE | EO | OE | OO]

    ee = y[0 * hw:1 * hw]                        # conv1 at (2i,   2j)
    eo = y[1 * hw:2 * hw]                        # conv1 at (2i,   2j+1)
    oe = y[2 * hw:3 * hw]                        # conv1 at (2i+1, 2j)
    oo = y[3 * hw:4 * hw]                        # conv1 at (2i+1, 2j+1)

    # ---- hoisted masks for shifted taps (shared by maxpool and 3x3 convs) -
    col = jax.lax.broadcasted_iota(jnp.int32, (hw, c), 0) % pool_w
    mask_l = col >= 1                 # tap with dj == -1 invalid where j == 0
    mask_r = col <= pool_w - 2        # tap with dj == +1 invalid where j == last

    def tap(v, di, dj):
        # out[(i, j)] = v[(i + di, j + dj)] if in range else 0 (zero padding).
        s = di * pool_w + dj
        if s > 0:
            shifted = jnp.concatenate(
                [v[s:, :], jnp.zeros((s, c), v.dtype)], axis=0)
        elif s < 0:
            shifted = jnp.concatenate(
                [jnp.zeros((-s, c), v.dtype), v[:s, :]], axis=0)
        else:
            shifted = v
        if dj == -1:
            return jnp.where(mask_l, shifted, 0.0)
        if dj == 1:
            return jnp.where(mask_r, shifted, 0.0)
        return shifted

    # ---- 3x3/s2/p1 maxpool on the parity-grouped conv1 output -------------
    # Window at pooled (i, j) covers {2i-1..2i+1} x {2j-1..2j+1}.  Out-of-range
    # taps are filled with 0, which is safe because every window contains the
    # always-valid EE tap and all values are post-ReLU (>= 0).
    p = jnp.maximum(ee, eo)
    p = jnp.maximum(p, oe)
    p = jnp.maximum(p, oo)
    p = jnp.maximum(p, tap(eo, 0, -1))
    p = jnp.maximum(p, tap(oe, -1, 0))
    p = jnp.maximum(p, tap(oo, 0, -1))
    p = jnp.maximum(p, tap(oo, -1, 0))
    p = jnp.maximum(p, tap(oo, -1, -1))

    # ---- layer1: two 64->64 BasicBlocks, activation VMEM-resident ----------
    bl = bl_ref[...]                                           # (4, C)
    offsets = [(di, dj) for di in (-1, 0, 1) for dj in (-1, 0, 1)]

    def conv3x3(v, cidx):
        # 3x3/s1/p1 conv as 9 accumulated (hw,C)x(C,C) f32 MXU matmuls.
        acc = jnp.zeros((hw, c), jnp.float32)
        for t, (di, dj) in enumerate(offsets):                 # t == kh*3 + kw
            acc = acc + jnp.dot(tap(v, di, dj), wl_ref[cidx * 9 + t],
                                preferred_element_type=jnp.float32)
        return acc

    def basic_block(v, c0):
        h = jnp.maximum(conv3x3(v, c0) + bl[c0:c0 + 1, :], 0.0)
        h = conv3x3(h, c0 + 1) + bl[c0 + 1:c0 + 2, :]
        return jnp.maximum(h + v, 0.0)                         # residual + ReLU

    z = basic_block(p, 0)
    z = basic_block(z, 2)
    # TODO(synk): 64-lane masked store; pack row pairs to 128 lanes only if
    #             profiling ever shows this 16 KiB store on the critical path.
    o_ref[0] = z


# ------------------------------ Pallas wrapper -------------------------------

def _conv1_patches_parity(x_nhwc, kh, kw, stride, pad, k_pad):
    """Parity-grouped im2col for conv1: rows ordered [EE, EO, OE, OO]."""
    n, h, w, cin = x_nhwc.shape
    ho = (h + 2 * pad - kh) // stride + 1
    wo = (w + 2 * pad - kw) // stride + 1
    assert ho % 2 == 0 and wo % 2 == 0, (ho, wo)
    k = kh * kw * cin
    xp = jnp.pad(x_nhwc, ((0, 0), (pad, pad), (pad, pad), (0, 0)))
    cols = []
    for i in range(kh):
        for j in range(kw):
            cols.append(xp[:, i:i + stride * ho:stride,
                           j:j + stride * wo:stride, :])
    # K ordered (kh, kw, Cin) to match the HWIO weight reshape.
    patches = jnp.stack(cols, axis=3).reshape(n, ho, wo, k)
    groups = [patches[:, 0::2, 0::2], patches[:, 0::2, 1::2],
              patches[:, 1::2, 0::2], patches[:, 1::2, 1::2]]
    a = jnp.concatenate(
        [g.reshape(n, (ho // 2) * (wo // 2), k) for g in groups], axis=1)
    a = jnp.pad(a, ((0, 0), (0, 0), (0, k_pad - k)))          # lane-align K
    return a.astype(jnp.float32), ho, wo


def _prep_trunk_params(params, k_pad):
    """Fold BN into conv weights / biases and lay weights out for the kernel."""
    kh, kw, cin, cout = params["conv1_w"].shape
    k = kh * kw * cin
    w1 = params["conv1_w"].reshape(k, cout) * params["bn1_scale"][None, :]
    w1 = jnp.pad(w1, ((0, k_pad - k), (0, 0))).astype(jnp.float32)
    b1 = params["bn1_bias"].reshape(1, cout).astype(jnp.float32)

    wl, bl = [], []
    for blk in params["layer1"]:
        for wk, sk, bk in (("w1", "s1", "b1"), ("w2", "s2", "b2")):
            wl.append((blk[wk] * blk[sk][None, None, None, :])
                      .reshape(9, cout, cout))
            bl.append(blk[bk])
    wl = jnp.concatenate(wl, axis=0).astype(jnp.float32)       # (36, C, C)
    bl = jnp.stack(bl, axis=0).astype(jnp.float32)             # (4,  C)
    return w1, b1, wl, bl


def partial_resnet_forward_pallas(x_nchw, params):
    """up_to_layer = 1 forward, NCHW in / NCHW out (matches PyTorch)."""
    x = jnp.transpose(x_nchw, (0, 2, 3, 1)).astype(jnp.float32)    # -> NHWC
    n = x.shape[0]
    k_pad = 256
    a, ho, wo = _conv1_patches_parity(x, 7, 7, 2, 3, k_pad)
    w1, b1, wl, bl = _prep_trunk_params(params, k_pad)

    pool_h, pool_w = ho // 2, wo // 2
    hw = pool_h * pool_w
    cout = w1.shape[1]

    out = pl.pallas_call(
        functools.partial(_trunk_kernel, pool_h=pool_h, pool_w=pool_w),
        out_shape=jax.ShapeDtypeStruct((n, hw, cout), jnp.float32),
        grid=(n,),
        in_specs=[
            pl.BlockSpec((1, 4 * hw, k_pad), lambda b: (b, 0, 0)),
            pl.BlockSpec((k_pad, cout), lambda b: (0, 0)),       # constant ->
            pl.BlockSpec((1, cout), lambda b: (0, 0)),           # weights stay
            pl.BlockSpec((36, cout, cout), lambda b: (0, 0, 0)), # VMEM-resident
            pl.BlockSpec((4, cout), lambda b: (0, 0)),
        ],
        out_specs=pl.BlockSpec((1, hw, cout), lambda b: (b, 0, 0)),
        compiler_params=pltpu.CompilerParams(
            dimension_semantics=("parallel",)),                 # dual-TC on v7x
    )(a, w1, b1, wl, bl)
    return jnp.transpose(out.reshape(n, pool_h, pool_w, cout), (0, 3, 1, 2))


# ------------------- Parameters (synthetic, deterministic) -------------------

_BN_EPS = 1e-5


def _fold_bn(gamma, beta, mean, var):
    scale = gamma / jnp.sqrt(var + _BN_EPS)
    bias = beta - mean * scale
    return scale.astype(jnp.float32), bias.astype(jnp.float32)


def _make_bn(key, c):
    kg, kb, km, kv = jax.random.split(key, 4)
    gamma = 1.0 + 0.1 * jax.random.normal(kg, (c,), jnp.float32)
    beta = 0.1 * jax.random.normal(kb, (c,), jnp.float32)
    mean = 0.1 * jax.random.normal(km, (c,), jnp.float32)
    var = jax.random.uniform(kv, (c,), jnp.float32, 0.5, 1.5)
    return _fold_bn(gamma, beta, mean, var)


def init_params(key):
    keys = jax.random.split(key, 16)
    params = {}
    params["conv1_w"] = 0.05 * jax.random.normal(keys[0], (7, 7, 3, 64),
                                                 jnp.float32)
    params["bn1_scale"], params["bn1_bias"] = _make_bn(keys[1], 64)
    blocks = []
    for b in range(2):
        k0, k1, k2, k3 = jax.random.split(keys[2 + b], 4)
        w1 = 0.05 * jax.random.normal(k0, (3, 3, 64, 64), jnp.float32)
        s1, b1 = _make_bn(k1, 64)
        w2 = 0.05 * jax.random.normal(k2, (3, 3, 64, 64), jnp.float32)
        s2, b2 = _make_bn(k3, 64)
        blocks.append(dict(w1=w1, s1=s1, b1=b1, w2=w2, s2=s2, b2=b2))
    params["layer1"] = blocks
    return params


# --------------------------- Pure-JAX reference ------------------------------

def _conv_ref(x, w, stride, pad):
    return jax.lax.conv_general_dilated(
        x, w, window_strides=(stride, stride),
        padding=[(pad, pad), (pad, pad)],
        dimension_numbers=("NHWC", "HWIO", "NHWC"),
        precision=jax.lax.Precision.HIGHEST)


def partial_resnet_forward_ref(x_nchw, params):
    x = jnp.transpose(x_nchw, (0, 2, 3, 1)).astype(jnp.float32)
    x = _conv_ref(x, params["conv1_w"], 2, 3)
    x = jnp.maximum(x * params["bn1_scale"] + params["bn1_bias"], 0.0)
    x = jax.lax.reduce_window(
        x, -jnp.inf, jax.lax.max, (1, 3, 3, 1), (1, 2, 2, 1),
        padding=[(0, 0), (1, 1), (1, 1), (0, 0)])
    for blk in params["layer1"]:
        identity = x
        h = _conv_ref(x, blk["w1"], 1, 1)
        h = jnp.maximum(h * blk["s1"] + blk["b1"], 0.0)
        h = _conv_ref(h, blk["w2"], 1, 1)
        x = jnp.maximum(h * blk["s2"] + blk["b2"] + identity, 0.0)
    return jnp.transpose(x, (0, 3, 1, 2))


# ----------------------------------- Main ------------------------------------

if __name__ == "__main__":
    key = jax.random.PRNGKey(0)
    kx, kp = jax.random.split(key)
    # PyTorch-style NCHW input: batch=2, 3 channels, 32x32 spatial.
    x = jax.random.normal(kx, (2, 3, 32, 32), jnp.float32)
    params = init_params(kp)

    out = jax.jit(partial_resnet_forward_pallas)(x, params)
    out = jax.block_until_ready(out)
    assert out.shape == (2, 64, 8, 8), out.shape

    ref = jax.jit(partial_resnet_forward_ref)(x, params)
    ref = jax.block_until_ready(ref)
    err = float(jnp.max(jnp.abs(out - ref)))
    # f32 MXU operands match the f32 reference to ~1e-5 in interpret / full-
    # precision lowering; the 3e-2 bound additionally tolerates toolchains that
    # lower f32 dots via reduced-precision bf16 MXU passes.
    assert jnp.allclose(out, ref, rtol=3e-2, atol=3e-2), err

    print("KERNEL_OK")
</pallas_src>

<mosaic_0001>
module attributes {stable_mosaic.version = 11 : i64} {
  func.func @_trunk_kernel(%arg0: i32, %arg1: memref<1x256x256xf32, #tpu.memory_space<vmem>>, %arg2: memref<256x64xf32, #tpu.memory_space<vmem>>, %arg3: memref<1x64xf32, #tpu.memory_space<vmem>>, %arg4: memref<36x64x64xf32, #tpu.memory_space<vmem>>, %arg5: memref<4x64xf32, #tpu.memory_space<vmem>>, %arg6: memref<1x64x64xf32, #tpu.memory_space<vmem>>) attributes {dimension_semantics = [#tpu.dimension_semantics<parallel>], iteration_bounds = array<i64: 2>, scalar_prefetch = 0 : i64, scratch_operands = 0 : i64, tpu.core_type = #tpu.core_type<tc>, window_params = [{transform_indices = @transform_0, window_bounds = array<i64: 1, 256, 256>}, {pipeline_mode = #tpu.pipeline_mode<synchronous>, transform_indices = @transform_1, window_bounds = array<i64: 256, 64>}, {pipeline_mode = #tpu.pipeline_mode<synchronous>, transform_indices = @transform_2, window_bounds = array<i64: 1, 64>}, {pipeline_mode = #tpu.pipeline_mode<synchronous>, transform_indices = @transform_3, window_bounds = array<i64: 36, 64, 64>}, {pipeline_mode = #tpu.pipeline_mode<synchronous>, transform_indices = @transform_4, window_bounds = array<i64: 4, 64>}, {transform_indices = @transform_5, window_bounds = array<i64: 1, 64, 64>}]} {
    %c0 = arith.constant 0 : index
    %c0_0 = arith.constant 0 : index
    %c0_1 = arith.constant 0 : index
    %0 = vector.load %arg1[%c0, %c0_0, %c0_1] : memref<1x256x256xf32, #tpu.memory_space<vmem>>, vector<1x256x256xf32>
    %1 = vector.shape_cast %0 : vector<1x256x256xf32> to vector<256x256xf32>
    %c0_2 = arith.constant 0 : index
    %c0_3 = arith.constant 0 : index
    %2 = vector.load %arg2[%c0_2, %c0_3] : memref<256x64xf32, #tpu.memory_space<vmem>>, vector<256x64xf32>
    %cst = arith.constant dense<0.000000e+00> : vector<256x64xf32>
    %3 = tpu.matmul %1, %2, %cst {dimension_numbers = #tpu.dot_dimension_numbers<[1], [0], [0], [1], [0, 0, 1, 1], [], []>} : vector<256x256xf32>, vector<256x64xf32>, vector<256x64xf32> -> vector<256x64xf32>
    %c0_4 = arith.constant 0 : index
    %c0_5 = arith.constant 0 : index
    %4 = vector.load %arg3[%c0_4, %c0_5] : memref<1x64xf32, #tpu.memory_space<vmem>>, vector<1x64xf32>
    %5 = vector.broadcast %4 : vector<1x64xf32> to vector<256x64xf32>
    %6 = arith.addf %3, %5 : vector<256x64xf32>
    %cst_6 = arith.constant 0.000000e+00 : f32
    %7 = vector.broadcast %cst_6 : f32 to vector<256x64xf32>
    %8 = arith.maximumf %6, %7 : vector<256x64xf32>
    %9 = vector.extract_strided_slice %8 {offsets = [0, 0], sizes = [64, 64], strides = [1, 1]} : vector<256x64xf32> to vector<64x64xf32>
    %10 = vector.extract_strided_slice %8 {offsets = [64, 0], sizes = [64, 64], strides = [1, 1]} : vector<256x64xf32> to vector<64x64xf32>
    %11 = vector.extract_strided_slice %8 {offsets = [128, 0], sizes = [64, 64], strides = [1, 1]} : vector<256x64xf32> to vector<64x64xf32>
    %12 = vector.extract_strided_slice %8 {offsets = [192, 0], sizes = [64, 64], strides = [1, 1]} : vector<256x64xf32> to vector<64x64xf32>
    %13 = tpu.iota {dimensions = array<i32: 0>} : vector<64x64xi32>
    %c8_i32 = arith.constant 8 : i32
    %c0_i32 = arith.constant 0 : i32
    %14 = arith.cmpi eq, %c8_i32, %c0_i32 : i32
    %c1_i32 = arith.constant 1 : i32
    %15 = arith.select %14, %c1_i32, %c8_i32 : i32
    %16 = vector.broadcast %15 : i32 to vector<64x64xi32>
    %17 = arith.remsi %13, %16 : vector<64x64xi32>
    %c0_i32_7 = arith.constant 0 : i32
    %18 = vector.broadcast %c0_i32_7 : i32 to vector<64x64xi32>
    %19 = arith.cmpi ne, %17, %18 : vector<64x64xi32>
    %c0_i32_8 = arith.constant 0 : i32
    %20 = vector.broadcast %c0_i32_8 : i32 to vector<64x64xi32>
    %21 = arith.cmpi slt, %17, %20 : vector<64x64xi32>
    %c0_i32_9 = arith.constant 0 : i32
    %22 = arith.cmpi slt, %15, %c0_i32_9 : i32
    %23 = vector.broadcast %22 : i1 to vector<64x64xi1>
    %24 = vector.broadcast %23 : vector<64x64xi1> to vector<64x64xi1>
    %25 = arith.xori %21, %24 : vector<64x64xi1>
    %26 = arith.andi %25, %19 : vector<64x64xi1>
    %27 = vector.broadcast %15 : i32 to vector<64x64xi32>
    %28 = arith.addi %17, %27 : vector<64x64xi32>
    %29 = arith.select %26, %28, %17 : vector<64x64xi1>, vector<64x64xi32>
    %c1_i32_10 = arith.constant 1 : i32
    %30 = vector.broadcast %c1_i32_10 : i32 to vector<64x64xi32>
    %31 = arith.cmpi sge, %29, %30 : vector<64x64xi32>
    %c6_i32 = arith.constant 6 : i32
    %32 = vector.broadcast %c6_i32 : i32 to vector<64x64xi32>
    %33 = arith.cmpi sle, %29, %32 : vector<64x64xi32>
    %34 = arith.maximumf %9, %10 : vector<64x64xf32>
    %35 = arith.maximumf %34, %11 : vector<64x64xf32>
    %36 = arith.maximumf %35, %12 : vector<64x64xf32>
    %cst_11 = arith.constant 0.000000e+00 : f32
    %37 = vector.broadcast %cst_11 : f32 to vector<1x64xf32>
    %38 = vector.extract_strided_slice %10 {offsets = [0, 0], sizes = [63, 64], strides = [1, 1]} : vector<64x64xf32> to vector<63x64xf32>
    %39 = tpu.concatenate %37, %38 in 0 : vector<1x64xf32>, vector<63x64xf32> -> vector<64x64xf32>
    %cst_12 = arith.constant 0.000000e+00 : f32
    %40 = vector.broadcast %cst_12 : f32 to vector<64x64xf32>
    %41 = arith.select %31, %39, %40 : vector<64x64xi1>, vector<64x64xf32>
    %42 = arith.maximumf %36, %41 : vector<64x64xf32>
    %cst_13 = arith.constant 0.000000e+00 : f32
    %43 = vector.broadcast %cst_13 : f32 to vector<8x64xf32>
    %44 = vector.extract_strided_slice %11 {offsets = [0, 0], sizes = [56, 64], strides = [1, 1]} : vector<64x64xf32> to vector<56x64xf32>
    %45 = tpu.concatenate %43, %44 in 0 : vector<8x64xf32>, vector<56x64xf32> -> vector<64x64xf32>
    %46 = arith.maximumf %42, %45 : vector<64x64xf32>
    %cst_14 = arith.constant 0.000000e+00 : f32
    %47 = vector.broadcast %cst_14 : f32 to vector<1x64xf32>
    %48 = vector.extract_strided_slice %12 {offsets = [0, 0], sizes = [63, 64], strides = [1, 1]} : vector<64x64xf32> to vector<63x64xf32>
    %49 = tpu.concatenate %47, %48 in 0 : vector<1x64xf32>, vector<63x64xf32> -> vector<64x64xf32>
    %cst_15 = arith.constant 0.000000e+00 : f32
    %50 = vector.broadcast %cst_15 : f32 to vector<64x64xf32>
    %51 = arith.select %31, %49, %50 : vector<64x64xi1>, vector<64x64xf32>
    %52 = arith.maximumf %46, %51 : vector<64x64xf32>
    %cst_16 = arith.constant 0.000000e+00 : f32
    %53 = vector.broadcast %cst_16 : f32 to vector<8x64xf32>
    %54 = vector.extract_strided_slice %12 {offsets = [0, 0], sizes = [56, 64], strides = [1, 1]} : vector<64x64xf32> to vector<56x64xf32>
    %55 = tpu.concatenate %53, %54 in 0 : vector<8x64xf32>, vector<56x64xf32> -> vector<64x64xf32>
    %56 = arith.maximumf %52, %55 : vector<64x64xf32>
    %cst_17 = arith.constant 0.000000e+00 : f32
    %57 = vector.broadcast %cst_17 : f32 to vector<9x64xf32>
    %58 = vector.extract_strided_slice %12 {offsets = [0, 0], sizes = [55, 64], strides = [1, 1]} : vector<64x64xf32> to vector<55x64xf32>
    %59 = tpu.concatenate %57, %58 in 0 : vector<9x64xf32>, vector<55x64xf32> -> vector<64x64xf32>
    %cst_18 = arith.constant 0.000000e+00 : f32
    %60 = vector.broadcast %cst_18 : f32 to vector<64x64xf32>
    %61 = arith.select %31, %59, %60 : vector<64x64xi1>, vector<64x64xf32>
    %62 = arith.maximumf %56, %61 : vector<64x64xf32>
    %c0_19 = arith.constant 0 : index
    %c0_20 = arith.constant 0 : index
    %63 = vector.load %arg5[%c0_19, %c0_20] : memref<4x64xf32, #tpu.memory_space<vmem>>, vector<4x64xf32>
    %cst_21 = arith.constant 0.000000e+00 : f32
    %64 = vector.broadcast %cst_21 : f32 to vector<64x64xf32>
    %cst_22 = arith.constant 0.000000e+00 : f32
    %65 = vector.broadcast %cst_22 : f32 to vector<9x64xf32>
    %66 = vector.extract_strided_slice %62 {offsets = [0, 0], sizes = [55, 64], strides = [1, 1]} : vector<64x64xf32> to vector<55x64xf32>
    %67 = tpu.concatenate %65, %66 in 0 : vector<9x64xf32>, vector<55x64xf32> -> vector<64x64xf32>
    %cst_23 = arith.constant 0.000000e+00 : f32
    %68 = vector.broadcast %cst_23 : f32 to vector<64x64xf32>
    %69 = arith.select %31, %67, %68 : vector<64x64xi1>, vector<64x64xf32>
    %c0_24 = arith.constant 0 : index
    %c0_25 = arith.constant 0 : index
    %c0_26 = arith.constant 0 : index
    %70 = vector.load %arg4[%c0_24, %c0_25, %c0_26] : memref<36x64x64xf32, #tpu.memory_space<vmem>>, vector<1x64x64xf32>
    %71 = vector.shape_cast %70 : vector<1x64x64xf32> to vector<64x64xf32>
    %cst_27 = arith.constant dense<0.000000e+00> : vector<64x64xf32>
    %72 = tpu.matmul %69, %71, %cst_27 {dimension_numbers = #tpu.dot_dimension_numbers<[1], [0], [0], [1], [0, 0, 1, 1], [], []>} : vector<64x64xf32>, vector<64x64xf32>, vector<64x64xf32> -> vector<64x64xf32>
    %73 = arith.addf %64, %72 : vector<64x64xf32>
    %cst_28 = arith.constant 0.000000e+00 : f32
    %74 = vector.broadcast %cst_28 : f32 to vector<8x64xf32>
    %75 = vector.extract_strided_slice %62 {offsets = [0, 0], sizes = [56, 64], strides = [1, 1]} : vector<64x64xf32> to vector<56x64xf32>
    %76 = tpu.concatenate %74, %75 in 0 : vector<8x64xf32>, vector<56x64xf32> -> vector<64x64xf32>
    %c1 = arith.constant 1 : index
    %c0_29 = arith.constant 0 : index
    %c0_30 = arith.constant 0 : index
    %77 = vector.load %arg4[%c1, %c0_29, %c0_30] : memref<36x64x64xf32, #tpu.memory_space<vmem>>, vector<1x64x64xf32>
    %78 = vector.shape_cast %77 : vector<1x64x64xf32> to vector<64x64xf32>
    %cst_31 = arith.constant dense<0.000000e+00> : vector<64x64xf32>
    %79 = tpu.matmul %76, %78, %cst_31 {dimension_numbers = #tpu.dot_dimension_numbers<[1], [0], [0], [1], [0, 0, 1, 1], [], []>} : vector<64x64xf32>, vector<64x64xf32>, vector<64x64xf32> -> vector<64x64xf32>
    %80 = arith.addf %73, %79 : vector<64x64xf32>
    %cst_32 = arith.constant 0.000000e+00 : f32
    %81 = vector.broadcast %cst_32 : f32 to vector<7x64xf32>
    %82 = vector.extract_strided_slice %62 {offsets = [0, 0], sizes = [57, 64], strides = [1, 1]} : vector<64x64xf32> to vector<57x64xf32>
    %83 = tpu.concatenate %81, %82 in 0 : vector<7x64xf32>, vector<57x64xf32> -> vector<64x64xf32>
    %cst_33 = arith.constant 0.000000e+00 : f32
    %84 = vector.broadcast %cst_33 : f32 to vector<64x64xf32>
    %85 = arith.select %33, %83, %84 : vector<64x64xi1>, vector<64x64xf32>
    %c2 = arith.constant 2 : index
    %c0_34 = arith.constant 0 : index
    %c0_35 = arith.constant 0 : index
    %86 = vector.load %arg4[%c2, %c0_34, %c0_35] : memref<36x64x64xf32, #tpu.memory_space<vmem>>, vector<1x64x64xf32>
    %87 = vector.shape_cast %86 : vector<1x64x64xf32> to vector<64x64xf32>
    %cst_36 = arith.constant dense<0.000000e+00> : vector<64x64xf32>
    %88 = tpu.matmul %85, %87, %cst_36 {dimension_numbers = #tpu.dot_dimension_numbers<[1], [0], [0], [1], [0, 0, 1, 1], [], []>} : vector<64x64xf32>, vector<64x64xf32>, vector<64x64xf32> -> vector<64x64xf32>
    %89 = arith.addf %80, %88 : vector<64x64xf32>
    %cst_37 = arith.constant 0.000000e+00 : f32
    %90 = vector.broadcast %cst_37 : f32 to vector<1x64xf32>
    %91 = vector.extract_strided_slice %62 {offsets = [0, 0], sizes = [63, 64], strides = [1, 1]} : vector<64x64xf32> to vector<63x64xf32>
    %92 = tpu.concatenate %90, %91 in 0 : vector<1x64xf32>, vector<63x64xf32> -> vector<64x64xf32>
    %cst_38 = arith.constant 0.000000e+00 : f32
    %93 = vector.broadcast %cst_38 : f32 to vector<64x64xf32>
    %94 = arith.select %31, %92, %93 : vector<64x64xi1>, vector<64x64xf32>
    %c3 = arith.constant 3 : index
    %c0_39 = arith.constant 0 : index
    %c0_40 = arith.constant 0 : index
    %95 = vector.load %arg4[%c3, %c0_39, %c0_40] : memref<36x64x64xf32, #tpu.memory_space<vmem>>, vector<1x64x64xf32>
    %96 = vector.shape_cast %95 : vector<1x64x64xf32> to vector<64x64xf32>
    %cst_41 = arith.constant dense<0.000000e+00> : vector<64x64xf32>
    %97 = tpu.matmul %94, %96, %cst_41 {dimension_numbers = #tpu.dot_dimension_numbers<[1], [0], [0], [1], [0, 0, 1, 1], [], []>} : vector<64x64xf32>, vector<64x64xf32>, vector<64x64xf32> -> vector<64x64xf32>
    %98 = arith.addf %89, %97 : vector<64x64xf32>
    %c4 = arith.constant 4 : index
    %c0_42 = arith.constant 0 : index
    %c0_43 = arith.constant 0 : index
    %99 = vector.load %arg4[%c4, %c0_42, %c0_43] : memref<36x64x64xf32, #tpu.memory_space<vmem>>, vector<1x64x64xf32>
    %100 = vector.shape_cast %99 : vector<1x64x64xf32> to vector<64x64xf32>
    %cst_44 = arith.constant dense<0.000000e+00> : vector<64x64xf32>
    %101 = tpu.matmul %62, %100, %cst_44 {dimension_numbers = #tpu.dot_dimension_numbers<[1], [0], [0], [1], [0, 0, 1, 1], [], []>} : vector<64x64xf32>, vector<64x64xf32>, vector<64x64xf32> -> vector<64x64xf32>
    %102 = arith.addf %98, %101 : vector<64x64xf32>
    %103 = vector.extract_strided_slice %62 {offsets = [1, 0], sizes = [63, 64], strides = [1, 1]} : vector<64x64xf32> to vector<63x64xf32>
    %cst_45 = arith.constant 0.000000e+00 : f32
    %104 = vector.broadcast %cst_45 : f32 to vector<1x64xf32>
    %105 = tpu.concatenate %103, %104 in 0 : vector<63x64xf32>, vector<1x64xf32> -> vector<64x64xf32>
    %cst_46 = arith.constant 0.000000e+00 : f32
    %106 = vector.broadcast %cst_46 : f32 to vector<64x64xf32>
    %107 = arith.select %33, %105, %106 : vector<64x64xi1>, vector<64x64xf32>
    %c5 = arith.constant 5 : index
    %c0_47 = arith.constant 0 : index
    %c0_48 = arith.constant 0 : index
    %108 = vector.load %arg4[%c5, %c0_47, %c0_48] : memref<36x64x64xf32, #tpu.memory_space<vmem>>, vector<1x64x64xf32>
    %109 = vector.shape_cast %108 : vector<1x64x64xf32> to vector<64x64xf32>
    %cst_49 = arith.constant dense<0.000000e+00> : vector<64x64xf32>
    %110 = tpu.matmul %107, %109, %cst_49 {dimension_numbers = #tpu.dot_dimension_numbers<[1], [0], [0], [1], [0, 0, 1, 1], [], []>} : vector<64x64xf32>, vector<64x64xf32>, vector<64x64xf32> -> vector<64x64xf32>
    %111 = arith.addf %102, %110 : vector<64x64xf32>
    %112 = vector.extract_strided_slice %62 {offsets = [7, 0], sizes = [57, 64], strides = [1, 1]} : vector<64x64xf32> to vector<57x64xf32>
    %cst_50 = arith.constant 0.000000e+00 : f32
    %113 = vector.broadcast %cst_50 : f32 to vector<7x64xf32>
    %114 = tpu.concatenate %112, %113 in 0 : vector<57x64xf32>, vector<7x64xf32> -> vector<64x64xf32>
    %cst_51 = arith.constant 0.000000e+00 : f32
    %115 = vector.broadcast %cst_51 : f32 to vector<64x64xf32>
    %116 = arith.select %31, %114, %115 : vector<64x64xi1>, vector<64x64xf32>
    %c6 = arith.constant 6 : index
    %c0_52 = arith.constant 0 : index
    %c0_53 = arith.constant 0 : index
    %117 = vector.load %arg4[%c6, %c0_52, %c0_53] : memref<36x64x64xf32, #tpu.memory_space<vmem>>, vector<1x64x64xf32>
    %118 = vector.shape_cast %117 : vector<1x64x64xf32> to vector<64x64xf32>
    %cst_54 = arith.constant dense<0.000000e+00> : vector<64x64xf32>
    %119 = tpu.matmul %116, %118, %cst_54 {dimension_numbers = #tpu.dot_dimension_numbers<[1], [0], [0], [1], [0, 0, 1, 1], [], []>} : vector<64x64xf32>, vector<64x64xf32>, vector<64x64xf32> -> vector<64x64xf32>
    %120 = arith.addf %111, %119 : vector<64x64xf32>
    %121 = vector.extract_strided_slice %62 {offsets = [8, 0], sizes = [56, 64], strides = [1, 1]} : vector<64x64xf32> to vector<56x64xf32>
    %cst_55 = arith.constant 0.000000e+00 : f32
    %122 = vector.broadcast %cst_55 : f32 to vector<8x64xf32>
    %123 = tpu.concatenate %121, %122 in 0 : vector<56x64xf32>, vector<8x64xf32> -> vector<64x64xf32>
    %c7 = arith.constant 7 : index
    %c0_56 = arith.constant 0 : index
    %c0_57 = arith.constant 0 : index
    %124 = vector.load %arg4[%c7, %c0_56, %c0_57] : memref<36x64x64xf32, #tpu.memory_space<vmem>>, vector<1x64x64xf32>
    %125 = vector.shape_cast %124 : vector<1x64x64xf32> to vector<64x64xf32>
    %cst_58 = arith.constant dense<0.000000e+00> : vector<64x64xf32>
    %126 = tpu.matmul %123, %125, %cst_58 {dimension_numbers = #tpu.dot_dimension_numbers<[1], [0], [0], [1], [0, 0, 1, 1], [], []>} : vector<64x64xf32>, vector<64x64xf32>, vector<64x64xf32> -> vector<64x64xf32>
    %127 = arith.addf %120, %126 : vector<64x64xf32>
    %128 = vector.extract_strided_slice %62 {offsets = [9, 0], sizes = [55, 64], strides = [1, 1]} : vector<64x64xf32> to vector<55x64xf32>
    %cst_59 = arith.constant 0.000000e+00 : f32
    %129 = vector.broadcast %cst_59 : f32 to vector<9x64xf32>
    %130 = tpu.concatenate %128, %129 in 0 : vector<55x64xf32>, vector<9x64xf32> -> vector<64x64xf32>
    %cst_60 = arith.constant 0.000000e+00 : f32
    %131 = vector.broadcast %cst_60 : f32 to vector<64x64xf32>
    %132 = arith.select %33, %130, %131 : vector<64x64xi1>, vector<64x64xf32>
    %c8 = arith.constant 8 : index
    %c0_61 = arith.constant 0 : index
    %c0_62 = arith.constant 0 : index
    %133 = vector.load %arg4[%c8, %c0_61, %c0_62] : memref<36x64x64xf32, #tpu.memory_space<vmem>>, vector<1x64x64xf32>
    %134 = vector.shape_cast %133 : vector<1x64x64xf32> to vector<64x64xf32>
    %cst_63 = arith.constant dense<0.000000e+00> : vector<64x64xf32>
    %135 = tpu.matmul %132, %134, %cst_63 {dimension_numbers = #tpu.dot_dimension_numbers<[1], [0], [0], [1], [0, 0, 1, 1], [], []>} : vector<64x64xf32>, vector<64x64xf32>, vector<64x64xf32> -> vector<64x64xf32>
    %136 = arith.addf %127, %135 : vector<64x64xf32>
    %137 = vector.extract_strided_slice %63 {offsets = [0, 0], sizes = [1, 64], strides = [1, 1]} : vector<4x64xf32> to vector<1x64xf32>
    %138 = vector.broadcast %137 : vector<1x64xf32> to vector<64x64xf32>
    %139 = arith.addf %136, %138 : vector<64x64xf32>
    %cst_64 = arith.constant 0.000000e+00 : f32
    %140 = vector.broadcast %cst_64 : f32 to vector<64x64xf32>
    %141 = arith.maximumf %139, %140 : vector<64x64xf32>
    %cst_65 = arith.constant 0.000000e+00 : f32
    %142 = vector.broadcast %cst_65 : f32 to vector<64x64xf32>
    %cst_66 = arith.constant 0.000000e+00 : f32
    %143 = vector.broadcast %cst_66 : f32 to vector<9x64xf32>
    %144 = vector.extract_strided_slice %141 {offsets = [0, 0], sizes = [55, 64], strides = [1, 1]} : vector<64x64xf32> to vector<55x64xf32>
    %145 = tpu.concatenate %143, %144 in 0 : vector<9x64xf32>, vector<55x64xf32> -> vector<64x64xf32>
    %cst_67 = arith.constant 0.000000e+00 : f32
    %146 = vector.broadcast %cst_67 : f32 to vector<64x64xf32>
    %147 = arith.select %31, %145, %146 : vector<64x64xi1>, vector<64x64xf32>
    %c9 = arith.constant 9 : index
    %c0_68 = arith.constant 0 : index
    %c0_69 = arith.constant 0 : index
    %148 = vector.load %arg4[%c9, %c0_68, %c0_69] : memref<36x64x64xf32, #tpu.memory_space<vmem>>, vector<1x64x64xf32>
    %149 = vector.shape_cast %148 : vector<1x64x64xf32> to vector<64x64xf32>
    %cst_70 = arith.constant dense<0.000000e+00> : vector<64x64xf32>
    %150 = tpu.matmul %147, %149, %cst_70 {dimension_numbers = #tpu.dot_dimension_numbers<[1], [0], [0], [1], [0, 0, 1, 1], [], []>} : vector<64x64xf32>, vector<64x64xf32>, vector<64x64xf32> -> vector<64x64xf32>
    %151 = arith.addf %142, %150 : vector<64x64xf32>
    %cst_71 = arith.constant 0.000000e+00 : f32
    %152 = vector.broadcast %cst_71 : f32 to vector<8x64xf32>
    %153 = vector.extract_strided_slice %141 {offsets = [0, 0], sizes = [56, 64], strides = [1, 1]} : vector<64x64xf32> to vector<56x64xf32>
    %154 = tpu.concatenate %152, %153 in 0 : vector<8x64xf32>, vector<56x64xf32> -> vector<64x64xf32>
    %c10 = arith.constant 10 : index
    %c0_72 = arith.constant 0 : index
    %c0_73 = arith.constant 0 : index
    %155 = vector.load %arg4[%c10, %c0_72, %c0_73] : memref<36x64x64xf32, #tpu.memory_space<vmem>>, vector<1x64x64xf32>
    %156 = vector.shape_cast %155 : vector<1x64x64xf32> to vector<64x64xf32>
    %cst_74 = arith.constant dense<0.000000e+00> : vector<64x64xf32>
    %157 = tpu.matmul %154, %156, %cst_74 {dimension_numbers = #tpu.dot_dimension_numbers<[1], [0], [0], [1], [0, 0, 1, 1], [], []>} : vector<64x64xf32>, vector<64x64xf32>, vector<64x64xf32> -> vector<64x64xf32>
    %158 = arith.addf %151, %157 : vector<64x64xf32>
    %cst_75 = arith.constant 0.000000e+00 : f32
    %159 = vector.broadcast %cst_75 : f32 to vector<7x64xf32>
    %160 = vector.extract_strided_slice %141 {offsets = [0, 0], sizes = [57, 64], strides = [1, 1]} : vector<64x64xf32> to vector<57x64xf32>
    %161 = tpu.concatenate %159, %160 in 0 : vector<7x64xf32>, vector<57x64xf32> -> vector<64x64xf32>
    %cst_76 = arith.constant 0.000000e+00 : f32
    %162 = vector.broadcast %cst_76 : f32 to vector<64x64xf32>
    %163 = arith.select %33, %161, %162 : vector<64x64xi1>, vector<64x64xf32>
    %c11 = arith.constant 11 : index
    %c0_77 = arith.constant 0 : index
    %c0_78 = arith.constant 0 : index
    %164 = vector.load %arg4[%c11, %c0_77, %c0_78] : memref<36x64x64xf32, #tpu.memory_space<vmem>>, vector<1x64x64xf32>
    %165 = vector.shape_cast %164 : vector<1x64x64xf32> to vector<64x64xf32>
    %cst_79 = arith.constant dense<0.000000e+00> : vector<64x64xf32>
    %166 = tpu.matmul %163, %165, %cst_79 {dimension_numbers = #tpu.dot_dimension_numbers<[1], [0], [0], [1], [0, 0, 1, 1], [], []>} : vector<64x64xf32>, vector<64x64xf32>, vector<64x64xf32> -> vector<64x64xf32>
    %167 = arith.addf %158, %166 : vector<64x64xf32>
    %cst_80 = arith.constant 0.000000e+00 : f32
    %168 = vector.broadcast %cst_80 : f32 to vector<1x64xf32>
    %169 = vector.extract_strided_slice %141 {offsets = [0, 0], sizes = [63, 64], strides = [1, 1]} : vector<64x64xf32> to vector<63x64xf32>
    %170 = tpu.concatenate %168, %169 in 0 : vector<1x64xf32>, vector<63x64xf32> -> vector<64x64xf32>
    %cst_81 = arith.constant 0.000000e+00 : f32
    %171 = vector.broadcast %cst_81 : f32 to vector<64x64xf32>
    %172 = arith.select %31, %170, %171 : vector<64x64xi1>, vector<64x64xf32>
    %c12 = arith.constant 12 : index
    %c0_82 = arith.constant 0 : index
    %c0_83 = arith.constant 0 : index
    %173 = vector.load %arg4[%c12, %c0_82, %c0_83] : memref<36x64x64xf32, #tpu.memory_space<vmem>>, vector<1x64x64xf32>
    %174 = vector.shape_cast %173 : vector<1x64x64xf32> to vector<64x64xf32>
    %cst_84 = arith.constant dense<0.000000e+00> : vector<64x64xf32>
    %175 = tpu.matmul %172, %174, %cst_84 {dimension_numbers = #tpu.dot_dimension_numbers<[1], [0], [0], [1], [0, 0, 1, 1], [], []>} : vector<64x64xf32>, vector<64x64xf32>, vector<64x64xf32> -> vector<64x64xf32>
    %176 = arith.addf %167, %175 : vector<64x64xf32>
    %c13 = arith.constant 13 : index
    %c0_85 = arith.constant 0 : index
    %c0_86 = arith.constant 0 : index
    %177 = vector.load %arg4[%c13, %c0_85, %c0_86] : memref<36x64x64xf32, #tpu.memory_space<vmem>>, vector<1x64x64xf32>
    %178 = vector.shape_cast %177 : vector<1x64x64xf32> to vector<64x64xf32>
    %cst_87 = arith.constant dense<0.000000e+00> : vector<64x64xf32>
    %179 = tpu.matmul %141, %178, %cst_87 {dimension_numbers = #tpu.dot_dimension_numbers<[1], [0], [0], [1], [0, 0, 1, 1], [], []>} : vector<64x64xf32>, vector<64x64xf32>, vector<64x64xf32> -> vector<64x64xf32>
    %180 = arith.addf %176, %179 : vector<64x64xf32>
    %181 = vector.extract_strided_slice %141 {offsets = [1, 0], sizes = [63, 64], strides = [1, 1]} : vector<64x64xf32> to vector<63x64xf32>
    %cst_88 = arith.constant 0.000000e+00 : f32
    %182 = vector.broadcast %cst_88 : f32 to vector<1x64xf32>
    %183 = tpu.concatenate %181, %182 in 0 : vector<63x64xf32>, vector<1x64xf32> -> vector<64x64xf32>
    %cst_89 = arith.constant 0.000000e+00 : f32
    %184 = vector.broadcast %cst_89 : f32 to vector<64x64xf32>
    %185 = arith.select %33, %183, %184 : vector<64x64xi1>, vector<64x64xf32>
    %c14 = arith.constant 14 : index
    %c0_90 = arith.constant 0 : index
    %c0_91 = arith.constant 0 : index
    %186 = vector.load %arg4[%c14, %c0_90, %c0_91] : memref<36x64x64xf32, #tpu.memory_space<vmem>>, vector<1x64x64xf32>
    %187 = vector.shape_cast %186 : vector<1x64x64xf32> to vector<64x64xf32>
    %cst_92 = arith.constant dense<0.000000e+00> : vector<64x64xf32>
    %188 = tpu.matmul %185, %187, %cst_92 {dimension_numbers = #tpu.dot_dimension_numbers<[1], [0], [0], [1], [0, 0, 1, 1], [], []>} : vector<64x64xf32>, vector<64x64xf32>, vector<64x64xf32> -> vector<64x64xf32>
    %189 = arith.addf %180, %188 : vector<64x64xf32>
    %190 = vector.extract_strided_slice %141 {offsets = [7, 0], sizes = [57, 64], strides = [1, 1]} : vector<64x64xf32> to vector<57x64xf32>
    %cst_93 = arith.constant 0.000000e+00 : f32
    %191 = vector.broadcast %cst_93 : f32 to vector<7x64xf32>
    %192 = tpu.concatenate %190, %191 in 0 : vector<57x64xf32>, vector<7x64xf32> -> vector<64x64xf32>
    %cst_94 = arith.constant 0.000000e+00 : f32
    %193 = vector.broadcast %cst_94 : f32 to vector<64x64xf32>
    %194 = arith.select %31, %192, %193 : vector<64x64xi1>, vector<64x64xf32>
    %c15 = arith.constant 15 : index
    %c0_95 = arith.constant 0 : index
    %c0_96 = arith.constant 0 : index
    %195 = vector.load %arg4[%c15, %c0_95, %c0_96] : memref<36x64x64xf32, #tpu.memory_space<vmem>>, vector<1x64x64xf32>
    %196 = vector.shape_cast %195 : vector<1x64x64xf32> to vector<64x64xf32>
    %cst_97 = arith.constant dense<0.000000e+00> : vector<64x64xf32>
    %197 = tpu.matmul %194, %196, %cst_97 {dimension_numbers = #tpu.dot_dimension_numbers<[1], [0], [0], [1], [0, 0, 1, 1], [], []>} : vector<64x64xf32>, vector<64x64xf32>, vector<64x64xf32> -> vector<64x64xf32>
    %198 = arith.addf %189, %197 : vector<64x64xf32>
    %199 = vector.extract_strided_slice %141 {offsets = [8, 0], sizes = [56, 64], strides = [1, 1]} : vector<64x64xf32> to vector<56x64xf32>
    %cst_98 = arith.constant 0.000000e+00 : f32
    %200 = vector.broadcast %cst_98 : f32 to vector<8x64xf32>
    %201 = tpu.concatenate %199, %200 in 0 : vector<56x64xf32>, vector<8x64xf32> -> vector<64x64xf32>
    %c16 = arith.constant 16 : index
    %c0_99 = arith.constant 0 : index
    %c0_100 = arith.constant 0 : index
    %202 = vector.load %arg4[%c16, %c0_99, %c0_100] : memref<36x64x64xf32, #tpu.memory_space<vmem>>, vector<1x64x64xf32>
    %203 = vector.shape_cast %202 : vector<1x64x64xf32> to vector<64x64xf32>
    %cst_101 = arith.constant dense<0.000000e+00> : vector<64x64xf32>
    %204 = tpu.matmul %201, %203, %cst_101 {dimension_numbers = #tpu.dot_dimension_numbers<[1], [0], [0], [1], [0, 0, 1, 1], [], []>} : vector<64x64xf32>, vector<64x64xf32>, vector<64x64xf32> -> vector<64x64xf32>
    %205 = arith.addf %198, %204 : vector<64x64xf32>
    %206 = vector.extract_strided_slice %141 {offsets = [9, 0], sizes = [55, 64], strides = [1, 1]} : vector<64x64xf32> to vector<55x64xf32>
    %cst_102 = arith.constant 0.000000e+00 : f32
    %207 = vector.broadcast %cst_102 : f32 to vector<9x64xf32>
    %208 = tpu.concatenate %206, %207 in 0 : vector<55x64xf32>, vector<9x64xf32> -> vector<64x64xf32>
    %cst_103 = arith.constant 0.000000e+00 : f32
    %209 = vector.broadcast %cst_103 : f32 to vector<64x64xf32>
    %210 = arith.select %33, %208, %209 : vector<64x64xi1>, vector<64x64xf32>
    %c17 = arith.constant 17 : index
    %c0_104 = arith.constant 0 : index
    %c0_105 = arith.constant 0 : index
    %211 = vector.load %arg4[%c17, %c0_104, %c0_105] : memref<36x64x64xf32, #tpu.memory_space<vmem>>, vector<1x64x64xf32>
    %212 = vector.shape_cast %211 : vector<1x64x64xf32> to vector<64x64xf32>
    %cst_106 = arith.constant dense<0.000000e+00> : vector<64x64xf32>
    %213 = tpu.matmul %210, %212, %cst_106 {dimension_numbers = #tpu.dot_dimension_numbers<[1], [0], [0], [1], [0, 0, 1, 1], [], []>} : vector<64x64xf32>, vector<64x64xf32>, vector<64x64xf32> -> vector<64x64xf32>
    %214 = arith.addf %205, %213 : vector<64x64xf32>
    %215 = vector.extract_strided_slice %63 {offsets = [1, 0], sizes = [1, 64], strides = [1, 1]} : vector<4x64xf32> to vector<1x64xf32>
    %216 = vector.broadcast %215 : vector<1x64xf32> to vector<64x64xf32>
    %217 = arith.addf %214, %216 : vector<64x64xf32>
    %218 = arith.addf %217, %62 : vector<64x64xf32>
    %cst_107 = arith.constant 0.000000e+00 : f32
    %219 = vector.broadcast %cst_107 : f32 to vector<64x64xf32>
    %220 = arith.maximumf %218, %219 : vector<64x64xf32>
    %cst_108 = arith.constant 0.000000e+00 : f32
    %221 = vector.broadcast %cst_108 : f32 to vector<64x64xf32>
    %cst_109 = arith.constant 0.000000e+00 : f32
    %222 = vector.broadcast %cst_109 : f32 to vector<9x64xf32>
    %223 = vector.extract_strided_slice %220 {offsets = [0, 0], sizes = [55, 64], strides = [1, 1]} : vector<64x64xf32> to vector<55x64xf32>
    %224 = tpu.concatenate %222, %223 in 0 : vector<9x64xf32>, vector<55x64xf32> -> vector<64x64xf32>
    %cst_110 = arith.constant 0.000000e+00 : f32
    %225 = vector.broadcast %cst_110 : f32 to vector<64x64xf32>
    %226 = arith.select %31, %224, %225 : vector<64x64xi1>, vector<64x64xf32>
    %c18 = arith.constant 18 : index
    %c0_111 = arith.constant 0 : index
    %c0_112 = arith.constant 0 : index
    %227 = vector.load %arg4[%c18, %c0_111, %c0_112] : memref<36x64x64xf32, #tpu.memory_space<vmem>>, vector<1x64x64xf32>
    %228 = vector.shape_cast %227 : vector<1x64x64xf32> to vector<64x64xf32>
    %cst_113 = arith.constant dense<0.000000e+00> : vector<64x64xf32>
    %229 = tpu.matmul %226, %228, %cst_113 {dimension_numbers = #tpu.dot_dimension_numbers<[1], [0], [0], [1], [0, 0, 1, 1], [], []>} : vector<64x64xf32>, vector<64x64xf32>, vector<64x64xf32> -> vector<64x64xf32>
    %230 = arith.addf %221, %229 : vector<64x64xf32>
    %cst_114 = arith.constant 0.000000e+00 : f32
    %231 = vector.broadcast %cst_114 : f32 to vector<8x64xf32>
    %232 = vector.extract_strided_slice %220 {offsets = [0, 0], sizes = [56, 64], strides = [1, 1]} : vector<64x64xf32> to vector<56x64xf32>
    %233 = tpu.concatenate %231, %232 in 0 : vector<8x64xf32>, vector<56x64xf32> -> vector<64x64xf32>
    %c19 = arith.constant 19 : index
    %c0_115 = arith.constant 0 : index
    %c0_116 = arith.constant 0 : index
    %234 = vector.load %arg4[%c19, %c0_115, %c0_116] : memref<36x64x64xf32, #tpu.memory_space<vmem>>, vector<1x64x64xf32>
    %235 = vector.shape_cast %234 : vector<1x64x64xf32> to vector<64x64xf32>
    %cst_117 = arith.constant dense<0.000000e+00> : vector<64x64xf32>
    %236 = tpu.matmul %233, %235, %cst_117 {dimension_numbers = #tpu.dot_dimension_numbers<[1], [0], [0], [1], [0, 0, 1, 1], [], []>} : vector<64x64xf32>, vector<64x64xf32>, vector<64x64xf32> -> vector<64x64xf32>
    %237 = arith.addf %230, %236 : vector<64x64xf32>
    %cst_118 = arith.constant 0.000000e+00 : f32
    %238 = vector.broadcast %cst_118 : f32 to vector<7x64xf32>
    %239 = vector.extract_strided_slice %220 {offsets = [0, 0], sizes = [57, 64], strides = [1, 1]} : vector<64x64xf32> to vector<57x64xf32>
    %240 = tpu.concatenate %238, %239 in 0 : vector<7x64xf32>, vector<57x64xf32> -> vector<64x64xf32>
    %cst_119 = arith.constant 0.000000e+00 : f32
    %241 = vector.broadcast %cst_119 : f32 to vector<64x64xf32>
    %242 = arith.select %33, %240, %241 : vector<64x64xi1>, vector<64x64xf32>
    %c20 = arith.constant 20 : index
    %c0_120 = arith.constant 0 : index
    %c0_121 = arith.constant 0 : index
    %243 = vector.load %arg4[%c20, %c0_120, %c0_121] : memref<36x64x64xf32, #tpu.memory_space<vmem>>, vector<1x64x64xf32>
    %244 = vector.shape_cast %243 : vector<1x64x64xf32> to vector<64x64xf32>
    %cst_122 = arith.constant dense<0.000000e+00> : vector<64x64xf32>
    %245 = tpu.matmul %242, %244, %cst_122 {dimension_numbers = #tpu.dot_dimension_numbers<[1], [0], [0], [1], [0, 0, 1, 1], [], []>} : vector<64x64xf32>, vector<64x64xf32>, vector<64x64xf32> -> vector<64x64xf32>
    %246 = arith.addf %237, %245 : vector<64x64xf32>
    %cst_123 = arith.constant 0.000000e+00 : f32
    %247 = vector.broadcast %cst_123 : f32 to vector<1x64xf32>
    %248 = vector.extract_strided_slice %220 {offsets = [0, 0], sizes = [63, 64], strides = [1, 1]} : vector<64x64xf32> to vector<63x64xf32>
    %249 = tpu.concatenate %247, %248 in 0 : vector<1x64xf32>, vector<63x64xf32> -> vector<64x64xf32>
    %cst_124 = arith.constant 0.000000e+00 : f32
    %250 = vector.broadcast %cst_124 : f32 to vector<64x64xf32>
    %251 = arith.select %31, %249, %250 : vector<64x64xi1>, vector<64x64xf32>
    %c21 = arith.constant 21 : index
    %c0_125 = arith.constant 0 : index
    %c0_126 = arith.constant 0 : index
    %252 = vector.load %arg4[%c21, %c0_125, %c0_126] : memref<36x64x64xf32, #tpu.memory_space<vmem>>, vector<1x64x64xf32>
    %253 = vector.shape_cast %252 : vector<1x64x64xf32> to vector<64x64xf32>
    %cst_127 = arith.constant dense<0.000000e+00> : vector<64x64xf32>
    %254 = tpu.matmul %251, %253, %cst_127 {dimension_numbers = #tpu.dot_dimension_numbers<[1], [0], [0], [1], [0, 0, 1, 1], [], []>} : vector<64x64xf32>, vector<64x64xf32>, vector<64x64xf32> -> vector<64x64xf32>
    %255 = arith.addf %246, %254 : vector<64x64xf32>
    %c22 = arith.constant 22 : index
    %c0_128 = arith.constant 0 : index
    %c0_129 = arith.constant 0 : index
    %256 = vector.load %arg4[%c22, %c0_128, %c0_129] : memref<36x64x64xf32, #tpu.memory_space<vmem>>, vector<1x64x64xf32>
    %257 = vector.shape_cast %256 : vector<1x64x64xf32> to vector<64x64xf32>
    %cst_130 = arith.constant dense<0.000000e+00> : vector<64x64xf32>
    %258 = tpu.matmul %220, %257, %cst_130 {dimension_numbers = #tpu.dot_dimension_numbers<[1], [0], [0], [1], [0, 0, 1, 1], [], []>} : vector<64x64xf32>, vector<64x64xf32>, vector<64x64xf32> -> vector<64x64xf32>
    %259 = arith.addf %255, %258 : vector<64x64xf32>
    %260 = vector.extract_strided_slice %220 {offsets = [1, 0], sizes = [63, 64], strides = [1, 1]} : vector<64x64xf32> to vector<63x64xf32>
    %cst_131 = arith.constant 0.000000e+00 : f32
    %261 = vector.broadcast %cst_131 : f32 to vector<1x64xf32>
    %262 = tpu.concatenate %260, %261 in 0 : vector<63x64xf32>, vector<1x64xf32> -> vector<64x64xf32>
    %cst_132 = arith.constant 0.000000e+00 : f32
    %263 = vector.broadcast %cst_132 : f32 to vector<64x64xf32>
    %264 = arith.select %33, %262, %263 : vector<64x64xi1>, vector<64x64xf32>
    %c23 = arith.constant 23 : index
    %c0_133 = arith.constant 0 : index
    %c0_134 = arith.constant 0 : index
    %265 = vector.load %arg4[%c23, %c0_133, %c0_134] : memref<36x64x64xf32, #tpu.memory_space<vmem>>, vector<1x64x64xf32>
    %266 = vector.shape_cast %265 : vector<1x64x64xf32> to vector<64x64xf32>
    %cst_135 = arith.constant dense<0.000000e+00> : vector<64x64xf32>
    %267 = tpu.matmul %264, %266, %cst_135 {dimension_numbers = #tpu.dot_dimension_numbers<[1], [0], [0], [1], [0, 0, 1, 1], [], []>} : vector<64x64xf32>, vector<64x64xf32>, vector<64x64xf32> -> vector<64x64xf32>
    %268 = arith.addf %259, %267 : vector<64x64xf32>
    %269 = vector.extract_strided_slice %220 {offsets = [7, 0], sizes = [57, 64], strides = [1, 1]} : vector<64x64xf32> to vector<57x64xf32>
    %cst_136 = arith.constant 0.000000e+00 : f32
    %270 = vector.broadcast %cst_136 : f32 to vector<7x64xf32>
    %271 = tpu.concatenate %269, %270 in 0 : vector<57x64xf32>, vector<7x64xf32> -> vector<64x64xf32>
    %cst_137 = arith.constant 0.000000e+00 : f32
    %272 = vector.broadcast %cst_137 : f32 to vector<64x64xf32>
    %273 = arith.select %31, %271, %272 : vector<64x64xi1>, vector<64x64xf32>
    %c24 = arith.constant 24 : index
    %c0_138 = arith.constant 0 : index
    %c0_139 = arith.constant 0 : index
    %274 = vector.load %arg4[%c24, %c0_138, %c0_139] : memref<36x64x64xf32, #tpu.memory_space<vmem>>, vector<1x64x64xf32>
    %275 = vector.shape_cast %274 : vector<1x64x64xf32> to vector<64x64xf32>
    %cst_140 = arith.constant dense<0.000000e+00> : vector<64x64xf32>
    %276 = tpu.matmul %273, %275, %cst_140 {dimension_numbers = #tpu.dot_dimension_numbers<[1], [0], [0], [1], [0, 0, 1, 1], [], []>} : vector<64x64xf32>, vector<64x64xf32>, vector<64x64xf32> -> vector<64x64xf32>
    %277 = arith.addf %268, %276 : vector<64x64xf32>
    %278 = vector.extract_strided_slice %220 {offsets = [8, 0], sizes = [56, 64], strides = [1, 1]} : vector<64x64xf32> to vector<56x64xf32>
    %cst_141 = arith.constant 0.000000e+00 : f32
    %279 = vector.broadcast %cst_141 : f32 to vector<8x64xf32>
    %280 = tpu.concatenate %278, %279 in 0 : vector<56x64xf32>, vector<8x64xf32> -> vector<64x64xf32>
    %c25 = arith.constant 25 : index
    %c0_142 = arith.constant 0 : index
    %c0_143 = arith.constant 0 : index
    %281 = vector.load %arg4[%c25, %c0_142, %c0_143] : memref<36x64x64xf32, #tpu.memory_space<vmem>>, vector<1x64x64xf32>
    %282 = vector.shape_cast %281 : vector<1x64x64xf32> to vector<64x64xf32>
    %cst_144 = arith.constant dense<0.000000e+00> : vector<64x64xf32>
    %283 = tpu.matmul %280, %282, %cst_144 {dimension_numbers = #tpu.dot_dimension_numbers<[1], [0], [0], [1], [0, 0, 1, 1], [], []>} : vector<64x64xf32>, vector<64x64xf32>, vector<64x64xf32> -> vector<64x64xf32>
    %284 = arith.addf %277, %283 : vector<64x64xf32>
    %285 = vector.extract_strided_slice %220 {offsets = [9, 0], sizes = [55, 64], strides = [1, 1]} : vector<64x64xf32> to vector<55x64xf32>
    %cst_145 = arith.constant 0.000000e+00 : f32
    %286 = vector.broadcast %cst_145 : f32 to vector<9x64xf32>
    %287 = tpu.concatenate %285, %286 in 0 : vector<55x64xf32>, vector<9x64xf32> -> vector<64x64xf32>
    %cst_146 = arith.constant 0.000000e+00 : f32
    %288 = vector.broadcast %cst_146 : f32 to vector<64x64xf32>
    %289 = arith.select %33, %287, %288 : vector<64x64xi1>, vector<64x64xf32>
    %c26 = arith.constant 26 : index
    %c0_147 = arith.constant 0 : index
    %c0_148 = arith.constant 0 : index
    %290 = vector.load %arg4[%c26, %c0_147, %c0_148] : memref<36x64x64xf32, #tpu.memory_space<vmem>>, vector<1x64x64xf32>
    %291 = vector.shape_cast %290 : vector<1x64x64xf32> to vector<64x64xf32>
    %cst_149 = arith.constant dense<0.000000e+00> : vector<64x64xf32>
    %292 = tpu.matmul %289, %291, %cst_149 {dimension_numbers = #tpu.dot_dimension_numbers<[1], [0], [0], [1], [0, 0, 1, 1], [], []>} : vector<64x64xf32>, vector<64x64xf32>, vector<64x64xf32> -> vector<64x64xf32>
    %293 = arith.addf %284, %292 : vector<64x64xf32>
    %294 = vector.extract_strided_slice %63 {offsets = [2, 0], sizes = [1, 64], strides = [1, 1]} : vector<4x64xf32> to vector<1x64xf32>
    %295 = vector.broadcast %294 : vector<1x64xf32> to vector<64x64xf32>
    %296 = arith.addf %293, %295 : vector<64x64xf32>
    %cst_150 = arith.constant 0.000000e+00 : f32
    %297 = vector.broadcast %cst_150 : f32 to vector<64x64xf32>
    %298 = arith.maximumf %296, %297 : vector<64x64xf32>
    %cst_151 = arith.constant 0.000000e+00 : f32
    %299 = vector.broadcast %cst_151 : f32 to vector<64x64xf32>
    %cst_152 = arith.constant 0.000000e+00 : f32
    %300 = vector.broadcast %cst_152 : f32 to vector<9x64xf32>
    %301 = vector.extract_strided_slice %298 {offsets = [0, 0], sizes = [55, 64], strides = [1, 1]} : vector<64x64xf32> to vector<55x64xf32>
    %302 = tpu.concatenate %300, %301 in 0 : vector<9x64xf32>, vector<55x64xf32> -> vector<64x64xf32>
    %cst_153 = arith.constant 0.000000e+00 : f32
    %303 = vector.broadcast %cst_153 : f32 to vector<64x64xf32>
    %304 = arith.select %31, %302, %303 : vector<64x64xi1>, vector<64x64xf32>
    %c27 = arith.constant 27 : index
    %c0_154 = arith.constant 0 : index
    %c0_155 = arith.constant 0 : index
    %305 = vector.load %arg4[%c27, %c0_154, %c0_155] : memref<36x64x64xf32, #tpu.memory_space<vmem>>, vector<1x64x64xf32>
    %306 = vector.shape_cast %305 : vector<1x64x64xf32> to vector<64x64xf32>
    %cst_156 = arith.constant dense<0.000000e+00> : vector<64x64xf32>
    %307 = tpu.matmul %304, %306, %cst_156 {dimension_numbers = #tpu.dot_dimension_numbers<[1], [0], [0], [1], [0, 0, 1, 1], [], []>} : vector<64x64xf32>, vector<64x64xf32>, vector<64x64xf32> -> vector<64x64xf32>
    %308 = arith.addf %299, %307 : vector<64x64xf32>
    %cst_157 = arith.constant 0.000000e+00 : f32
    %309 = vector.broadcast %cst_157 : f32 to vector<8x64xf32>
    %310 = vector.extract_strided_slice %298 {offsets = [0, 0], sizes = [56, 64], strides = [1, 1]} : vector<64x64xf32> to vector<56x64xf32>
    %311 = tpu.concatenate %309, %310 in 0 : vector<8x64xf32>, vector<56x64xf32> -> vector<64x64xf32>
    %c28 = arith.constant 28 : index
    %c0_158 = arith.constant 0 : index
    %c0_159 = arith.constant 0 : index
    %312 = vector.load %arg4[%c28, %c0_158, %c0_159] : memref<36x64x64xf32, #tpu.memory_space<vmem>>, vector<1x64x64xf32>
    %313 = vector.shape_cast %312 : vector<1x64x64xf32> to vector<64x64xf32>
    %cst_160 = arith.constant dense<0.000000e+00> : vector<64x64xf32>
    %314 = tpu.matmul %311, %313, %cst_160 {dimension_numbers = #tpu.dot_dimension_numbers<[1], [0], [0], [1], [0, 0, 1, 1], [], []>} : vector<64x64xf32>, vector<64x64xf32>, vector<64x64xf32> -> vector<64x64xf32>
    %315 = arith.addf %308, %314 : vector<64x64xf32>
    %cst_161 = arith.constant 0.000000e+00 : f32
    %316 = vector.broadcast %cst_161 : f32 to vector<7x64xf32>
    %317 = vector.extract_strided_slice %298 {offsets = [0, 0], sizes = [57, 64], strides = [1, 1]} : vector<64x64xf32> to vector<57x64xf32>
    %318 = tpu.concatenate %316, %317 in 0 : vector<7x64xf32>, vector<57x64xf32> -> vector<64x64xf32>
    %cst_162 = arith.constant 0.000000e+00 : f32
    %319 = vector.broadcast %cst_162 : f32 to vector<64x64xf32>
    %320 = arith.select %33, %318, %319 : vector<64x64xi1>, vector<64x64xf32>
    %c29 = arith.constant 29 : index
    %c0_163 = arith.constant 0 : index
    %c0_164 = arith.constant 0 : index
    %321 = vector.load %arg4[%c29, %c0_163, %c0_164] : memref<36x64x64xf32, #tpu.memory_space<vmem>>, vector<1x64x64xf32>
    %322 = vector.shape_cast %321 : vector<1x64x64xf32> to vector<64x64xf32>
    %cst_165 = arith.constant dense<0.000000e+00> : vector<64x64xf32>
    %323 = tpu.matmul %320, %322, %cst_165 {dimension_numbers = #tpu.dot_dimension_numbers<[1], [0], [0], [1], [0, 0, 1, 1], [], []>} : vector<64x64xf32>, vector<64x64xf32>, vector<64x64xf32> -> vector<64x64xf32>
    %324 = arith.addf %315, %323 : vector<64x64xf32>
    %cst_166 = arith.constant 0.000000e+00 : f32
    %325 = vector.broadcast %cst_166 : f32 to vector<1x64xf32>
    %326 = vector.extract_strided_slice %298 {offsets = [0, 0], sizes = [63, 64], strides = [1, 1]} : vector<64x64xf32> to vector<63x64xf32>
    %327 = tpu.concatenate %325, %326 in 0 : vector<1x64xf32>, vector<63x64xf32> -> vector<64x64xf32>
    %cst_167 = arith.constant 0.000000e+00 : f32
    %328 = vector.broadcast %cst_167 : f32 to vector<64x64xf32>
    %329 = arith.select %31, %327, %328 : vector<64x64xi1>, vector<64x64xf32>
    %c30 = arith.constant 30 : index
    %c0_168 = arith.constant 0 : index
    %c0_169 = arith.constant 0 : index
    %330 = vector.load %arg4[%c30, %c0_168, %c0_169] : memref<36x64x64xf32, #tpu.memory_space<vmem>>, vector<1x64x64xf32>
    %331 = vector.shape_cast %330 : vector<1x64x64xf32> to vector<64x64xf32>
    %cst_170 = arith.constant dense<0.000000e+00> : vector<64x64xf32>
    %332 = tpu.matmul %329, %331, %cst_170 {dimension_numbers = #tpu.dot_dimension_numbers<[1], [0], [0], [1], [0, 0, 1, 1], [], []>} : vector<64x64xf32>, vector<64x64xf32>, vector<64x64xf32> -> vector<64x64xf32>
    %333 = arith.addf %324, %332 : vector<64x64xf32>
    %c31 = arith.constant 31 : index
    %c0_171 = arith.constant 0 : index
    %c0_172 = arith.constant 0 : index
    %334 = vector.load %arg4[%c31, %c0_171, %c0_172] : memref<36x64x64xf32, #tpu.memory_space<vmem>>, vector<1x64x64xf32>
    %335 = vector.shape_cast %334 : vector<1x64x64xf32> to vector<64x64xf32>
    %cst_173 = arith.constant dense<0.000000e+00> : vector<64x64xf32>
    %336 = tpu.matmul %298, %335, %cst_173 {dimension_numbers = #tpu.dot_dimension_numbers<[1], [0], [0], [1], [0, 0, 1, 1], [], []>} : vector<64x64xf32>, vector<64x64xf32>, vector<64x64xf32> -> vector<64x64xf32>
    %337 = arith.addf %333, %336 : vector<64x64xf32>
    %338 = vector.extract_strided_slice %298 {offsets = [1, 0], sizes = [63, 64], strides = [1, 1]} : vector<64x64xf32> to vector<63x64xf32>
    %cst_174 = arith.constant 0.000000e+00 : f32
    %339 = vector.broadcast %cst_174 : f32 to vector<1x64xf32>
    %340 = tpu.concatenate %338, %339 in 0 : vector<63x64xf32>, vector<1x64xf32> -> vector<64x64xf32>
    %cst_175 = arith.constant 0.000000e+00 : f32
    %341 = vector.broadcast %cst_175 : f32 to vector<64x64xf32>
    %342 = arith.select %33, %340, %341 : vector<64x64xi1>, vector<64x64xf32>
    %c32 = arith.constant 32 : index
    %c0_176 = arith.constant 0 : index
    %c0_177 = arith.constant 0 : index
    %343 = vector.load %arg4[%c32, %c0_176, %c0_177] : memref<36x64x64xf32, #tpu.memory_space<vmem>>, vector<1x64x64xf32>
    %344 = vector.shape_cast %343 : vector<1x64x64xf32> to vector<64x64xf32>
    %cst_178 = arith.constant dense<0.000000e+00> : vector<64x64xf32>
    %345 = tpu.matmul %342, %344, %cst_178 {dimension_numbers = #tpu.dot_dimension_numbers<[1], [0], [0], [1], [0, 0, 1, 1], [], []>} : vector<64x64xf32>, vector<64x64xf32>, vector<64x64xf32> -> vector<64x64xf32>
    %346 = arith.addf %337, %345 : vector<64x64xf32>
    %347 = vector.extract_strided_slice %298 {offsets = [7, 0], sizes = [57, 64], strides = [1, 1]} : vector<64x64xf32> to vector<57x64xf32>
    %cst_179 = arith.constant 0.000000e+00 : f32
    %348 = vector.broadcast %cst_179 : f32 to vector<7x64xf32>
    %349 = tpu.concatenate %347, %348 in 0 : vector<57x64xf32>, vector<7x64xf32> -> vector<64x64xf32>
    %cst_180 = arith.constant 0.000000e+00 : f32
    %350 = vector.broadcast %cst_180 : f32 to vector<64x64xf32>
    %351 = arith.select %31, %349, %350 : vector<64x64xi1>, vector<64x64xf32>
    %c33 = arith.constant 33 : index
    %c0_181 = arith.constant 0 : index
    %c0_182 = arith.constant 0 : index
    %352 = vector.load %arg4[%c33, %c0_181, %c0_182] : memref<36x64x64xf32, #tpu.memory_space<vmem>>, vector<1x64x64xf32>
    %353 = vector.shape_cast %352 : vector<1x64x64xf32> to vector<64x64xf32>
    %cst_183 = arith.constant dense<0.000000e+00> : vector<64x64xf32>
    %354 = tpu.matmul %351, %353, %cst_183 {dimension_numbers = #tpu.dot_dimension_numbers<[1], [0], [0], [1], [0, 0, 1, 1], [], []>} : vector<64x64xf32>, vector<64x64xf32>, vector<64x64xf32> -> vector<64x64xf32>
    %355 = arith.addf %346, %354 : vector<64x64xf32>
    %356 = vector.extract_strided_slice %298 {offsets = [8, 0], sizes = [56, 64], strides = [1, 1]} : vector<64x64xf32> to vector<56x64xf32>
    %cst_184 = arith.constant 0.000000e+00 : f32
    %357 = vector.broadcast %cst_184 : f32 to vector<8x64xf32>
    %358 = tpu.concatenate %356, %357 in 0 : vector<56x64xf32>, vector<8x64xf32> -> vector<64x64xf32>
    %c34 = arith.constant 34 : index
    %c0_185 = arith.constant 0 : index
    %c0_186 = arith.constant 0 : index
    %359 = vector.load %arg4[%c34, %c0_185, %c0_186] : memref<36x64x64xf32, #tpu.memory_space<vmem>>, vector<1x64x64xf32>
    %360 = vector.shape_cast %359 : vector<1x64x64xf32> to vector<64x64xf32>
    %cst_187 = arith.constant dense<0.000000e+00> : vector<64x64xf32>
    %361 = tpu.matmul %358, %360, %cst_187 {dimension_numbers = #tpu.dot_dimension_numbers<[1], [0], [0], [1], [0, 0, 1, 1], [], []>} : vector<64x64xf32>, vector<64x64xf32>, vector<64x64xf32> -> vector<64x64xf32>
    %362 = arith.addf %355, %361 : vector<64x64xf32>
    %363 = vector.extract_strided_slice %298 {offsets = [9, 0], sizes = [55, 64], strides = [1, 1]} : vector<64x64xf32> to vector<55x64xf32>
    %cst_188 = arith.constant 0.000000e+00 : f32
    %364 = vector.broadcast %cst_188 : f32 to vector<9x64xf32>
    %365 = tpu.concatenate %363, %364 in 0 : vector<55x64xf32>, vector<9x64xf32> -> vector<64x64xf32>
    %cst_189 = arith.constant 0.000000e+00 : f32
    %366 = vector.broadcast %cst_189 : f32 to vector<64x64xf32>
    %367 = arith.select %33, %365, %366 : vector<64x64xi1>, vector<64x64xf32>
    %c35 = arith.constant 35 : index
    %c0_190 = arith.constant 0 : index
    %c0_191 = arith.constant 0 : index
    %368 = vector.load %arg4[%c35, %c0_190, %c0_191] : memref<36x64x64xf32, #tpu.memory_space<vmem>>, vector<1x64x64xf32>
    %369 = vector.shape_cast %368 : vector<1x64x64xf32> to vector<64x64xf32>
    %cst_192 = arith.constant dense<0.000000e+00> : vector<64x64xf32>
    %370 = tpu.matmul %367, %369, %cst_192 {dimension_numbers = #tpu.dot_dimension_numbers<[1], [0], [0], [1], [0, 0, 1, 1], [], []>} : vector<64x64xf32>, vector<64x64xf32>, vector<64x64xf32> -> vector<64x64xf32>
    %371 = arith.addf %362, %370 : vector<64x64xf32>
    %372 = vector.extract_strided_slice %63 {offsets = [3, 0], sizes = [1, 64], strides = [1, 1]} : vector<4x64xf32> to vector<1x64xf32>
    %373 = vector.broadcast %372 : vector<1x64xf32> to vector<64x64xf32>
    %374 = arith.addf %371, %373 : vector<64x64xf32>
    %375 = arith.addf %374, %220 : vector<64x64xf32>
    %cst_193 = arith.constant 0.000000e+00 : f32
    %376 = vector.broadcast %cst_193 : f32 to vector<64x64xf32>
    %377 = arith.maximumf %375, %376 : vector<64x64xf32>
    %c0_194 = arith.constant 0 : index
    %c0_195 = arith.constant 0 : index
    %c0_196 = arith.constant 0 : index
    %378 = vector.load %arg6[%c0_194, %c0_195, %c0_196] : memref<1x64x64xf32, #tpu.memory_space<vmem>>, vector<1x64x64xf32>
    %379 = vector.shape_cast %378 : vector<1x64x64xf32> to vector<64x64xf32>
    %380 = vector.shape_cast %377 : vector<64x64xf32> to vector<1x64x64xf32>
    tpu.vector_store %arg6[%c0_194, %c0_195, %c0_196], %380 {strides = array<i32>} : memref<1x64x64xf32, #tpu.memory_space<vmem>>, vector<1x64x64xf32>,
    return
  }
  func.func @transform_0(%arg0: i32) -> (i32, i32, i32) {
    %c0_i32 = arith.constant 0 : i32
    %c0_i32_0 = arith.constant 0 : i32
    %c0_i32_1 = arith.constant 0 : i32
    return %arg0, %c0_i32, %c0_i32_0 : i32, i32, i32
  }
  func.func @transform_1(%arg0: i32) -> (i32, i32) {
    %c0_i32 = arith.constant 0 : i32
    %c0_i32_0 = arith.constant 0 : i32
    %c0_i32_1 = arith.constant 0 : i32
    return %c0_i32, %c0_i32_0 : i32, i32
  }
  func.func @transform_2(%arg0: i32) -> (i32, i32) {
    %c0_i32 = arith.constant 0 : i32
    %c0_i32_0 = arith.constant 0 : i32
    %c0_i32_1 = arith.constant 0 : i32
    return %c0_i32, %c0_i32_0 : i32, i32
  }
  func.func @transform_3(%arg0: i32) -> (i32, i32, i32) {
    %c0_i32 = arith.constant 0 : i32
    %c0_i32_0 = arith.constant 0 : i32
    %c0_i32_1 = arith.constant 0 : i32
    %c0_i32_2 = arith.constant 0 : i32
    return %c0_i32, %c0_i32_0, %c0_i32_1 : i32, i32, i32
  }
  func.func @transform_4(%arg0: i32) -> (i32, i32) {
    %c0_i32 = arith.constant 0 : i32
    %c0_i32_0 = arith.constant 0 : i32
    %c0_i32_1 = arith.constant 0 : i32
    return %c0_i32, %c0_i32_0 : i32, i32
  }
  func.func @transform_5(%arg0: i32) -> (i32, i32, i32) {
    %c0_i32 = arith.constant 0 : i32
    %c0_i32_0 = arith.constant 0 : i32
    %c0_i32_1 = arith.constant 0 : i32
    return %arg0, %c0_i32, %c0_i32_0 : i32, i32, i32
  }
}

</mosaic_0001>

<bundles_post_ra>
// kernel: partial_resnet_forward_pallas.1
= control target key start
LH: loop header
LB: loop body
LE: loop exit
PB: predicated region body
PF: predicated region fallthrough
CT: control target
= control target key end

     0   :  { %10 = vsyncpa [#allocation3], 0  ;;  %s8203_s0 = inlined_call_operand.vmem [shape: f32[2,256,256], index: 0, kind: input, shape index: {}]   ;;  %s8204_s1 = inlined_call_operand.vmem [shape: f32[256,64], index: 1, kind: input, shape index: {}]   ;;  %s8205_s2 = inlined_call_operand.vmem [shape: f32[1,64], index: 2, kind: input, shape index: {}]   ;;  %s8206_s3 = inlined_call_operand.vmem [shape: f32[36,64,64], index: 3, kind: input, shape index: {}]   ;;  %s8207_s4 = inlined_call_operand.vmem [shape: f32[4,64], index: 4, kind: input, shape index: {}]   ;;  %s8208_s5 = inlined_call_operand.hbm [shape: f32[2,64,64], index: 5, kind: output, shape index: {}]  }
   0x1   :  { %12 = vsyncpa [#allocation3 + $0x1], 0  ;;  %s4816_s18 = smov 0   ;;  %s4818_s19 = smov 0  }
   0x2   :  { %s4820_s20 = smov 0   ;;  %s4822_s21 = smov 0  }
   0x3 LB: > { %s4837_s22 = sadd.s32 4294967295, %s4781_s21   ;;  %s4093_s23 = sadd.s32 4294967294, %s4781_s21   ;;  %s4781_s21 = sphi %s4822_s21, %s8636_s21   ;;  %s4777_s20 = sphi %s4820_s20, %s8635_s20   ;;  %s4773_s19 = sphi %s4818_s19, %s8634_s19   ;;  %s4769_s18 = sphi %s4816_s18, %s8633_s18  }
   0x4   : > { %s4841_s24 = sadd.s32 1, %s4781_s21   ;;  %s135_s25 = sadd.s32 1, %s4777_s20 }
   0x5   : > { %s132_s26 = ssub.s32 %s4781_s21, %s4841_s24  ;;  %p145_p0 = scmp.ne.s32.totalorder %s4777_s20, %s4773_s19 }
   0x6   : > { %p133_p1 = scmp.eq.s32.totalorder %s132_s26, 0  ;;  %p146_p2 = scmp.eq.s32.totalorder %s4837_s22, 1 }
   0x7   : > { %p151_p3 = scmp.ne.s32.totalorder %s4773_s19, %s4769_s18  ;;  %p152_p4 = scmp.eq.s32.totalorder %s4093_s23, 1 }
   0x8   : > { %s4852_s27 = scalar_select %p133_p1, %s4777_s20, %s135_s25  }
   0x9   : > { %p4854_p5 = por %p146_p2, %p145_p0  ;;  %p4858_p6 = por %p152_p4, %p151_p3 }
   0xa   : > { %p4096_p7 = scmp.ge.s32.totalorder %s4781_s21, 1  ;;  %p190_p8 = scmp.lt.s32.totalorder %s4781_s21, 3 }
   0xc   : > { %p191_p9 = pnand %p4096_p7, %p190_p8 }
   0xe   : > { %194 = sbr.rel (%p191_p9) target bundleno = 1592 (0x638), region = 40 }
  0x13   : > { %v302_v0 = vld [vmem:[%s8204_s1 + $0x78] sm:$0xff]  ;;  %v301_v1 = vld [vmem:[%s8204_s1 + $0x70] sm:$0xff]  ;;  %v300_v4 = vld [vmem:[%s8204_s1 + $0x68] sm:$0xff]  ;;  %p218_p10 = scmp.lt.s32.totalorder %s4837_s22, 1  ;;  %vm8214_vm0 = vcmask 1040384   ;;  %vm8241_vm3 = vcmask 523264  }
  0x14   : > { %v318_v2 = vld [vmem:[%s8204_s1 + $0xf8] sm:$0xff]  ;;  %323 = vmatpush.msra.mxu0 %v302_v0  ;;  %v317_v3 = vld [vmem:[%s8204_s1 + $0xf0] sm:$0xff]  ;;  %v316_v5 = vld [vmem:[%s8204_s1 + $0xe8] sm:$0xff]  ;;  %vm8215_vm10 = vcmask 1046528   ;;  %s215_s16 = sand.u32 1, %s4773_s19   ;;  %s4658_s26 = sshll.u32 %s4837_s22, 6 }
  0x15   : > { %436 = vmatpush.msra.mxu1 %v318_v2  ;;  %v299_v6 = vld [vmem:[%s8204_s1 + $0x60] sm:$0xff]  ;;  %v298_v8 = vld [vmem:[%s8204_s1 + $0x58] sm:$0xff]  ;;  %v297_v10 = vld [vmem:[%s8204_s1 + $0x50] sm:$0xff]  ;;  %s219_s17 = scalar_select %p218_p10, %s4837_s22, 1 }
  0x16   : > { %324 = vmatpush.msra.mxu0 %v301_v1  ;;  %v315_v7 = vld [vmem:[%s8204_s1 + $0xe0] sm:$0xff]  ;;  %v314_v9 = vld [vmem:[%s8204_s1 + $0xd8] sm:$0xff]  ;;  %v313_v11 = vld [vmem:[%s8204_s1 + $0xd0] sm:$0xff]  ;;  %s4097_s23 = sshll.u32 %s215_s16, 6  ;;  %s4027_s6 = scalar_lea.hbm %s8208_s5, %s4658_s26 }
  0x17   : > { %437 = vmatpush.msra.mxu1 %v317_v3  ;;  %v296_v12 = vld [vmem:[%s8204_s1 + $0x48] sm:$0xff]  ;;  %v295_v14 = vld [vmem:[%s8204_s1 + $0x40] sm:$0xff]  ;;  %v294_v16 = vld [vmem:[%s8204_s1 + $0x38] sm:$0xff]  ;;  %s4657_s10 = sshll.u32 %s219_s17, 9  ;;  %s8120_s25 = scalar_lea.vmem [#allocation2], %s4097_s23 }
  0x18   : > { %325 = vmatpush.msra.mxu0 %v300_v4  ;;  %v312_v13 = vld [vmem:[%s8204_s1 + $0xc8] sm:$0xff]  ;;  %v311_v15 = vld [vmem:[%s8204_s1 + $0xc0] sm:$0xff]  ;;  %v310_v17 = vld [vmem:[%s8204_s1 + $0xb8] sm:$0xff]  ;;  %s4959_s30 = scalar_lea.vmem %s8203_s0, %s4657_s10  ;;  %s4028_s7 = sshll.u32 %s8120_s25, 4  ;;  %s4029_s7 = int_to_ptr.vmem [resolvable:$true] %s4028_s7 }
  0x19   : > { %438 = vmatpush.msra.mxu1 %v316_v5  ;;  %v293_v18 = vld [vmem:[%s8204_s1 + $0x30] sm:$0xff]  ;;  %v292_v20 = vld [vmem:[%s8204_s1 + $0x28] sm:$0xff]  ;;  %v291_v22 = vld [vmem:[%s8204_s1 + $0x20] sm:$0xff]  ;;  %s4030_s8 = sshll.u32 %s4027_s6, 4  ;;  %s4016_s22 = scalar_lea.sflag [#allocation3], %s215_s16  ;;  %s4031_s8 = int_to_ptr.hbm [resolvable:$true] %s4030_s8 }
  0x1a   : > { %326 = vmatpush.msra.mxu0 %v299_v6  ;;  %v309_v19 = vld [vmem:[%s8204_s1 + $0xb0] sm:$0xff]  ;;  %v308_v21 = vld [vmem:[%s8204_s1 + $0xa8] sm:$0xff]  ;;  %v307_v23 = vld [vmem:[%s8204_s1 + $0xa0] sm:$0xff]  ;;  %s4733_s9 = sshra.s32 %s4031_s8, 4  ;;  %s4739_s13 = scalar_lea.hbm %s8208_s5, 128  ;;  %s4734_s9 = int_to_ptr.hbm [resolvable:$true] %s4733_s9 }
  0x1b   : > { %439 = vmatpush.msra.mxu1 %v315_v7  ;;  %v290_v24 = vld [vmem:[%s8204_s1 + $0x18] sm:$0xff]  ;;  %v289_v26 = vld [vmem:[%s8204_s1 + $0x10] sm:$0xff]  ;;  %v288_v28 = vld [vmem:[%s8204_s1 + $0x8] sm:$0xff]  ;;  %s4735_s10 = scalar_lea.hbm %s4734_s9, 64  ;;  %p4740_p0 = scmp.lt.s32.totalorder %s4734_s9, %s8208_s5 }
  0x1c   : > { %327 = vmatpush.msra.mxu0 %v298_v8  ;;  %v306_v25 = vld [vmem:[%s8204_s1 + $0x98] sm:$0xff]  ;;  %v305_v27 = vld [vmem:[%s8204_s1 + $0x90] sm:$0xff]  ;;  %v304_v29 = vld [vmem:[%s8204_s1 + $0x88] sm:$0xff]  ;;  %p4736_p11 = scmp.ne.s32.totalorder %s4734_s9, %s4735_s10  ;;  %p4741_p1 = scmp.lt.s32.totalorder %s4739_s13, %s4735_s10 }
  0x1d   : > { %440 = vmatpush.msra.mxu1 %v314_v9  ;;  %v287_v30 = vld [vmem:[%s8204_s1] sm:$0xff]  ;;  %v224_v33 = vld [vmem:[%s4959_s30 + $0x8] sm:$0xff]  ;;  %v225_v34 = vld [vmem:[%s4959_s30 + $0x10] sm:$0xff] }
  0x1e   : > { %328 = vmatpush.msra.mxu0 %v297_v10  ;;  %v303_v31 = vld [vmem:[%s8204_s1 + $0x80] sm:$0xff]  ;;  %v226_v35 = vld [vmem:[%s4959_s30 + $0x18] sm:$0xff]  ;;  %v228_v37 = vld [vmem:[%s4959_s30 + $0x28] sm:$0xff]  ;;  %p4737_p12 = pnand %p4736_p11, %p4854_p5  ;;  %p4742_p2 = por %p4741_p1, %p4740_p0 }
  0x1f   : > { %441 = vmatpush.msra.mxu1 %v313_v11  ;;  %v223_v32 = vld [vmem:[%s4959_s30] sm:$0xff]  ;;  %v229_v38 = vld [vmem:[%s4959_s30 + $0x30] sm:$0xff]  ;;  %v230_v39 = vld [vmem:[%s4959_s30 + $0x38] sm:$0xff] }
  0x20   : > { %329 = vmatpush.msra.mxu0 %v296_v12  ;;  %v227_v36 = vld [vmem:[%s4959_s30 + $0x20] sm:$0xff]  ;;  %v232_v41 = vld [vmem:[%s4959_s30 + $0x48] sm:$0xff]  ;;  %v233_v42 = vld [vmem:[%s4959_s30 + $0x50] sm:$0xff]  ;;  %p4738_p13 = pneg %p4737_p12 }
  0x21   : > { %442 = vmatpush.msra.mxu1 %v312_v13  ;;  %v231_v40 = vld [vmem:[%s4959_s30 + $0x40] sm:$0xff]  ;;  %v234_v43 = vld [vmem:[%s4959_s30 + $0x58] sm:$0xff]  ;;  %v236_v45 = vld [vmem:[%s4959_s30 + $0x68] sm:$0xff] }
  0x22   : > { %330 = vmatpush.msra.mxu0 %v295_v14  ;;  %v235_v44 = vld [vmem:[%s4959_s30 + $0x60] sm:$0xff]  ;;  %v237_v46 = vld [vmem:[%s4959_s30 + $0x70] sm:$0xff]  ;;  %v238_v47 = vld [vmem:[%s4959_s30 + $0x78] sm:$0xff]  ;;  %p4743_p3 = pnand %p4742_p2, %p4738_p13 }
  0x23   : > { %443 = vmatpush.msra.mxu1 %v311_v15  ;;  %v239_v48 = vld [vmem:[%s4959_s30 + $0x80] sm:$0xff]  ;;  %v240_v49 = vld [vmem:[%s4959_s30 + $0x88] sm:$0xff]  ;;  %v241_v50 = vld [vmem:[%s4959_s30 + $0x90] sm:$0xff] }
  0x24   : > { %331 = vmatpush.msra.mxu0 %v294_v16  ;;  %v242_v51 = vld [vmem:[%s4959_s30 + $0x98] sm:$0xff]  ;;  %v243_v52 = vld [vmem:[%s4959_s30 + $0xa0] sm:$0xff]  ;;  %v244_v53 = vld [vmem:[%s4959_s30 + $0xa8] sm:$0xff] }
  0x25   : > { %444 = vmatpush.msra.mxu1 %v310_v17  ;;  %v245_v54 = vld [vmem:[%s4959_s30 + $0xb0] sm:$0xff]  ;;  %v246_v55 = vld [vmem:[%s4959_s30 + $0xb8] sm:$0xff]  ;;  %v247_v56 = vld [vmem:[%s4959_s30 + $0xc0] sm:$0xff] }
  0x26   : > { %332 = vmatpush.msra.mxu0 %v293_v18  ;;  %v248_v57 = vld [vmem:[%s4959_s30 + $0xc8] sm:$0xff]  ;;  %v249_v58 = vld [vmem:[%s4959_s30 + $0xd0] sm:$0xff]  ;;  %v250_v59 = vld [vmem:[%s4959_s30 + $0xd8] sm:$0xff] }
  0x27   : > { %445 = vmatpush.msra.mxu1 %v309_v19  ;;  %v251_v60 = vld [vmem:[%s4959_s30 + $0xe0] sm:$0xff]  ;;  %v252_v61 = vld [vmem:[%s4959_s30 + $0xe8] sm:$0xff]  ;;  %v253_v62 = vld [vmem:[%s4959_s30 + $0xf0] sm:$0xff] }
  0x28   : > { %333 = vmatpush.msra.mxu0 %v292_v20  ;;  %v254_v63 = vld [vmem:[%s4959_s30 + $0xf8] sm:$0xff]  ;;  %v255_v2 = vld [vmem:[%s4959_s30 + $0x100] sm:$0xff]  ;;  %v256_v3 = vld [vmem:[%s4959_s30 + $0x108] sm:$0xff] }
  0x29   : > { %446 = vmatpush.msra.mxu1 %v308_v21  ;;  %v257_v6 = vld [vmem:[%s4959_s30 + $0x110] sm:$0xff]  ;;  %v258_v7 = vld [vmem:[%s4959_s30 + $0x118] sm:$0xff]  ;;  %v259_v10 = vld [vmem:[%s4959_s30 + $0x120] sm:$0xff] }
  0x2a   : > { %334 = vmatpush.msra.mxu0 %v291_v22  ;;  %v260_v11 = vld [vmem:[%s4959_s30 + $0x128] sm:$0xff]  ;;  %v261_v14 = vld [vmem:[%s4959_s30 + $0x130] sm:$0xff]  ;;  %v262_v15 = vld [vmem:[%s4959_s30 + $0x138] sm:$0xff] }
  0x2b   : > { %447 = vmatpush.msra.mxu1 %v307_v23  ;;  %v263_v18 = vld [vmem:[%s4959_s30 + $0x140] sm:$0xff]  ;;  %v264_v19 = vld [vmem:[%s4959_s30 + $0x148] sm:$0xff]  ;;  %v265_v22 = vld [vmem:[%s4959_s30 + $0x150] sm:$0xff] }
  0x2c   : > { %335 = vmatpush.msra.mxu0 %v290_v24  ;;  %v266_v23 = vld [vmem:[%s4959_s30 + $0x158] sm:$0xff] }
  0x2d   : > { %448 = vmatpush.msra.mxu1 %v306_v25 }
  0x2e   : > { %336 = vmatpush.msra.mxu0 %v289_v26  ;;  %v267_v26 = vld [vmem:[%s4959_s30 + $0x160] sm:$0xff] }
  0x2f   : > { %449 = vmatpush.msra.mxu1 %v305_v27  ;;  %v268_v27 = vld [vmem:[%s4959_s30 + $0x168] sm:$0xff] }
  0x30   : > { %337 = vmatpush.msra.mxu0 %v288_v28 }
  0x31   : > { %450 = vmatpush.msra.mxu1 %v304_v29 }
  0x32   : > { %338 = vmatpush.msra.mxu0 %v287_v30  ;;  %v269_v30 = vld [vmem:[%s4959_s30 + $0x170] sm:$0xff] }
  0x33   : > { %451 = vmatpush.msra.mxu1 %v303_v31  ;;  %339 = vmatmul.f32.vlgmr.msra.gmra.mxu0 %v223_v32  ;;  %v270_v31 = vld [vmem:[%s4959_s30 + $0x178] sm:$0xff] }
  0x34   : > { %452 = vmatmul.f32.vlgmr.msra.gmra.mxu1 %v224_v33 }
  0x3b   : > { %342 = vmatmul.f32.gmra.mxu0 %v225_v34  ;;  %v271_v34 = vld [vmem:[%s4959_s30 + $0x180] sm:$0xff] }
  0x3c   : > { %455 = vmatmul.f32.gmra.mxu1 %v226_v35  ;;  %v272_v35 = vld [vmem:[%s4959_s30 + $0x188] sm:$0xff] }
  0x43   : > { %345 = vmatmul.f32.gmra.mxu0 %v227_v36 }
  0x44   : > { %458 = vmatmul.f32.gmra.mxu1 %v228_v37 }
  0x4b   : > { %348 = vmatmul.f32.gmra.mxu0 %v229_v38  ;;  %v273_v38 = vld [vmem:[%s4959_s30 + $0x190] sm:$0xff] }
  0x4c   : > { %461 = vmatmul.f32.gmra.mxu1 %v230_v39  ;;  %v274_v39 = vld [vmem:[%s4959_s30 + $0x198] sm:$0xff] }
  0x53   : > { %351 = vmatmul.f32.gmra.mxu0 %v231_v40 }
  0x54   : > { %464 = vmatmul.f32.gmra.mxu1 %v232_v41 }
  0x5b   : > { %354 = vmatmul.f32.gmra.mxu0 %v233_v42  ;;  %v275_v42 = vld [vmem:[%s4959_s30 + $0x1a0] sm:$0xff] }
  0x5c   : > { %467 = vmatmul.f32.gmra.mxu1 %v234_v43  ;;  %v276_v43 = vld [vmem:[%s4959_s30 + $0x1a8] sm:$0xff] }
  0x63   : > { %357 = vmatmul.f32.gmra.mxu0 %v235_v44 }
  0x64   : > { %470 = vmatmul.f32.gmra.mxu1 %v236_v45 }
  0x6b   : > { %360 = vmatmul.f32.gmra.mxu0 %v237_v46  ;;  %v277_v46 = vld [vmem:[%s4959_s30 + $0x1b0] sm:$0xff] }
  0x6c   : > { %473 = vmatmul.f32.gmra.mxu1 %v238_v47  ;;  %v278_v47 = vld [vmem:[%s4959_s30 + $0x1b8] sm:$0xff] }
  0x73   : > { %363 = vmatmul.f32.gmra.mxu0 %v239_v48 }
  0x74   : > { %476 = vmatmul.f32.gmra.mxu1 %v240_v49 }
  0x7b   : > { %366 = vmatmul.f32.gmra.mxu0 %v241_v50  ;;  %v279_v50 = vld [vmem:[%s4959_s30 + $0x1c0] sm:$0xff] }
  0x7c   : > { %479 = vmatmul.f32.gmra.mxu1 %v242_v51  ;;  %v280_v51 = vld [vmem:[%s4959_s30 + $0x1c8] sm:$0xff] }
  0x83   : > { %369 = vmatmul.f32.gmra.mxu0 %v243_v52 }
  0x84   : > { %482 = vmatmul.f32.gmra.mxu1 %v244_v53 }
  0x8b   : > { %372 = vmatmul.f32.gmra.mxu0 %v245_v54  ;;  %v281_v54 = vld [vmem:[%s4959_s30 + $0x1d0] sm:$0xff] }
  0x8c   : > { %485 = vmatmul.f32.gmra.mxu1 %v246_v55  ;;  %v282_v55 = vld [vmem:[%s4959_s30 + $0x1d8] sm:$0xff] }
  0x93   : > { %375 = vmatmul.f32.gmra.mxu0 %v247_v56 }
  0x94   : > { %488 = vmatmul.f32.gmra.mxu1 %v248_v57 }
  0x9b   : > { %378 = vmatmul.f32.gmra.mxu0 %v249_v58  ;;  %v283_v58 = vld [vmem:[%s4959_s30 + $0x1e0] sm:$0xff] }
  0x9c   : > { %491 = vmatmul.f32.gmra.mxu1 %v250_v59  ;;  %v284_v59 = vld [vmem:[%s4959_s30 + $0x1e8] sm:$0xff] }
  0xa3   : > { %381 = vmatmul.f32.gmra.mxu0 %v251_v60 }
  0xa4   : > { %494 = vmatmul.f32.gmra.mxu1 %v252_v61 }
  0xab   : > { %384 = vmatmul.f32.gmra.mxu0 %v253_v62  ;;  %v285_v62 = vld [vmem:[%s4959_s30 + $0x1f0] sm:$0xff] }
  0xac   : > { %497 = vmatmul.f32.gmra.mxu1 %v254_v63  ;;  %v286_v63 = vld [vmem:[%s4959_s30 + $0x1f8] sm:$0xff] }
  0xb0   : > { %v4999_v0 = vpop.f32.mrf.mxu0 }
  0xb1   : > { %v5001_v1 = vpop.f32.mrf.mxu1 }
  0xb3   : > { %387 = vmatmul.f32.gmra.mxu0 %v255_v2 }
  0xb4   : > { %500 = vmatmul.f32.gmra.mxu1 %v256_v3 }
  0xb8   : > { %v5005_v4 = vpop.f32.mrf.mxu0 }
  0xb9   : > { %v5007_v5 = vpop.f32.mrf.mxu1 }
  0xbb   : > { %390 = vmatmul.f32.gmra.mxu0 %v257_v6 }
  0xbc   : > { %503 = vmatmul.f32.gmra.mxu1 %v258_v7 }
  0xc0   : > { %v5011_v8 = vpop.f32.mrf.mxu0 }
  0xc1   : > { %v5013_v9 = vpop.f32.mrf.mxu1 }
  0xc3   : > { %393 = vmatmul.f32.gmra.mxu0 %v259_v10 }
  0xc4   : > { %506 = vmatmul.f32.gmra.mxu1 %v260_v11 }
  0xc8   : > { %v5017_v12 = vpop.f32.mrf.mxu0 }
  0xc9   : > { %v5019_v13 = vpop.f32.mrf.mxu1 }
  0xcb   : > { %396 = vmatmul.f32.gmra.mxu0 %v261_v14 }
  0xcc   : > { %509 = vmatmul.f32.gmra.mxu1 %v262_v15 }
  0xd0   : > { %v5023_v16 = vpop.f32.mrf.mxu0 }
  0xd1   : > { %v5025_v17 = vpop.f32.mrf.mxu1 }
  0xd3   : > { %399 = vmatmul.f32.gmra.mxu0 %v263_v18  ;;  %v4107_v18 = vld [vmem:[%s8206_s3 + $0x78] sm:$0xff] }
  0xd4   : > { %512 = vmatmul.f32.gmra.mxu1 %v264_v19  ;;  %v897_v19 = vld [vmem:[%s8206_s3 + $0x38] sm:$0xff]  ;;  %933 = vmatpush.msra.mxu2 %v4107_v18 }
  0xd5   : > { %995 = vmatpush.msra.mxu3 %v897_v19 }
  0xd8   : > { %v5029_v20 = vpop.f32.mrf.mxu0 }
  0xd9   : > { %v5031_v21 = vpop.f32.mrf.mxu1 }
  0xdb   : > { %402 = vmatmul.f32.gmra.mxu0 %v265_v22  ;;  %v4106_v22 = vld [vmem:[%s8206_s3 + $0x70] sm:$0xff] }
  0xdc   : > { %515 = vmatmul.f32.gmra.mxu1 %v266_v23  ;;  %v896_v23 = vld [vmem:[%s8206_s3 + $0x30] sm:$0xff]  ;;  %934 = vmatpush.msra.mxu2 %v4106_v22  ;;  %v581_v22 = vlaneseq }
  0xdd   : > { %996 = vmatpush.msra.mxu3 %v896_v23 }
  0xe0   : > { %v5035_v24 = vpop.f32.mrf.mxu0 }
  0xe1   : > { %v5037_v25 = vpop.f32.mrf.mxu1 }
  0xe3   : > { %405 = vmatmul.f32.gmra.mxu0 %v267_v26  ;;  %v4105_v26 = vld [vmem:[%s8206_s3 + $0x68] sm:$0xff] }
  0xe4   : > { %518 = vmatmul.f32.gmra.mxu1 %v268_v27  ;;  %v895_v27 = vld [vmem:[%s8206_s3 + $0x28] sm:$0xff]  ;;  %935 = vmatpush.msra.mxu2 %v4105_v26 }
  0xe5   : > { %997 = vmatpush.msra.mxu3 %v895_v27 }
  0xe8   : > { %v5041_v28 = vpop.f32.mrf.mxu0 }
  0xe9   : > { %v5043_v29 = vpop.f32.mrf.mxu1 }
  0xeb   : > { %408 = vmatmul.f32.gmra.mxu0 %v269_v30 }
  0xec   : > { %521 = vmatmul.f32.gmra.mxu1 %v270_v31 }
  0xf0   : > { %v5047_v32 = vpop.f32.mrf.mxu0 }
  0xf1   : > { %v5049_v33 = vpop.f32.mrf.mxu1 }
  0xf3   : > { %411 = vmatmul.f32.gmra.mxu0 %v271_v34  ;;  %v4104_v34 = vld [vmem:[%s8206_s3 + $0x60] sm:$0xff] }
  0xf4   : > { %524 = vmatmul.f32.gmra.mxu1 %v272_v35  ;;  %v894_v35 = vld [vmem:[%s8206_s3 + $0x20] sm:$0xff]  ;;  %936 = vmatpush.msra.mxu2 %v4104_v34 }
  0xf5   : > { %998 = vmatpush.msra.mxu3 %v894_v35  ;;  %v4129_v35 = vld [vmem:[%s8206_s3 + $0xb8] sm:$0xff] }
  0xf8   : > { %v5053_v36 = vpop.f32.mrf.mxu0 }
  0xf9   : > { %v5055_v37 = vpop.f32.mrf.mxu1 }
  0xfb   : > { %414 = vmatmul.f32.gmra.mxu0 %v273_v38  ;;  %v4103_v38 = vld [vmem:[%s8206_s3 + $0x58] sm:$0xff] }
  0xfc   : > { %527 = vmatmul.f32.gmra.mxu1 %v274_v39  ;;  %v893_v39 = vld [vmem:[%s8206_s3 + $0x18] sm:$0xff]  ;;  %937 = vmatpush.msra.mxu2 %v4103_v38 }
  0xfd   : > { %999 = vmatpush.msra.mxu3 %v893_v39 }
 0x100   : > { %v5059_v40 = vpop.f32.mrf.mxu0 }
 0x101   : > { %v5061_v41 = vpop.f32.mrf.mxu1 }
 0x103   : > { %417 = vmatmul.f32.gmra.mxu0 %v275_v42  ;;  %v4102_v42 = vld [vmem:[%s8206_s3 + $0x50] sm:$0xff] }
 0x104   : > { %530 = vmatmul.f32.gmra.mxu1 %v276_v43  ;;  %v892_v43 = vld [vmem:[%s8206_s3 + $0x10] sm:$0xff]  ;;  %938 = vmatpush.msra.mxu2 %v4102_v42 }
 0x105   : > { %1000 = vmatpush.msra.mxu3 %v892_v43 }
 0x108   : > { %v5065_v44 = vpop.f32.mrf.mxu0 }
 0x109   : > { %v5067_v45 = vpop.f32.mrf.mxu1 }
 0x10b   : > { %420 = vmatmul.f32.gmra.mxu0 %v277_v46  ;;  %v4101_v46 = vld [vmem:[%s8206_s3 + $0x48] sm:$0xff] }
 0x10c   : > { %533 = vmatmul.f32.gmra.mxu1 %v278_v47  ;;  %v891_v47 = vld [vmem:[%s8206_s3 + $0x8] sm:$0xff]  ;;  %939 = vmatpush.msra.mxu2 %v4101_v46 }
 0x10d   : > { %1001 = vmatpush.msra.mxu3 %v891_v47 }
 0x110   : > { %v5071_v48 = vpop.f32.mrf.mxu0 }
 0x111   : > { %v5073_v49 = vpop.f32.mrf.mxu1 }
 0x113   : > { %423 = vmatmul.f32.gmra.mxu0 %v279_v50 }
 0x114   : > { %536 = vmatmul.f32.gmra.mxu1 %v280_v51 }
 0x118   : > { %v5077_v52 = vpop.f32.mrf.mxu0 }
 0x119   : > { %v5079_v53 = vpop.f32.mrf.mxu1 }
 0x11b   : > { %426 = vmatmul.f32.gmra.mxu0 %v281_v54  ;;  %v4100_v54 = vld [vmem:[%s8206_s3 + $0x40] sm:$0xff] }
 0x11c   : > { %539 = vmatmul.f32.gmra.mxu1 %v282_v55  ;;  %v890_v55 = vld [vmem:[%s8206_s3] sm:$0xff]  ;;  %940 = vmatpush.msra.mxu2 %v4100_v54 }
 0x11d   : > { %1002 = vmatpush.msra.mxu3 %v890_v55 }
 0x11e   : > { %1103 = vmatpush.msrb.mxu2 %v4129_v35 }
 0x120   : > { %v5083_v56 = vpop.f32.mrf.mxu0 }
 0x121   : > { %v5085_v57 = vpop.f32.mrf.mxu1 }
 0x123   : > { %429 = vmatmul.f32.gmra.mxu0 %v283_v58  ;;  %v8209_v58 = vmov 0.0  }
 0x124   : > { %542 = vmatmul.f32.gmra.mxu1 %v284_v59  ;;  %941 = vmatmul.f32.vlgmr.msra.gmra.mxu2 %v8209_v58 }
 0x125   : > { %1003 = vmatmul.f32.vlgmr.msra.gmra.mxu3 %v8209_v58 }
 0x128   : > { %v5089_v60 = vpop.f32.mrf.mxu0 }
 0x129   : > { %v5091_v61 = vpop.f32.mrf.mxu1 }
 0x12b   : > { %432 = vmatmul.f32.gmra.mxu0 %v285_v62 }
 0x12c   : > { %545 = vmatmul.f32.gmra.mxu1 %v286_v63  ;;  %v5172_v63 = vld [vmem:[%s8205_s2] ss:$0 sm:$0xff] }
 0x12d   : > { %v365_v18 = vadd.f32 %v5172_v63, %v5047_v32  ;;  %v341_v19 = vadd.f32 %v5172_v63, %v4999_v0  ;;  %v5188_v32 = vshrl.u32 %v581_v22, 7  ;;  %v368_v0 = vadd.f32 %v5172_v63, %v5053_v36 }
 0x12f   : > { %v478_v27 = vadd.f32 %v5049_v33, %v365_v18  ;;  %v454_v38 = vadd.f32 %v5001_v1, %v341_v19  ;;  %v344_v33 = vadd.f32 %v5172_v63, %v5005_v4  ;;  %v481_v46 = vadd.f32 %v5055_v37, %v368_v0 }
 0x130   : > { %v388_v2 = vpop.f32.mrf.mxu0  ;;  %v371_v4 = vadd.f32 %v5172_v63, %v5059_v40  ;;  %v347_v19 = vadd.f32 %v5172_v63, %v5011_v8  ;;  %v5217_v35 = vadd.s32 8, %v5188_v32  ;;  %v350_v0 = vadd.f32 %v5172_v63, %v5017_v12 }
 0x131   : > { %v501_v3 = vpop.f32.mrf.mxu1  ;;  %v389_v34 = vadd.f32 %v5172_v63, %v388_v2  ;;  %v557_v39 = vmax.f32 %v478_v27, 0.0  ;;  %v549_v43 = vmax.f32 %v454_v38, 0.0  ;;  %v8211_v2 = vand.u32 7, %v5188_v32 }
 0x132   : > { %v457_v37 = vadd.f32 %v5007_v5, %v344_v33 }
 0x133   : > { %v5192_v42 = vadd.f32 %v501_v3, %v389_v34  ;;  %v735_v55 = vrot.slane %v557_v39, 7  ;;  %v4128_v3 = vld [vmem:[%s8206_s3 + $0xb0] sm:$0xff]  ;;  %v702_v22 = vmax.f32 %v549_v43, %v557_v39  ;;  %vm5212_vm1 = vcmp.ge.s32.totalorder %v8211_v2, 1 }
 0x134   : > { %1104 = vmatpush.msrb.mxu2 %v4128_v3  ;;  %v558_v34 = vmax.f32 %v481_v46, 0.0  ;;  %v484_v39 = vadd.f32 %v5061_v41, %v371_v4  ;;  %v550_v33 = vmax.f32 %v457_v37, 0.0  ;;  %v460_v43 = vadd.f32 %v5013_v9, %v347_v19  ;;  %v4127_v19 = vld [vmem:[%s8206_s3 + $0xa8] sm:$0xff] }
 0x135   : > { %v565_v1 = vmax.f32 %v5192_v42, 0.0  ;;  %v758_v40 = vsel %vm8214_vm0, 0.0, %v735_v55 }
 0x136   : > { %1105 = vmatpush.msrb.mxu2 %v4127_v19  ;;  %v551_v58 = vmax.f32 %v460_v43, 0.0 }
 0x137   : > { %v710_v5 = vmax.f32 %v702_v22, %v565_v1  ;;  %v5247_v22 = vadd.f32 %v5019_v13, %v350_v0  ;;  %v8295_v13 = vmov 0 }
 0x138   : > { %v5095_v6 = vpop.f32.mrf.mxu0 }
 0x139   : > { %v5097_v7 = vpop.f32.mrf.mxu1  ;;  %v392_v18 = vadd.f32 %v5172_v63, %v5095_v6  ;;  %v8293_v6 = vmov 0 }
 0x13a   : > { %v8294_v6 = vsel %vm5212_vm1, 4294967295, %v8293_v6 }
 0x13b   : > { %v5223_v38 = vadd.f32 %v5097_v7, %v392_v18  ;;  %v8213_v18 = vand.u32 7, %v5217_v35 }
 0x13d   : > { %v566_v41 = vmax.f32 %v5223_v38, 0.0  ;;  %vm5261_vm2 = vcmp.ge.s32.totalorder %v8213_v18, 1 }
 0x13e   : > { %v8296_v13 = vsel %vm5261_vm2, 4294967295, %v8295_v13 }
 0x140   : > { %v5099_v10 = vpop.f32.mrf.mxu0 }
 0x141   : > { %v5101_v11 = vpop.f32.mrf.mxu1  ;;  %v395_v7 = vadd.f32 %v5172_v63, %v5099_v10  ;;  %v353_v10 = vadd.f32 %v5172_v63, %v5023_v16 }
 0x143   : > { %v5257_v2 = vadd.f32 %v5101_v11, %v395_v7  ;;  %v552_v11 = vmax.f32 %v5247_v22, 0.0 }
 0x145   : > { %v567_v19 = vmax.f32 %v5257_v2, 0.0 }
 0x148   : > { %v5103_v14 = vpop.f32.mrf.mxu0 }
 0x149   : > { %v5105_v15 = vpop.f32.mrf.mxu1 }
 0x150   : > { %v5125_v30 = vpop.f32.mrf.mxu0 }
 0x151   : > { %v5127_v31 = vpop.f32.mrf.mxu1 }
 0x158   : > { %v5153_v50 = vpop.f32.mrf.mxu0 }
 0x159   : > { %v5155_v51 = vpop.f32.mrf.mxu1 }
 0x160   : > { %v5165_v59 = vpop.f32.mrf.mxu0 }
 0x161   : > { %v5167_v62 = vpop.f32.mrf.mxu1 }
 0x168   : > { %v5178_v23 = vpop.f32.mrf.mxu0 }
 0x169   : > { %v5180_v26 = vpop.f32.mrf.mxu1 }
 0x170   : > { %v412_v47 = vpop.f32.mrf.mxu0 }
 0x171   : > { %v525_v54 = vpop.f32.mrf.mxu1  ;;  %v413_v36 = vadd.f32 %v5172_v63, %v412_v47 }
 0x173   : > { %v526_v27 = vadd.f32 %v525_v54, %v413_v36  ;;  %v759_v54 = vsel %vm5212_vm1, %v758_v40, 0.0  ;;  %v736_v36 = vrot.slane %v558_v34, 7  ;;  %v5252_v40 = vadd.s32 16, %v5188_v32 }
 0x175   : > { %v5225_v8 = vmax.f32 %v526_v27, 0.0  ;;  %v559_v27 = vmax.f32 %v484_v39, 0.0  ;;  %v8212_v7 = vand.u32 7, %v5252_v40 }
 0x177   : > { %v718_v46 = vmax.f32 %v710_v5, %v5225_v8  ;;  %v791_v47 = vrot.slane %v5225_v8, 7  ;;  %v703_v5 = vmax.f32 %v550_v33, %v558_v34  ;;  %v737_v34 = vsel %vm8214_vm0, %v735_v55, %v736_v36 }
 0x178   : > { %v415_v3 = vpop.f32.mrf.mxu0  ;;  %v5275_v33 = vadd.f32 %v5025_v17, %v353_v10  ;;  %v5277_v43 = vrot.slane %v559_v27, 7  ;;  %v760_v17 = vsel %vm5261_vm2, %v737_v34, 0.0  ;;  %vm5301_vm4 = vcmp.ge.s32.totalorder %v8212_v7, 1 }
 0x179   : > { %v528_v12 = vpop.f32.mrf.mxu1  ;;  %v767_v4 = vmax.f32 %v718_v46, %v759_v54  ;;  %v5240_v9 = vsel %vm8214_vm0, 0.0, %v791_v47  ;;  %v416_v37 = vadd.f32 %v5172_v63, %v415_v3  ;;  %v374_v46 = vadd.f32 %v5172_v63, %v5065_v44 }
 0x17a   : > { %v815_v16 = vsel %vm5212_vm1, %v5240_v9, 0.0  ;;  %v711_v44 = vmax.f32 %v703_v5, %v566_v41  ;;  %v398_v5 = vadd.f32 %v5172_v63, %v5103_v14  ;;  %v739_v14 = vsel %vm8214_vm0, %v736_v36, %v5277_v43 }
 0x17b   : > { %v775_v54 = vmax.f32 %v767_v4, 0.0  ;;  %v529_v3 = vadd.f32 %v528_v12, %v416_v37  ;;  %v487_v12 = vadd.f32 %v5067_v45, %v374_v46  ;;  %v8298_v34 = vmov 0 }
 0x17c   : > { %v8299_v34 = vsel %vm5301_vm4, 4294967295, %v8298_v34  ;;  %v553_v36 = vmax.f32 %v5275_v33, 0.0  ;;  %v4143_v33 = vld [vmem:[%s8206_s3 + $0xe8] sm:$0xff] }
 0x17d   : > { %v823_v0 = vmax.f32 %v775_v54, %v815_v16  ;;  %v5271_v39 = vmax.f32 %v529_v3, 0.0  ;;  %v4126_v16 = vld [vmem:[%s8206_s3 + $0xa0] sm:$0xff] }
 0x17e   : > { %1106 = vmatpush.msrb.mxu2 %v4126_v16 }
 0x17f   : > { %v831_v4 = vmax.f32 %v823_v0, 0.0  ;;  %v719_v55 = vmax.f32 %v711_v44, %v5271_v39  ;;  %v792_v37 = vrot.slane %v5271_v39, 7  ;;  %v704_v44 = vmax.f32 %v551_v58, %v559_v27 }
 0x180   : > { %v418_v22 = vpop.f32.mrf.mxu0  ;;  %v5306_v0 = vadd.s32 24, %v5188_v32  ;;  %v377_v27 = vadd.f32 %v5172_v63, %v5071_v48 }
 0x181   : > { %v531_v10 = vpop.f32.mrf.mxu1  ;;  %v5288_v54 = vmax.f32 %v831_v4, 0.0  ;;  %v768_v3 = vmax.f32 %v719_v55, %v760_v17  ;;  %v5291_v45 = vsel %vm8214_vm0, %v791_v47, %v792_v37  ;;  %v419_v46 = vadd.f32 %v5172_v63, %v418_v22 }
 0x182   : > { %v560_v47 = vmax.f32 %v487_v12, 0.0  ;;  %v5317_v17 = vadd.f32 %v5105_v15, %v398_v5  ;;  %v816_v12 = vsel %vm5261_vm2, %v5291_v45, 0.0  ;;  %v712_v42 = vmax.f32 %v704_v44, %v567_v19 }
 0x183   : > { %8297 = vst [vmem:[#allocation5_spill] sm:$0xff] %v5288_v54  ;;  %v776_v4 = vmax.f32 %v768_v3, %v565_v1  ;;  %v532_v55 = vadd.f32 %v531_v10, %v419_v46  ;;  %4108 = vmatmul.msk.f32.gmra.mxu2 %vm8241_vm3, %v5288_v54  ;;  %v862_v58 = vrot.slane %v5288_v54, 7  ;;  %v356_v3 = vadd.f32 %v5172_v63, %v5029_v20 }
 0x184   : > { %v615_v48 = vand.u32 7, %v5306_v0  ;;  %v761_v15 = vsel %vm5301_vm4, %v739_v14, 0.0  ;;  %v5337_v46 = vrot.slane %v560_v47, 7  ;;  %v490_v20 = vadd.f32 %v5073_v49, %v377_v27  ;;  %v4125_v49 = vld [vmem:[%s8206_s3 + $0x98] sm:$0xff] }
 0x185   : > { %v824_v1 = vmax.f32 %v776_v4, %v816_v12  ;;  %v5324_v22 = vmax.f32 %v532_v55, 0.0  ;;  %v5327_v10 = vsel %vm8214_vm0, 0.0, %v862_v58  ;;  %v568_v55 = vmax.f32 %v5317_v17, 0.0  ;;  %1107 = vmatpush.msrb.mxu2 %v4125_v49 }
 0x186   : > { %v883_v5 = vsel %vm5261_vm2, %v5327_v10, 0.0  ;;  %v401_v14 = vadd.f32 %v5172_v63, %v5125_v30  ;;  %v839_v12 = vsel %vm5261_vm2, %v5240_v9, 0.0  ;;  %v5360_v30 = vadd.f32 %v5031_v21, %v356_v3 }
 0x187   : > { %v832_v16 = vmax.f32 %v824_v1, %v5225_v8  ;;  %v720_v44 = vmax.f32 %v712_v42, %v5324_v22  ;;  %v794_v4 = vrot.slane %v5324_v22, 7  ;;  %4115 = vmatmul.msk.f32.gmra.mxu3 %vm8241_vm3, %v883_v5  ;;  %v380_v9 = vadd.f32 %v5172_v63, %v5077_v52 }
 0x188   : > { %v421_v7 = vpop.f32.mrf.mxu0  ;;  %vm5366_vm5 = vcmp.ge.s32.totalorder %v615_v48, 1  ;;  %v8301_v27 = vmov 0  ;;  %v741_v52 = vsel %vm8214_vm0, %v5277_v43, %v5337_v46  ;;  %v561_v3 = vmax.f32 %v490_v20, 0.0 }
 0x189   : > { %v534_v18 = vpop.f32.mrf.mxu1  ;;  %v5350_v8 = vmax.f32 %v832_v16, %v839_v12  ;;  %v769_v42 = vmax.f32 %v720_v44, %v761_v15  ;;  %v5353_v1 = vsel %vm8214_vm0, %v792_v37, %v794_v4  ;;  %v422_v5 = vadd.f32 %v5172_v63, %v421_v7 }
 0x18a   : > { %v8302_v27 = vsel %vm5366_vm5, 4294967295, %v8301_v27  ;;  %v5371_v37 = vadd.s32 32, %v5188_v32  ;;  %v705_v7 = vmax.f32 %v552_v11, %v560_v47  ;;  %v5382_v44 = vadd.f32 %v5127_v31, %v401_v14 }
 0x18b   : > { %8300 = vst [vmem:[#allocation6_spill] sm:$0xff] %v5350_v8  ;;  %v777_v15 = vmax.f32 %v769_v42, %v566_v41  ;;  %v535_v16 = vadd.f32 %v534_v18, %v422_v5  ;;  %4109 = vmatmul.msk.f32.gmra.mxu2 %vm8241_vm3, %v5350_v8  ;;  %v863_v21 = vrot.slane %v5350_v8, 7  ;;  %v817_v11 = vsel %vm5301_vm4, %v5353_v1, 0.0 }
 0x18c   : > { %v713_v38 = vmax.f32 %v705_v7, %v568_v55  ;;  %v554_v12 = vmax.f32 %v5360_v30, 0.0  ;;  %v5396_v43 = vadd.f32 %v5079_v53, %v380_v9  ;;  %v622_v31 = vand.u32 7, %v5371_v37  ;;  %v4145_v53 = vld [vmem:[%s8206_s3 + $0xf8] sm:$0xff] }
 0x18d   : > { %v825_v18 = vmax.f32 %v777_v15, %v817_v11  ;;  %v5389_v41 = vmax.f32 %v535_v16, 0.0  ;;  %v5392_v47 = vsel %vm8214_vm0, %v862_v58, %v863_v21  ;;  %v762_v5 = vsel %vm5366_vm5, %v741_v52, 0.0  ;;  %1196 = vmatpush.msrb.mxu3 %v4145_v53 }
 0x18e   : > { %v884_v20 = vsel %vm5301_vm4, %v5392_v47, 0.0  ;;  %v5411_v49 = vrot.slane %v561_v3, 7  ;;  %v569_v9 = vmax.f32 %v5382_v44, 0.0  ;;  %v840_v7 = vsel %vm5301_vm4, %v5291_v45, 0.0 }
 0x18f   : > { %v833_v14 = vmax.f32 %v825_v18, %v5271_v39  ;;  %v721_v42 = vmax.f32 %v713_v38, %v5389_v41  ;;  %v796_v58 = vrot.slane %v5389_v41, 7  ;;  %4116 = vmatmul.msk.f32.gmra.mxu3 %vm8241_vm3, %v884_v20  ;;  %v404_v39 = vadd.f32 %v5172_v63, %v5153_v50  ;;  %v4124_v20 = vld [vmem:[%s8206_s3 + $0x90] sm:$0xff] }
 0x190   : > { %v424_v15 = vpop.f32.mrf.mxu0  ;;  %v4144_v50 = vld [vmem:[%s8206_s3 + $0xf0] sm:$0xff]  ;;  %v359_v45 = vadd.f32 %v5172_v63, %v5035_v24  ;;  %1108 = vmatpush.msrb.mxu2 %v4124_v20  ;;  %vm5457_vm6 = vcmp.ge.s32.totalorder %v622_v31, 1  ;;  %vm5745_vm14 = vcmp.le.s32.totalorder %v615_v48, 6  ;;  %vm5778_vm15 = vcmp.le.s32.totalorder %v622_v31, 6 }
 0x191   : > { %v537_v16 = vpop.f32.mrf.mxu1  ;;  %v5419_v52 = vmax.f32 %v833_v14, %v840_v7  ;;  %v770_v11 = vmax.f32 %v721_v42, %v762_v5  ;;  %v5422_v38 = vsel %vm8214_vm0, %v794_v4, %v796_v58  ;;  %v425_v18 = vadd.f32 %v5172_v63, %v424_v15  ;;  %1197 = vmatpush.msrb.mxu3 %v4144_v50 }
 0x192   : > { %v706_v14 = vmax.f32 %v553_v36, %v561_v3  ;;  %v562_v42 = vmax.f32 %v5396_v43, 0.0  ;;  %v5437_v4 = vadd.s32 40, %v5188_v32  ;;  %v383_v5 = vadd.f32 %v5172_v63, %v5083_v56 }
 0x193   : > { %8303 = vst [vmem:[#allocation7_spill] sm:$0xff] %v5419_v52  ;;  %v778_v53 = vmax.f32 %v770_v11, %v567_v19  ;;  %v538_v7 = vadd.f32 %v537_v16, %v425_v18  ;;  %4110 = vmatmul.msk.f32.gmra.mxu2 %vm8241_vm3, %v5419_v52  ;;  %v865_v24 = vrot.slane %v5419_v52, 7  ;;  %v743_v36 = vsel %vm8214_vm0, %v5337_v46, %v5411_v49  ;;  %v4142_v46 = vld [vmem:[%s8206_s3 + $0xe0] sm:$0xff] }
 0x194   : > { %v5453_v3 = vadd.f32 %v5155_v51, %v404_v39  ;;  %v8304_v56 = vmov 0  ;;  %v818_v2 = vsel %vm5366_vm5, %v5422_v38, 0.0  ;;  %1198 = vmatpush.msrb.mxu3 %v4143_v33  ;;  %v714_v19 = vmax.f32 %v706_v14, %v569_v9 }
 0x195   : > { %v8305_v56 = vsel %vm5457_vm6, 4294967295, %v8304_v56  ;;  %v826_v43 = vmax.f32 %v778_v53, %v818_v2  ;;  %v5466_v15 = vmax.f32 %v538_v7, 0.0  ;;  %v5469_v51 = vsel %vm8214_vm0, %v863_v21, %v865_v24 }
 0x196   : > { %v5475_v39 = vadd.f32 %v5037_v25, %v359_v45  ;;  %v5477_v16 = vrot.slane %v562_v42, 7  ;;  %v629_v11 = vand.u32 7, %v5437_v4  ;;  %v885_v18 = vsel %vm5366_vm5, %v5469_v51, 0.0  ;;  %1199 = vmatpush.msrb.mxu3 %v4142_v46  ;;  %v4123_v25 = vld [vmem:[%s8206_s3 + $0x88] sm:$0xff]  ;;  %v4141_v45 = vld [vmem:[%s8206_s3 + $0xd8] sm:$0xff] }
 0x197   : > { %v5484_v20 = vadd.f32 %v5085_v57, %v383_v5  ;;  %v834_v21 = vmax.f32 %v826_v43, %v5324_v22  ;;  %v722_v50 = vmax.f32 %v714_v19, %v5466_v15  ;;  %v798_v14 = vrot.slane %v5466_v15, 7  ;;  %4117 = vmatmul.msk.f32.gmra.mxu3 %vm8241_vm3, %v885_v18  ;;  %1109 = vmatpush.msrb.mxu2 %v4123_v25  ;;  %v4139_v25 = vld [vmem:[%s8206_s3 + $0xc8] sm:$0xff] }
 0x198   : > { %v570_v53 = vmax.f32 %v5453_v3, 0.0  ;;  %v407_v57 = vadd.f32 %v5172_v63, %v5165_v59  ;;  %v841_v22 = vsel %vm5366_vm5, %v5353_v1, 0.0  ;;  %v763_v5 = vsel %vm5457_vm6, %v743_v36, 0.0  ;;  %v427_v7 = vpop.f32.mrf.mxu0  ;;  %1200 = vmatpush.msrb.mxu3 %v4141_v45  ;;  %v4122_v59 = vld [vmem:[%s8206_s3 + $0x80] sm:$0xff]  ;;  %v4140_v1 = vld [vmem:[%s8206_s3 + $0xd0] sm:$0xff] }
 0x199   : > { %v540_v33 = vpop.f32.mrf.mxu1  ;;  %v5504_v2 = vmax.f32 %v834_v21, %v841_v22  ;;  %v771_v19 = vmax.f32 %v722_v50, %v763_v5  ;;  %v5507_v43 = vsel %vm8214_vm0, %v796_v58, %v798_v14  ;;  %v428_v46 = vadd.f32 %v5172_v63, %v427_v7  ;;  %1110 = vmatpush.msrb.mxu2 %v4122_v59 }
 0x19a   : > { %v707_v36 = vmax.f32 %v554_v12, %v562_v42  ;;  %v745_v18 = vsel %vm8214_vm0, %v5411_v49, %v5477_v16  ;;  %vm5523_vm7 = vcmp.ge.s32.totalorder %v629_v11, 1  ;;  %v8307_v58 = vmov 0  ;;  %1201 = vmatpush.msrb.mxu3 %v4140_v1  ;;  %v4161_v42 = vld [vmem:[%s8206_s3 + $0x138] sm:$0xff] }
 0x19b   : > { %8306 = vst [vmem:[#allocation8_spill] sm:$0xff] %v5504_v2  ;;  %v8308_v58 = vsel %vm5523_vm7, 4294967295, %v8307_v58  ;;  %v5528_v21 = vadd.s32 48, %v5188_v32  ;;  %v563_v50 = vmax.f32 %v5484_v20, 0.0  ;;  %v779_v30 = vmax.f32 %v771_v19, %v568_v55  ;;  %4111 = vmatmul.msk.f32.gmra.mxu2 %vm8241_vm3, %v5504_v2  ;;  %v4138_v20 = vld [vmem:[%s8206_s3 + $0xc0] sm:$0xff] }
 0x19c   : > { %v541_v12 = vadd.f32 %v540_v33, %v428_v46  ;;  %v867_v49 = vrot.slane %v5504_v2, 7  ;;  %v555_v17 = vmax.f32 %v5475_v39, 0.0  ;;  %v386_v55 = vadd.f32 %v5172_v63, %v5089_v60  ;;  %1256 = vmatpush.msra.mxu2 %v4161_v42  ;;  %1202 = vmatpush.msrb.mxu3 %v4139_v25 }
 0x19d   : > { %v5549_v45 = vadd.f32 %v5167_v62, %v407_v57  ;;  %v819_v22 = vsel %vm5457_vm6, %v5507_v43, 0.0  ;;  %v715_v5 = vmax.f32 %v707_v36, %v570_v53  ;;  %v362_v60 = vadd.f32 %v5172_v63, %v5041_v28 }
 0x19e   : > { %v827_v7 = vmax.f32 %v779_v30, %v819_v22  ;;  %v5556_v33 = vmax.f32 %v541_v12, 0.0  ;;  %v5559_v39 = vsel %vm8214_vm0, %v865_v24, %v867_v49  ;;  %v636_v62 = vand.u32 7, %v5528_v21  ;;  %1203 = vmatpush.msrb.mxu3 %v4138_v20 }
 0x19f   : > { %v764_v57 = vsel %vm5523_vm7, %v745_v18, 0.0  ;;  %v886_v19 = vsel %vm5457_vm6, %v5559_v39, 0.0  ;;  %v746_v46 = vrot.slane %v563_v50, 7  ;;  %v499_v28 = vadd.f32 %v5091_v61, %v386_v55 }
 0x1a0   : > { %v835_v59 = vmax.f32 %v827_v7, %v5389_v41  ;;  %v723_v1 = vmax.f32 %v715_v5, %v5556_v33  ;;  %v800_v24 = vrot.slane %v5556_v33, 7  ;;  %4118 = vmatmul.msk.f32.gmra.mxu3 %vm8241_vm3, %v886_v19  ;;  %v571_v36 = vmax.f32 %v5549_v45, 0.0  ;;  %v430_v12 = vpop.f32.mrf.mxu0 }
 0x1a1   : > { %v410_v18 = vadd.f32 %v5172_v63, %v5178_v23  ;;  %v842_v30 = vsel %vm5457_vm6, %v5422_v38, 0.0  ;;  %v543_v42 = vpop.f32.mrf.mxu1  ;;  %v431_v22 = vadd.f32 %v5172_v63, %v430_v12  ;;  %v475_v61 = vadd.f32 %v5043_v29, %v362_v60  ;;  %v4160_v29 = vld [vmem:[%s8206_s3 + $0x130] sm:$0xff] }
 0x1a2   : > { %v5580_v41 = vmax.f32 %v835_v59, %v842_v30  ;;  %v772_v25 = vmax.f32 %v723_v1, %v764_v57  ;;  %v801_v20 = vsel %vm8214_vm0, %v798_v14, %v800_v24  ;;  %vm5587_vm8 = vcmp.ge.s32.totalorder %v636_v62, 1  ;;  %1257 = vmatpush.msra.mxu2 %v4160_v29 }
 0x1a3   : > { %v8310_v55 = vmov 0  ;;  %v5592_v23 = vadd.s32 56, %v5188_v32  ;;  %v708_v38 = vmax.f32 %v555_v17, %v563_v50  ;;  %v544_v7 = vadd.f32 %v543_v42, %v431_v22 }
 0x1a4   : > { %8309 = vst [vmem:[#allocation9_spill] sm:$0xff] %v5580_v41  ;;  %v8311_v55 = vsel %vm5587_vm8, 4294967295, %v8310_v55  ;;  %v780_v5 = vmax.f32 %v772_v25, %v569_v9  ;;  %4112 = vmatmul.msk.f32.gmra.mxu2 %vm8241_vm3, %v5580_v41  ;;  %v869_v14 = vrot.slane %v5580_v41, 7  ;;  %v747_v60 = vsel %vm8214_vm0, %v5477_v16, %v746_v46 }
 0x1a5   : > { %8312 = vst [vmem:[#allocation10_spill] sm:$0xff] %v8311_v55  ;;  %v564_v57 = vmax.f32 %v499_v28, 0.0  ;;  %v523_v19 = vadd.f32 %v5180_v26, %v410_v18  ;;  %v820_v44 = vsel %vm5523_vm7, %v801_v20, 0.0  ;;  %v716_v9 = vmax.f32 %v708_v38, %v571_v36 }
 0x1a6   : > { %v828_v50 = vmax.f32 %v780_v5, %v820_v44  ;;  %v579_v17 = vmax.f32 %v544_v7, 0.0  ;;  %v5610_v59 = vsel %vm8214_vm0, %v867_v49, %v869_v14  ;;  %v556_v1 = vmax.f32 %v475_v61, 0.0 }
 0x1a7   : > { %v887_v16 = vsel %vm5523_vm7, %v5610_v59, 0.0  ;;  %v643_v26 = vand.u32 7, %v5592_v23  ;;  %v748_v12 = vrot.slane %v564_v57, 7  ;;  %v572_v42 = vmax.f32 %v523_v19, 0.0 }
 0x1a8   : > { %v836_v28 = vmax.f32 %v828_v50, %v5466_v15  ;;  %v724_v18 = vmax.f32 %v716_v9, %v579_v17  ;;  %v802_v30 = vrot.slane %v579_v17, 7  ;;  %4119 = vmatmul.msk.f32.gmra.mxu3 %vm8241_vm3, %v887_v16  ;;  %v843_v49 = vsel %vm5523_vm7, %v5507_v43, 0.0  ;;  %v433_v22 = vpop.f32.mrf.mxu0 }
 0x1a9   : > { %v765_v25 = vsel %vm5587_vm8, %v747_v60, 0.0  ;;  %v546_v61 = vpop.f32.mrf.mxu1  ;;  %v434_v7 = vadd.f32 %v5172_v63, %v433_v22  ;;  %v709_v29 = vmax.f32 %v556_v1, %v564_v57  ;;  %v4159_v60 = vld [vmem:[%s8206_s3 + $0x128] sm:$0xff]  ;;  %vm5637_vm9 = vcmp.ge.s32.totalorder %v643_v26, 1 }
 0x1aa   : > { %v5623_v38 = vmax.f32 %v836_v28, %v843_v49  ;;  %v773_v15 = vmax.f32 %v724_v18, %v765_v25  ;;  %v803_v5 = vsel %vm8214_vm0, %v800_v24, %v802_v30  ;;  %v8314_v24 = vmov 0  ;;  %1258 = vmatpush.msra.mxu2 %v4159_v60 }
 0x1ab   : > { %v547_v44 = vadd.f32 %v546_v61, %v434_v7  ;;  %v8315_v24 = vsel %vm5637_vm9, 4294967295, %v8314_v24  ;;  %v821_v63 = vsel %vm5587_vm8, %v803_v5, 0.0  ;;  %v749_v3 = vsel %vm8214_vm0, %v746_v46, %v748_v12 }
 0x1ac   : > { %8313 = vst [vmem:[#allocation11_spill] sm:$0xff] %v5623_v38  ;;  %v781_v19 = vmax.f32 %v773_v15, %v570_v53  ;;  %4113 = vmatmul.msk.f32.gmra.mxu2 %vm8241_vm3, %v5623_v38  ;;  %v871_v43 = vrot.slane %v5623_v38, 7  ;;  %v717_v53 = vmax.f32 %v709_v29, %v572_v42  ;;  %v844_v46 = vsel %vm5587_vm8, %v801_v20, 0.0  ;;  %v4158_v20 = vld [vmem:[%s8206_s3 + $0x120] sm:$0xff] }
 0x1ad   : > { %8316 = vst [vmem:[#allocation12_spill] sm:$0xff] %v8315_v24  ;;  %v580_v9 = vmax.f32 %v547_v44, 0.0  ;;  %v766_v12 = vsel %vm5637_vm9, %v749_v3, 0.0  ;;  %v1030_v22 = vrot.slane %v5288_v54, 1  ;;  %1259 = vmatpush.msra.mxu2 %v4158_v20  ;;  %v8318_v15 = vand.u32 7, %v5188_v32  ;;  %v4154_v20 = vld [vmem:[%s8206_s3 + $0x100] sm:$0xff] }
 0x1ae   : > { %v829_v57 = vmax.f32 %v781_v19, %v821_v63  ;;  %v5645_v50 = vsel %vm8214_vm0, %v869_v14, %v871_v43  ;;  %v845_v44 = vsel %vm5637_vm9, %v803_v5, 0.0  ;;  %v1031_v32 = vrot.slane %v5350_v8, 1 }
 0x1af   : > { %v888_v1 = vsel %vm5587_vm8, %v5645_v50, 0.0  ;;  %v725_v28 = vmax.f32 %v717_v53, %v580_v9  ;;  %v804_v18 = vrot.slane %v580_v9, 7  ;;  %vm5680_vm11 = vcmp.le.s32.totalorder %v8318_v15, 6 }
 0x1b0   : > { %v837_v16 = vmax.f32 %v829_v57, %v5556_v33  ;;  %4120 = vmatmul.msk.f32.gmra.mxu3 %vm8241_vm3, %v888_v1  ;;  %v1053_v19 = vsel %vm8215_vm10, 0.0, %v1030_v22  ;;  %v1147_v63 = vsel %vm5212_vm1, %v5327_v10, 0.0  ;;  %v8322_v5 = vand.u32 7, %v5217_v35  ;;  %v4156_v10 = vld [vmem:[%s8206_s3 + $0x110] sm:$0xff] }
 0x1b1   : > { %v774_v14 = vmax.f32 %v725_v28, %v766_v12  ;;  %v805_v49 = vsel %vm8214_vm0, %v802_v30, %v804_v18  ;;  %v1054_v60 = vsel %vm5680_vm11, %v1053_v19, 0.0  ;;  %v5708_v53 = vsel %vm8215_vm10, %v1030_v22, %v1031_v32  ;;  %v4155_v12 = vld [vmem:[%s8206_s3 + $0x108] sm:$0xff]  ;;  %v4176_v22 = vld [vmem:[%s8206_s3 + $0x170] sm:$0xff]  ;;  %v4173_v19 = vld [vmem:[%s8206_s3 + $0x158] sm:$0xff] }
 0x1b2   : > { %v5656_v42 = vmax.f32 %v837_v16, %v844_v46  ;;  %v822_v61 = vsel %vm5637_vm9, %v805_v49, 0.0  ;;  %vm5703_vm12 = vcmp.le.s32.totalorder %v8322_v5, 6  ;;  %v1033_v9 = vrot.slane %v5419_v52, 1 }
 0x1b3   : > { %v782_v25 = vmax.f32 %v774_v14, %v571_v36  ;;  %v1055_v57 = vsel %vm5703_vm12, %v5708_v53, 0.0  ;;  %v1148_v35 = vsel %vm5261_vm2, %v5392_v47, 0.0  ;;  %v8325_v1 = vand.u32 7, %v5252_v40 }
 0x1b4   : > { %8317 = vst [vmem:[#allocation13_spill] sm:$0xff] %v5656_v42  ;;  %4114 = vmatmul.msk.f32.gmra.mxu2 %vm8241_vm3, %v5656_v42  ;;  %v873_v33 = vrot.slane %v5656_v42, 7  ;;  %v5729_v28 = vsel %vm8215_vm10, %v1031_v32, %v1033_v9  ;;  %v1035_v46 = vrot.slane %v5504_v2, 1  ;;  %v1149_v40 = vsel %vm5301_vm4, %v5469_v51, 0.0  ;;  %v4171_v32 = vld [vmem:[%s8206_s3 + $0x148] sm:$0xff] }
 0x1b5   : > { %v830_v30 = vmax.f32 %v782_v25, %v822_v61  ;;  %vm5724_vm13 = vcmp.le.s32.totalorder %v8325_v1, 6  ;;  %v8328_v14 = vmov 0  ;;  %v4177_v25 = vld [vmem:[%s8206_s3 + $0x178] sm:$0xff]  ;;  %v1037_v48 = vrot.slane %v5580_v41, 1  ;;  %v4175_v61 = vld [vmem:[%s8206_s3 + $0x168] sm:$0xff] }
 0x1b6   : > { %v5673_v45 = vsel %vm8214_vm0, %v871_v43, %v873_v33  ;;  %v1056_v18 = vsel %vm5724_vm13, %v5729_v28, 0.0  ;;  %v8329_v14 = vsel %vm5745_vm14, 4294967295, %v8328_v14  ;;  %v5750_v49 = vsel %vm8215_vm10, %v1033_v9, %v1035_v46  ;;  %1348 = vmatpush.msra.mxu3 %v4177_v25 }
 0x1b7   : > { %v889_v36 = vsel %vm5637_vm9, %v5673_v45, 0.0  ;;  %v838_v29 = vmax.f32 %v830_v30, %v579_v17  ;;  %v4157_v17 = vld [vmem:[%s8206_s3 + $0x118] sm:$0xff]  ;;  %v1057_v0 = vsel %vm5745_vm14, %v5750_v49, 0.0  ;;  %v4174_v30 = vld [vmem:[%s8206_s3 + $0x160] sm:$0xff]  ;;  %v8330_v15 = vmov 0 }
 0x1b8   : > { %4121 = vmatmul.msk.f32.gmra.mxu3 %vm8241_vm3, %v889_v36  ;;  %1260 = vmatpush.msra.mxu2 %v4157_v17  ;;  %v1150_v36 = vsel %vm5366_vm5, %v5559_v39, 0.0  ;;  %v8331_v15 = vsel %vm5778_vm15, 4294967295, %v8330_v15  ;;  %v1039_v31 = vrot.slane %v5623_v38, 1  ;;  %v4170_v17 = vld [vmem:[%s8206_s3 + $0x140] sm:$0xff]  ;;  %vm5811_vm0 = vcmp.le.s32.totalorder %v629_v11, 6 }
 0x1b9   : > { %v5688_v43 = vmax.f32 %v838_v29, %v845_v44  ;;  %1349 = vmatpush.msra.mxu3 %v4176_v22  ;;  %v5783_v29 = vsel %vm8215_vm10, %v1035_v46, %v1037_v48  ;;  %v4172_v44 = vld [vmem:[%s8206_s3 + $0x150] sm:$0xff]  ;;  %v8332_v5 = vmov 0  ;;  %v1152_v4 = vsel %vm5523_vm7, %v5645_v50, 0.0 }
 0x1ba   : > { %1261 = vmatpush.msra.mxu2 %v4156_v10  ;;  %v1058_v37 = vsel %vm5778_vm15, %v5783_v29, 0.0  ;;  %v8333_v5 = vsel %vm5811_vm0, 4294967295, %v8332_v5  ;;  %v1041_v10 = vrot.slane %v5656_v42, 1  ;;  %v8335_v11 = vmov 0 }
 0x1bb   : > { %8321 = vst [vmem:[#allocation14_spill] sm:$0xff] %v5688_v43  ;;  %1350 = vmatpush.msra.mxu3 %v4175_v61  ;;  %v1043_v46 = vrot.slane %v5688_v43, 1  ;;  %v1153_v21 = vsel %vm5587_vm8, %v5673_v45, 0.0  ;;  %vm8342_vm7 = vcmask 1046528   ;;  %v1144_v25 = vrot.slane %v5688_v43, 7  ;;  %v5892_v61 = vpop.f32.mrf.mxu3 }
 0x1bc   : > { %4130 = vmatmul.msk.f32.vlgmr.msrb.gmra.mxu2 %vm8241_vm3, %v1054_v60  ;;  %v4193_v60 = vld [vmem:[%s8206_s3 + $0x1b8] sm:$0xff]  ;;  %8334 = vst [vmem:[#allocation15_spill] sm:$0xff] %v8333_v5  ;;  %vm8343_vm8 = vcmask 1040384  }
 0x1bd   : > { %1262 = vmatpush.msra.mxu2 %v4155_v12  ;;  %1351 = vmatpush.msra.mxu3 %v4174_v30  ;;  %v4191_v12 = vld [vmem:[%s8206_s3 + $0x1a8] sm:$0xff]  ;;  %v5872_v23 = vsel %vm8343_vm8, %v873_v33, %v1144_v25  ;;  %v5886_v33 = vpop.f32.mrf.mxu2  ;;  %v4188_v30 = vld [vmem:[%s8206_s3 + $0x190] sm:$0xff]  ;;  %vm8344_vm8 = vnez %v8305_v56 }
 0x1bf   : > { %1263 = vmatpush.msra.mxu2 %v4154_v20  ;;  %1352 = vmatpush.msra.mxu3 %v4173_v19  ;;  %v1299_v20 = vsel %vm5680_vm11, %v5708_v53, 0.0  ;;  %v1300_v19 = vsel %vm5703_vm12, %v5729_v28, 0.0 }
 0x1c0   : > { %4146 = vmatmul.msk.f32.vlgmr.msrb.gmra.mxu3 %vm8241_vm3, %v1147_v63  ;;  %v1151_v63 = vsel %vm5457_vm6, %v5610_v59, 0.0  ;;  %vm8338_vm6 = vcmask 1046528  }
 0x1c1   : > { %1353 = vmatpush.msra.mxu3 %v4172_v44  ;;  %1440 = vmatpush.msrb.mxu2 %v4193_v60  ;;  %v5837_v1 = vsel %vm8338_vm6, %v1039_v31, %v1041_v10  ;;  %vm5853_vm6 = vcmp.le.s32.totalorder %v643_v26, 6  ;;  %v4190_v26 = vld [vmem:[%s8206_s3 + $0x1a0] sm:$0xff]  ;;  %v1301_v60 = vsel %vm5724_vm13, %v5750_v49, 0.0 }
 0x1c3   : > { %1354 = vmatpush.msra.mxu3 %v4171_v32  ;;  %v4209_v32 = vld [vmem:[%s8206_s3 + $0x1f8] sm:$0xff] }
 0x1c4   : > { %4131 = vmatmul.msk.f32.gmra.mxu2 %vm8241_vm3, %v1055_v57  ;;  %v5816_v57 = vsel %vm8215_vm10, %v1037_v48, %v1039_v31  ;;  %vm5832_vm10 = vcmp.le.s32.totalorder %v636_v62, 6  ;;  %v8339_v62 = vmov 0  ;;  %v4189_v48 = vld [vmem:[%s8206_s3 + $0x198] sm:$0xff] }
 0x1c5   : > { %1355 = vmatpush.msra.mxu3 %v4170_v17  ;;  %v1059_v9 = vsel %vm5811_vm0, %v5816_v57, 0.0  ;;  %v8336_v11 = vsel %vm5832_vm10, 4294967295, %v8335_v11  ;;  %v8340_v62 = vsel %vm5853_vm6, 4294967295, %v8339_v62 }
 0x1c6   : > { %8337 = vst [vmem:[#allocation16_spill] sm:$0xff] %v8336_v11 }
 0x1c7   : > { %8341 = vst [vmem:[#allocation17_spill] sm:$0xff] %v8340_v62  ;;  %1498 = vmatpush.msrb.mxu3 %v4209_v32  ;;  %v4223_v32 = vld [vmem:[%s8206_s3 + $0x230] sm:$0xff] }
 0x1c8   : > { %4147 = vmatmul.msk.f32.gmra.mxu3 %vm8241_vm3, %v1148_v35  ;;  %v4192_v35 = vld [vmem:[%s8206_s3 + $0x1b0] sm:$0xff] }
 0x1c9   : > { %1441 = vmatpush.msrb.mxu2 %v4192_v35  ;;  %v4207_v35 = vld [vmem:[%s8206_s3 + $0x1e8] sm:$0xff] }
 0x1cb   : > { %1442 = vmatpush.msrb.mxu2 %v4191_v12  ;;  %v4206_v12 = vld [vmem:[%s8206_s3 + $0x1e0] sm:$0xff] }
 0x1cc   : > { %4132 = vmatmul.msk.f32.gmra.mxu2 %vm8241_vm3, %v1056_v18  ;;  %v1060_v18 = vsel %vm5832_vm10, %v5837_v1, 0.0 }
 0x1cd   : > { %1443 = vmatpush.msrb.mxu2 %v4190_v26 }
 0x1cf   : > { %1444 = vmatpush.msrb.mxu2 %v4189_v48  ;;  %v4224_v48 = vld [vmem:[%s8206_s3 + $0x238] sm:$0xff] }
 0x1d0   : > { %4148 = vmatmul.msk.f32.gmra.mxu3 %vm8241_vm3, %v1149_v40  ;;  %v5860_v40 = vsel %vm8342_vm7, %v1041_v10, %v1043_v46  ;;  %v4186_v10 = vld [vmem:[%s8206_s3 + $0x180] sm:$0xff] }
 0x1d1   : > { %v1061_v22 = vsel %vm5853_vm6, %v5860_v40, 0.0  ;;  %1445 = vmatpush.msrb.mxu2 %v4188_v30  ;;  %v4239_v30 = vld [vmem:[%s8206_s3 + $0x278] sm:$0xff] }
 0x1d2   : > { %1779 = vmatpush.msrb.mxu0 %v4239_v30 }
 0x1d4   : > { %4133 = vmatmul.msk.f32.gmra.mxu2 %vm8241_vm3, %v1057_v0  ;;  %v1154_v0 = vsel %vm5637_vm9, %v5872_v23, 0.0 }
 0x1d8   : > { %4149 = vmatmul.msk.f32.gmra.mxu3 %vm8241_vm3, %v1150_v36 }
 0x1dc   : > { %4134 = vmatmul.msk.f32.gmra.mxu2 %vm8241_vm3, %v1058_v37  ;;  %v4187_v37 = vld [vmem:[%s8206_s3 + $0x188] sm:$0xff] }
 0x1dd   : > { %1446 = vmatpush.msrb.mxu2 %v4187_v37  ;;  %v4269_v37 = vld [vmem:[%s8206_s3 + $0x2f8] sm:$0xff] }
 0x1de   : > { %1886 = vmatpush.msrb.mxu1 %v4269_v37  ;;  %v4238_v37 = vld [vmem:[%s8206_s3 + $0x270] sm:$0xff] }
 0x1df   : > { %1447 = vmatpush.msrb.mxu2 %v4186_v10  ;;  %1780 = vmatpush.msrb.mxu0 %v4238_v37 }
 0x1e0   : > { %4150 = vmatmul.msk.f32.gmra.mxu3 %vm8241_vm3, %v1151_v63 }
 0x1e4   : > { %4135 = vmatmul.msk.f32.gmra.mxu2 %vm8241_vm3, %v1059_v9  ;;  %v4208_v9 = vld [vmem:[%s8206_s3 + $0x1f0] sm:$0xff] }
 0x1e5   : > { %1499 = vmatpush.msrb.mxu3 %v4208_v9  ;;  %v1304_v9 = vsel %vm5811_vm0, %v5837_v1, 0.0 }
 0x1e7   : > { %1500 = vmatpush.msrb.mxu3 %v4207_v35 }
 0x1e8   : > { %4151 = vmatmul.msk.f32.gmra.mxu3 %vm8241_vm3, %v1152_v4 }
 0x1e9   : > { %1501 = vmatpush.msrb.mxu3 %v4206_v12  ;;  %v1305_v12 = vsel %vm5832_vm10, %v5860_v40, 0.0 }
 0x1ec   : > { %4136 = vmatmul.msk.f32.gmra.mxu2 %vm8241_vm3, %v1060_v18  ;;  %v1302_v18 = vsel %vm5745_vm14, %v5783_v29, 0.0 }
 0x1f0   : > { %4152 = vmatmul.msk.f32.gmra.mxu3 %vm8241_vm3, %v1153_v21  ;;  %v4205_v21 = vld [vmem:[%s8206_s3 + $0x1d8] sm:$0xff] }
 0x1f1   : > { %1502 = vmatpush.msrb.mxu3 %v4205_v21 }
 0x1f4   : > { %4137 = vmatmul.msk.f32.gmra.mxu2 %vm8241_vm3, %v1061_v22 }
 0x1f8   : > { %4153 = vmatmul.msk.f32.gmra.mxu3 %vm8241_vm3, %v1154_v0  ;;  %v4204_v0 = vld [vmem:[%s8206_s3 + $0x1d0] sm:$0xff] }
 0x1f9   : > { %1503 = vmatpush.msrb.mxu3 %v4204_v0  ;;  %v5993_v0 = vsel %vm8342_vm7, %v1043_v46, 0.0  ;;  %v4220_v46 = vld [vmem:[%s8206_s3 + $0x218] sm:$0xff]  ;;  %vm8345_vm7 = vnez %v8308_v58 }
 0x1fa   : > { %v1306_v30 = vsel %vm5853_vm6, %v5993_v0, 0.0  ;;  %vm8346_vm6 = vnez %v8311_v55 }
 0x1fc   : > { %4162 = vmatmul.msk.f32.vlgmr.msra.gmra.mxu2 %vm8241_vm3, %v5288_v54 }
 0x1fd   : > { %1584 = vmatpush.msra.mxu2 %v4224_v48  ;;  %v4221_v48 = vld [vmem:[%s8206_s3 + $0x220] sm:$0xff] }
 0x1ff   : > { %1585 = vmatpush.msra.mxu2 %v4223_v32  ;;  %v1392_v32 = vsel %vm5261_vm2, %v5469_v51, 0.0  ;;  %v4218_v51 = vld [vmem:[%s8206_s3 + $0x208] sm:$0xff] }
 0x200   : > { %4178 = vmatmul.msk.f32.vlgmr.msra.gmra.mxu3 %vm8241_vm3, %v1299_v20  ;;  %v4203_v20 = vld [vmem:[%s8206_s3 + $0x1c8] sm:$0xff] }
 0x201   : > { %1504 = vmatpush.msrb.mxu3 %v4203_v20 }
 0x204   : > { %4163 = vmatmul.msk.f32.gmra.mxu2 %vm8241_vm3, %v5350_v8 }
 0x206   : > { %v945_v36 = vpop.f32.mrf.mxu2 }
 0x208   : > { %4179 = vmatmul.msk.f32.gmra.mxu3 %vm8241_vm3, %v1300_v19  ;;  %v1303_v19 = vsel %vm5778_vm15, %v5816_v57, 0.0 }
 0x20a   : > { %v1007_v53 = vpop.f32.mrf.mxu3 }
 0x20b   : > { %v5903_v44 = vadd.f32 %v1007_v53, %v945_v36  ;;  %v4202_v53 = vld [vmem:[%s8206_s3 + $0x1c0] sm:$0xff] }
 0x20c   : > { %4164 = vmatmul.msk.f32.gmra.mxu2 %vm8241_vm3, %v5419_v52  ;;  %1505 = vmatpush.msrb.mxu3 %v4202_v53 }
 0x20e   : > { %v948_v31 = vpop.f32.mrf.mxu2 }
 0x210   : > { %4180 = vmatmul.msk.f32.gmra.mxu3 %vm8241_vm3, %v1301_v60 }
 0x212   : > { %v1010_v17 = vpop.f32.mrf.mxu3 }
 0x213   : > { %v5917_v63 = vadd.f32 %v1010_v17, %v948_v31 }
 0x214   : > { %4165 = vmatmul.msk.f32.gmra.mxu2 %vm8241_vm3, %v5504_v2 }
 0x216   : > { %v951_v4 = vpop.f32.mrf.mxu2 }
 0x218   : > { %4181 = vmatmul.msk.f32.gmra.mxu3 %vm8241_vm3, %v1302_v18 }
 0x21a   : > { %v1013_v22 = vpop.f32.mrf.mxu3 }
 0x21b   : > { %v5940_v26 = vadd.f32 %v1013_v22, %v951_v4  ;;  %v4222_v4 = vld [vmem:[%s8206_s3 + $0x228] sm:$0xff] }
 0x21c   : > { %4166 = vmatmul.msk.f32.gmra.mxu2 %vm8241_vm3, %v5580_v41 }
 0x21d   : > { %1586 = vmatpush.msra.mxu2 %v4222_v4  ;;  %v1393_v4 = vsel %vm5301_vm4, %v5559_v39, 0.0  ;;  %v1394_v39 = vsel %vm5366_vm5, %v5610_v59, 0.0  ;;  %v1395_v59 = vsel %vm8344_vm8, %v5645_v50, 0.0  ;;  %v1396_v50 = vsel %vm8345_vm7, %v5673_v45, 0.0 }
 0x21e   : > { %v954_v36 = vpop.f32.mrf.mxu2  ;;  %vm8347_vm7 = vcmask 1040384  }
 0x21f   : > { %1587 = vmatpush.msra.mxu2 %v4221_v48  ;;  %v1390_v45 = vsel %vm8347_vm7, %v1144_v25, 0.0  ;;  %v4236_v25 = vld [vmem:[%s8206_s3 + $0x260] sm:$0xff] }
 0x220   : > { %4182 = vmatmul.msk.f32.gmra.mxu3 %vm8241_vm3, %v1303_v19 }
 0x221   : > { %1588 = vmatpush.msra.mxu2 %v4220_v46 }
 0x223   : > { %v1016_v31 = vpop.f32.mrf.mxu3 }
 0x224   : > { %v5966_v60 = vadd.f32 %v1016_v31, %v954_v36  ;;  %4167 = vmatmul.msk.f32.gmra.mxu2 %vm8241_vm3, %v5623_v38  ;;  %v1391_v36 = vsel %vm5212_vm1, %v5392_v47, 0.0  ;;  %v4268_v47 = vld [vmem:[%s8206_s3 + $0x2f0] sm:$0xff] }
 0x225   : > { %1887 = vmatpush.msrb.mxu1 %v4268_v47 }
 0x227   : > { %v957_v17 = vpop.f32.mrf.mxu2 }
 0x228   : > { %4183 = vmatmul.msk.f32.gmra.mxu3 %vm8241_vm3, %v1304_v9 }
 0x22b   : > { %v1019_v10 = vpop.f32.mrf.mxu3 }
 0x22c   : > { %v5977_v35 = vadd.f32 %v1019_v10, %v957_v17  ;;  %4168 = vmatmul.msk.f32.gmra.mxu2 %vm8241_vm3, %v5656_v42  ;;  %v4219_v17 = vld [vmem:[%s8206_s3 + $0x210] sm:$0xff] }
 0x22d   : > { %1589 = vmatpush.msra.mxu2 %v4219_v17 }
 0x22f   : > { %v960_v18 = vpop.f32.mrf.mxu2  ;;  %1590 = vmatpush.msra.mxu2 %v4218_v51 }
 0x230   : > { %4184 = vmatmul.msk.f32.gmra.mxu3 %vm8241_vm3, %v1305_v12 }
 0x233   : > { %v1022_v21 = vpop.f32.mrf.mxu3 }
 0x234   : > { %v1023_v22 = vadd.f32 %v1022_v21, %v960_v18  ;;  %4169 = vmatmul.msk.f32.gmra.mxu2 %vm8241_vm3, %v5688_v43  ;;  %v4217_v21 = vld [vmem:[%s8206_s3 + $0x200] sm:$0xff] }
 0x235   : > { %1591 = vmatpush.msra.mxu2 %v4217_v21 }
 0x237   : > { %v963_v20 = vpop.f32.mrf.mxu2 }
 0x238   : > { %4185 = vmatmul.msk.f32.gmra.mxu3 %vm8241_vm3, %v1306_v30  ;;  %v4237_v30 = vld [vmem:[%s8206_s3 + $0x268] sm:$0xff] }
 0x239   : > { %1781 = vmatpush.msrb.mxu0 %v4237_v30  ;;  %v1541_v30 = vsel %vm5724_vm13, %v5783_v29, 0.0  ;;  %v4247_v29 = vld [vmem:[%s8206_s3 + $0x2b8] sm:$0xff] }
 0x23a   : > { %1717 = vmatpush.msra.mxu3 %v4247_v29  ;;  %v4234_v29 = vld [vmem:[%s8206_s3 + $0x250] sm:$0xff] }
 0x23b   : > { %v1025_v19 = vpop.f32.mrf.mxu3  ;;  %1782 = vmatpush.msrb.mxu0 %v4236_v25  ;;  %v1545_v25 = vsel %vm5832_vm10, %v5993_v0, 0.0  ;;  %vm8349_vm10 = vcmask 1046528  }
 0x23c   : > { %v1026_v53 = vadd.f32 %v1025_v19, %v963_v20  ;;  %4194 = vmatmul.msk.f32.vlgmr.msrb.gmra.mxu2 %vm8241_vm3, %v1391_v36 }
 0x23f   : > { %v6012_v31 = vpop.f32.mrf.mxu2 }
 0x240   : > { %4210 = vmatmul.msk.f32.vlgmr.msrb.gmra.mxu3 %vm8241_vm3, %v5350_v8  ;;  %v4262_v8 = vld [vmem:[%s8206_s3 + $0x2c0] sm:$0xff] }
 0x243   : > { %v6038_v18 = vpop.f32.mrf.mxu3 }
 0x244   : > { %4195 = vmatmul.msk.f32.gmra.mxu2 %vm8241_vm3, %v1392_v32  ;;  %v1397_v32 = vsel %vm8346_vm6, %v5872_v23, 0.0 }
 0x247   : > { %v1115_v9 = vpop.f32.mrf.mxu2 }
 0x248   : > { %v6027_v10 = vadd.f32 %v1115_v9, %v5903_v44  ;;  %4211 = vmatmul.msk.f32.gmra.mxu3 %vm8241_vm3, %v5419_v52  ;;  %v4279_v52 = vld [vmem:[%s8206_s3 + $0x308] sm:$0xff] }
 0x24b   : > { %v6052_v48 = vpop.f32.mrf.mxu3 }
 0x24c   : > { %4196 = vmatmul.msk.f32.gmra.mxu2 %vm8241_vm3, %v1393_v4 }
 0x24f   : > { %v1118_v12 = vpop.f32.mrf.mxu2 }
 0x250   : > { %v6041_v44 = vadd.f32 %v1118_v12, %v5917_v63  ;;  %4212 = vmatmul.msk.f32.gmra.mxu3 %vm8241_vm3, %v5504_v2  ;;  %v8348_v12 = vmov 0.0   ;;  %v4232_v2 = vld [vmem:[%s8206_s3 + $0x240] sm:$0xff] }
 0x253   : > { %v6074_v46 = vpop.f32.mrf.mxu3 }
 0x254   : > { %4197 = vmatmul.msk.f32.gmra.mxu2 %vm8241_vm3, %v1394_v39 }
 0x257   : > { %v1121_v20 = vpop.f32.mrf.mxu2 }
 0x258   : > { %v6055_v63 = vadd.f32 %v1121_v20, %v5940_v26  ;;  %4213 = vmatmul.msk.f32.gmra.mxu3 %vm8241_vm3, %v5580_v41  ;;  %v4267_v26 = vld [vmem:[%s8206_s3 + $0x2e8] sm:$0xff] }
 0x259   : > { %1888 = vmatpush.msrb.mxu1 %v4267_v26  ;;  %v4283_v41 = vld [vmem:[%s8206_s3 + $0x328] sm:$0xff] }
 0x25b   : > { %v6085_v47 = vpop.f32.mrf.mxu3 }
 0x25c   : > { %4198 = vmatmul.msk.f32.gmra.mxu2 %vm8241_vm3, %v1395_v59 }
 0x25f   : > { %v1124_v36 = vpop.f32.mrf.mxu2 }
 0x260   : > { %v6067_v19 = vadd.f32 %v1124_v36, %v5966_v60  ;;  %4214 = vmatmul.msk.f32.gmra.mxu3 %vm8241_vm3, %v5623_v38 }
 0x263   : > { %v6101_v4 = vpop.f32.mrf.mxu3 }
 0x264   : > { %4199 = vmatmul.msk.f32.gmra.mxu2 %vm8241_vm3, %v1396_v50 }
 0x267   : > { %v1127_v37 = vpop.f32.mrf.mxu2 }
 0x268   : > { %v6081_v60 = vadd.f32 %v1127_v37, %v5977_v35  ;;  %4215 = vmatmul.msk.f32.gmra.mxu3 %vm8241_vm3, %v5656_v42  ;;  %v1398_v35 = vsel %vm5637_vm9, %v1390_v45, 0.0  ;;  %v1543_v37 = vsel %vm5778_vm15, %v5837_v1, 0.0  ;;  %v4265_v1 = vld [vmem:[%s8206_s3 + $0x2d8] sm:$0xff]  ;;  %v1544_v45 = vsel %vm5811_vm0, %v5860_v40, 0.0  ;;  %v4245_v40 = vld [vmem:[%s8206_s3 + $0x2a8] sm:$0xff] }
 0x269   : > { %v4233_v42 = vld [vmem:[%s8206_s3 + $0x248] sm:$0xff] }
 0x26b   : > { %v6113_v39 = vpop.f32.mrf.mxu3 }
 0x26c   : > { %4200 = vmatmul.msk.f32.gmra.mxu2 %vm8241_vm3, %v1397_v32  ;;  %v4235_v32 = vld [vmem:[%s8206_s3 + $0x258] sm:$0xff] }
 0x26d   : > { %1783 = vmatpush.msrb.mxu0 %v4235_v32 }
 0x26f   : > { %v1130_v17 = vpop.f32.mrf.mxu2  ;;  %1784 = vmatpush.msrb.mxu0 %v4234_v29  ;;  %v4240_v29 = vld [vmem:[%s8206_s3 + $0x280] sm:$0xff] }
 0x270   : > { %v6091_v9 = vadd.f32 %v1130_v17, %v1023_v22  ;;  %4216 = vmatmul.msk.f32.gmra.mxu3 %vm8241_vm3, %v5688_v43  ;;  %v1539_v22 = vsel %vm5680_vm11, %v5729_v28, 0.0  ;;  %v1540_v28 = vsel %vm5703_vm12, %v5750_v49, 0.0  ;;  %v1542_v49 = vsel %vm5745_vm14, %v5816_v57, 0.0  ;;  %v4285_v43 = vld [vmem:[%s8206_s3 + $0x338] sm:$0xff] }
 0x271   : > { %1979 = vmatpush.msrb.mxu2 %v4285_v43  ;;  %1785 = vmatpush.msrb.mxu0 %v4233_v42  ;;  %v4282_v42 = vld [vmem:[%s8206_s3 + $0x320] sm:$0xff] }
 0x273   : > { %v6126_v59 = vpop.f32.mrf.mxu3  ;;  %1786 = vmatpush.msrb.mxu0 %v4232_v2  ;;  %v4300_v2 = vld [vmem:[%s8206_s3 + $0x370] sm:$0xff] }
 0x274   : > { %4201 = vmatmul.msk.f32.gmra.mxu2 %vm8241_vm3, %v1398_v35  ;;  %v4246_v35 = vld [vmem:[%s8206_s3 + $0x2b0] sm:$0xff]  ;;  %1787 = vmatmul.f32.vlgmr.msrb.gmra.mxu0 %v8348_v12 }
 0x275   : > { %1718 = vmatpush.msra.mxu3 %v4246_v35 }
 0x277   : > { %v1133_v23 = vpop.f32.mrf.mxu2  ;;  %1719 = vmatpush.msra.mxu3 %v4245_v40  ;;  %v4241_v40 = vld [vmem:[%s8206_s3 + $0x288] sm:$0xff] }
 0x278   : > { %v6103_v51 = vadd.f32 %v1133_v23, %v1026_v53  ;;  %1527 = vmatmul.f32.gmra.mxu3 %v8348_v12  ;;  %v4266_v53 = vld [vmem:[%s8206_s3 + $0x2e0] sm:$0xff] }
 0x279   : > { %1889 = vmatpush.msrb.mxu1 %v4266_v53 }
 0x27b   : > { %v6134_v26 = vpop.f32.mrf.mxu3  ;;  %1890 = vmatpush.msrb.mxu1 %v4265_v1  ;;  %v4264_v1 = vld [vmem:[%s8206_s3 + $0x2d0] sm:$0xff] }
 0x27c   : > { %4225 = vmatmul.msk.f32.vlgmr.msra.gmra.mxu2 %vm8241_vm3, %v1539_v22 }
 0x27d   : > { %1891 = vmatpush.msrb.mxu1 %v4264_v1 }
 0x27f   : > { %v6115_v21 = vpop.f32.mrf.mxu2 }
 0x283   : > { %v6152_v17 = vpop.f32.mrf.mxu3 }
 0x284   : > { %4226 = vmatmul.msk.f32.gmra.mxu2 %vm8241_vm3, %v1540_v28 }
 0x287   : > { %v6124_v20 = vpop.f32.mrf.mxu2 }
 0x28b   : > { %v6166_v23 = vpop.f32.mrf.mxu3 }
 0x28c   : > { %4227 = vmatmul.msk.f32.gmra.mxu2 %vm8241_vm3, %v1541_v30  ;;  %v4244_v30 = vld [vmem:[%s8206_s3 + $0x2a0] sm:$0xff] }
 0x28d   : > { %1720 = vmatpush.msra.mxu3 %v4244_v30 }
 0x28f   : > { %v6132_v36 = vpop.f32.mrf.mxu2 }
 0x293   : > { %v6179_v28 = vpop.f32.mrf.mxu3 }
 0x294   : > { %4228 = vmatmul.msk.f32.gmra.mxu2 %vm8241_vm3, %v1542_v49 }
 0x297   : > { %v6140_v50 = vpop.f32.mrf.mxu2 }
 0x29b   : > { %v6187_v0 = vpop.f32.mrf.mxu3 }
 0x29c   : > { %4229 = vmatmul.msk.f32.gmra.mxu2 %vm8241_vm3, %v1543_v37  ;;  %v4243_v37 = vld [vmem:[%s8206_s3 + $0x298] sm:$0xff] }
 0x29d   : > { %1721 = vmatpush.msra.mxu3 %v4243_v37 }
 0x29f   : > { %v6154_v57 = vpop.f32.mrf.mxu2 }
 0x2a3   : > { %v6201_v35 = vpop.f32.mrf.mxu3 }
 0x2a4   : > { %4230 = vmatmul.msk.f32.gmra.mxu2 %vm8241_vm3, %v1544_v45  ;;  %v4242_v45 = vld [vmem:[%s8206_s3 + $0x290] sm:$0xff] }
 0x2a5   : > { %1722 = vmatpush.msra.mxu3 %v4242_v45 }
 0x2a7   : > { %v6168_v22 = vpop.f32.mrf.mxu2  ;;  %1723 = vmatpush.msra.mxu3 %v4241_v40  ;;  %v4284_v40 = vld [vmem:[%s8206_s3 + $0x330] sm:$0xff] }
 0x2a8   : > { %1980 = vmatpush.msrb.mxu2 %v4284_v40  ;;  %v4263_v40 = vld [vmem:[%s8206_s3 + $0x2c8] sm:$0xff] }
 0x2a9   : > { %1724 = vmatpush.msra.mxu3 %v4240_v29  ;;  %v4301_v29 = vld [vmem:[%s8206_s3 + $0x378] sm:$0xff]  ;;  %1892 = vmatpush.msrb.mxu1 %v4263_v40  ;;  %v4278_v40 = vld [vmem:[%s8206_s3 + $0x300] sm:$0xff] }
 0x2aa   : > { %1725 = vmatmul.f32.vlgmr.msra.gmra.mxu3 %v8348_v12  ;;  %1981 = vmatpush.msrb.mxu2 %v4283_v41  ;;  %v4281_v41 = vld [vmem:[%s8206_s3 + $0x318] sm:$0xff] }
 0x2ab   : > { %v6208_v30 = vpop.f32.mrf.mxu3  ;;  %2039 = vmatpush.msrb.mxu3 %v4301_v29  ;;  %v4280_v29 = vld [vmem:[%s8206_s3 + $0x310] sm:$0xff]  ;;  %1893 = vmatpush.msrb.mxu1 %v4262_v8  ;;  %v4298_v8 = vld [vmem:[%s8206_s3 + $0x360] sm:$0xff] }
 0x2ac   : > { %4231 = vmatmul.msk.f32.gmra.mxu2 %vm8241_vm3, %v1545_v25 }
 0x2ad   : > { %1982 = vmatpush.msrb.mxu2 %v4282_v42  ;;  %2040 = vmatpush.msrb.mxu3 %v4300_v2 }
 0x2af   : > { %v6177_v53 = vpop.f32.mrf.mxu2  ;;  %1983 = vmatpush.msrb.mxu2 %v4281_v41 }
 0x2b1   : > { %1984 = vmatpush.msrb.mxu2 %v4280_v29  ;;  %v4299_v29 = vld [vmem:[%s8206_s3 + $0x368] sm:$0xff] }
 0x2b2   : > { %2041 = vmatpush.msrb.mxu3 %v4299_v29  ;;  %v4297_v29 = vld [vmem:[%s8206_s3 + $0x358] sm:$0xff] }
 0x2b3   : > { %v6218_v45 = vpop.f32.mrf.mxu3  ;;  %1985 = vmatpush.msrb.mxu2 %v4279_v52  ;;  %v1005_v52 = vadd.f32 %v5892_v61, %v5886_v33  ;;  %v6288_v33 = vld [vmem:[%s8207_s4] sm:$0xf] }
 0x2b4   : > { %1613 = vmatmul.f32.gmra.mxu2 %v8348_v12  ;;  %2042 = vmatpush.msrb.mxu3 %v4298_v8 }
 0x2b5   : > { %1986 = vmatpush.msrb.mxu2 %v4278_v40  ;;  %v1136_v54 = vadd.f32 %v6012_v31, %v1005_v52 }
 0x2b6   : > { %2043 = vmatpush.msrb.mxu3 %v4297_v29 }
 0x2b7   : > { %v6185_v49 = vpop.f32.mrf.mxu2  ;;  %v1229_v12 = vadd.f32 %v6038_v18, %v1136_v54  ;;  %v1230_v54 = vadd.f32 %v6052_v48, %v6027_v10  ;;  %v6293_v18 = vperm.slane %v6288_v33, 0 }
 0x2b9   : > { %v1289_v11 = vadd.f32 %v6115_v21, %v1229_v12 }
 0x2bb   : > { %v6243_v43 = vpop.f32.mrf.mxu3  ;;  %v1381_v24 = vadd.f32 %v6152_v17, %v1289_v11  ;;  %v1290_v11 = vadd.f32 %v6124_v20, %v1230_v54 }
 0x2bd   : > { %v1382_v52 = vadd.f32 %v6166_v23, %v1290_v11  ;;  %v4296_v23 = vld [vmem:[%s8206_s3 + $0x350] sm:$0xff] }
 0x2be   : > { %2044 = vmatpush.msrb.mxu3 %v4296_v23 }
 0x2bf   : > { %v1449_v32 = vpop.f32.mrf.mxu2 }
 0x2c0   : > { %v1473_v61 = vadd.f32 %v1449_v32, %v1381_v24  ;;  %v1231_v32 = vadd.f32 %v6074_v46, %v6041_v44 }
 0x2c3   : > { %v1507_v41 = vpop.f32.mrf.mxu3 }
 0x2c4   : > { %v1531_v31 = vadd.f32 %v1507_v41, %v1473_v61 }
 0x2c7   : > { %v6203_v25 = vpop.f32.mrf.mxu2 }
 0x2c8   : > { %v1474_v10 = vadd.f32 %v6203_v25, %v1382_v52  ;;  %v1291_v25 = vadd.f32 %v6132_v36, %v1231_v32 }
 0x2cb   : > { %v1510_v40 = vpop.f32.mrf.mxu3 }
 0x2cc   : > { %v1532_v41 = vadd.f32 %v1510_v40, %v1474_v10 }
 0x2cf   : > { %v6210_v37 = vpop.f32.mrf.mxu2 }
 0x2d3   : > { %v1513_v17 = vpop.f32.mrf.mxu3 }
 0x2d7   : > { %v6216_v1 = vpop.f32.mrf.mxu2 }
 0x2db   : > { %v1516_v36 = vpop.f32.mrf.mxu3 }
 0x2df   : > { %v6232_v38 = vpop.f32.mrf.mxu2 }
 0x2e7   : > { %v6258_v42 = vpop.f32.mrf.mxu2 }
 0x2ef   : > { %v6272_v2 = vpop.f32.mrf.mxu2 }
 0x2f7   : > { %v6281_v62 = vpop.f32.mrf.mxu2 }
 0x2ff   : > { %v1593_v12 = vpop.f32.mrf.mxu2 }
 0x300   : > { %v1617_v21 = vadd.f32 %v1593_v12, %v1531_v31  ;;  %v1383_v12 = vadd.f32 %v6179_v28, %v1291_v25 }
 0x302   : > { %v1626_v24 = vadd.f32 %v6293_v18, %v1617_v21  ;;  %v1475_v21 = vadd.f32 %v6210_v37, %v1383_v12 }
 0x304   : > { %v6302_v48 = vmax.f32 %v1626_v24, 0.0  ;;  %v1232_v24 = vadd.f32 %v6085_v47, %v6055_v63  ;;  %v1533_v10 = vadd.f32 %v1513_v17, %v1475_v21 }
 0x306   : > { %4248 = vmatmul.msk.f32.gmra.mxu3 %vm8241_vm3, %v6302_v48  ;;  %v1649_v8 = vrot.slane %v6302_v48, 7  ;;  %v1813_v20 = vrot.slane %v6302_v48, 1  ;;  %v1292_v37 = vadd.f32 %v6140_v50, %v1232_v24 }
 0x307   : > { %v1596_v61 = vpop.f32.mrf.mxu2 }
 0x308   : > { %v1618_v54 = vadd.f32 %v1596_v61, %v1532_v41  ;;  %v1669_v31 = vsel %vm8347_vm7, 0.0, %v1649_v8  ;;  %v1836_v44 = vsel %vm8349_vm10, 0.0, %v1813_v20  ;;  %v4295_v41 = vld [vmem:[%s8206_s3 + $0x348] sm:$0xff]  ;;  %vm8350_vm10 = vmmov %vm8347_vm7  ;;  %vm8351_vm7 = vcmask 1046528  }
 0x309   : > { %v1670_v46 = vsel %vm5261_vm2, %v1669_v31, 0.0  ;;  %v1930_v40 = vsel %vm5212_vm1, %v1669_v31, 0.0  ;;  %v1837_v29 = vsel %vm5680_vm11, %v1836_v44, 0.0  ;;  %2045 = vmatpush.msrb.mxu3 %v4295_v41  ;;  %v4316_v44 = vld [vmem:[%s8206_s3 + $0x3b0] sm:$0xff] }
 0x30a   : > { %v1627_v11 = vadd.f32 %v6293_v18, %v1618_v54  ;;  %4255 = vmatmul.msk.f32.gmra.mxu0 %vm8241_vm3, %v1670_v46  ;;  %4270 = vmatmul.msk.f32.vlgmr.msrb.gmra.mxu1 %vm8241_vm3, %v1837_v29  ;;  %v1384_v54 = vadd.f32 %v6187_v0, %v1292_v37  ;;  %v4317_v0 = vld [vmem:[%s8206_s3 + $0x3b8] sm:$0xff]  ;;  %v1519_v46 = vpop.f32.mrf.mxu3  ;;  %v4314_v37 = vld [vmem:[%s8206_s3 + $0x3a0] sm:$0xff] }
 0x30b   : > { %4286 = vmatmul.msk.f32.vlgmr.msrb.gmra.mxu2 %vm8241_vm3, %v1930_v40  ;;  %2131 = vmatpush.msra.mxu0 %v4317_v0  ;;  %v1233_v40 = vadd.f32 %v6101_v4, %v6067_v19 }
 0x30c   : > { %v6328_v52 = vmax.f32 %v1627_v11, 0.0  ;;  %v4294_v11 = vld [vmem:[%s8206_s3 + $0x340] sm:$0xff] }
 0x30d   : > { %2132 = vmatpush.msra.mxu0 %v4316_v44  ;;  %2046 = vmatpush.msrb.mxu3 %v4294_v11  ;;  %v1293_v24 = vadd.f32 %v6154_v57, %v1233_v40  ;;  %v4364_v44 = vld [vmem:[%s8206_s3 + $0x478] sm:$0xff]  ;;  %v4311_v40 = vld [vmem:[%s8206_s3 + $0x388] sm:$0xff] }
 0x30e   : > { %4249 = vmatmul.msk.f32.gmra.mxu3 %vm8241_vm3, %v6328_v52  ;;  %v1650_v28 = vrot.slane %v6328_v52, 7  ;;  %v1814_v32 = vrot.slane %v6328_v52, 1 }
 0x30f   : > { %v1599_v23 = vpop.f32.mrf.mxu2  ;;  %2367 = vmatpush.msra.mxu3 %v4364_v44 }
 0x310   : > { %v1619_v61 = vadd.f32 %v1599_v23, %v1533_v10  ;;  %v6341_v25 = vsel %vm8350_vm10, %v1649_v8, %v1650_v28  ;;  %v6344_v63 = vsel %vm8351_vm7, %v1813_v20, %v1814_v32  ;;  %v1476_v8 = vadd.f32 %v6216_v1, %v1384_v54  ;;  %v4349_v54 = vld [vmem:[%s8206_s3 + $0x438] sm:$0xff] }
 0x311   : > { %v1671_v47 = vsel %vm5301_vm4, %v6341_v25, 0.0  ;;  %v1838_v17 = vsel %vm5703_vm12, %v6344_v63, 0.0  ;;  %v1931_v50 = vsel %vm5261_vm2, %v6341_v25, 0.0  ;;  %2281 = vmatpush.msra.mxu2 %v4349_v54  ;;  %v1235_v54 = vadd.f32 %v6126_v59, %v6091_v9 }
 0x312   : > { %v1628_v31 = vadd.f32 %v6293_v18, %v1619_v61  ;;  %4256 = vmatmul.msk.f32.gmra.mxu0 %vm8241_vm3, %v1671_v47  ;;  %4271 = vmatmul.msk.f32.gmra.mxu1 %vm8241_vm3, %v1838_v17  ;;  %v1534_v29 = vadd.f32 %v1516_v36, %v1476_v8  ;;  %v4315_v36 = vld [vmem:[%s8206_s3 + $0x3a8] sm:$0xff]  ;;  %v4333_v17 = vld [vmem:[%s8206_s3 + $0x3f8] sm:$0xff]  ;;  %v4348_v8 = vld [vmem:[%s8206_s3 + $0x430] sm:$0xff]  ;;  %v1522_v11 = vpop.f32.mrf.mxu3 }
 0x313   : > { %4287 = vmatmul.msk.f32.gmra.mxu2 %vm8241_vm3, %v1931_v50  ;;  %2133 = vmatpush.msra.mxu0 %v4315_v36  ;;  %v4332_v50 = vld [vmem:[%s8206_s3 + $0x3f0] sm:$0xff]  ;;  %v1295_v9 = vadd.f32 %v6177_v53, %v1235_v54 }
 0x314   : > { %v6361_v20 = vmax.f32 %v1628_v31, 0.0  ;;  %v1234_v31 = vadd.f32 %v6113_v39, %v6081_v60  ;;  %2223 = vmatpush.msra.mxu1 %v4333_v17  ;;  %2282 = vmatpush.msra.mxu2 %v4348_v8  ;;  %v4345_v17 = vld [vmem:[%s8206_s3 + $0x418] sm:$0xff]  ;;  %v4363_v8 = vld [vmem:[%s8206_s3 + $0x470] sm:$0xff] }
 0x315   : > { %2134 = vmatpush.msra.mxu0 %v4314_v37  ;;  %v4346_v37 = vld [vmem:[%s8206_s3 + $0x420] sm:$0xff]  ;;  %2368 = vmatpush.msra.mxu3 %v4363_v8 }
 0x316   : > { %4250 = vmatmul.msk.f32.gmra.mxu3 %vm8241_vm3, %v6361_v20  ;;  %v1652_v1 = vrot.slane %v6361_v20, 7  ;;  %v1816_v12 = vrot.slane %v6361_v20, 1  ;;  %2224 = vmatpush.msra.mxu1 %v4332_v50  ;;  %v4328_v50 = vld [vmem:[%s8206_s3 + $0x3d0] sm:$0xff] }
 0x317   : > { %v1602_v21 = vpop.f32.mrf.mxu2 }
 0x318   : > { %v1620_v10 = vadd.f32 %v1602_v21, %v1534_v29  ;;  %v6380_v19 = vsel %vm8350_vm10, %v1650_v28, %v1652_v1  ;;  %v6383_v4 = vsel %vm8351_vm7, %v1814_v32, %v1816_v12  ;;  %v1385_v28 = vadd.f32 %v6201_v35, %v1293_v24  ;;  %v4313_v35 = vld [vmem:[%s8206_s3 + $0x398] sm:$0xff] }
 0x319   : > { %v1672_v41 = vsel %vm5366_vm5, %v6380_v19, 0.0  ;;  %v1839_v23 = vsel %vm5724_vm13, %v6383_v4, 0.0  ;;  %v1932_v57 = vsel %vm5301_vm4, %v6380_v19, 0.0  ;;  %2135 = vmatpush.msra.mxu0 %v4313_v35  ;;  %v1294_v29 = vadd.f32 %v6168_v22, %v1234_v31 }
 0x31a   : > { %v1629_v32 = vadd.f32 %v6293_v18, %v1620_v10  ;;  %4257 = vmatmul.msk.f32.gmra.mxu0 %vm8241_vm3, %v1672_v41  ;;  %4272 = vmatmul.msk.f32.gmra.mxu1 %vm8241_vm3, %v1839_v23  ;;  %v1477_v61 = vadd.f32 %v6232_v38, %v1385_v28  ;;  %v4312_v38 = vld [vmem:[%s8206_s3 + $0x390] sm:$0xff]  ;;  %v4310_v41 = vld [vmem:[%s8206_s3 + $0x380] sm:$0xff] }
 0x31b   : > { %4288 = vmatmul.msk.f32.gmra.mxu2 %vm8241_vm3, %v1932_v57  ;;  %2136 = vmatpush.msra.mxu0 %v4312_v38  ;;  %v4330_v57 = vld [vmem:[%s8206_s3 + $0x3e0] sm:$0xff]  ;;  %v1386_v28 = vadd.f32 %v6208_v30, %v1294_v29  ;;  %v4329_v30 = vld [vmem:[%s8206_s3 + $0x3d8] sm:$0xff]  ;;  %v1525_v29 = vpop.f32.mrf.mxu3 }
 0x31c   : > { %v6406_v47 = vmax.f32 %v1629_v32, 0.0  ;;  %v1535_v0 = vadd.f32 %v1519_v46, %v1477_v61  ;;  %v4331_v46 = vld [vmem:[%s8206_s3 + $0x3e8] sm:$0xff] }
 0x31d   : > { %2137 = vmatpush.msra.mxu0 %v4311_v40  ;;  %2225 = vmatpush.msra.mxu1 %v4331_v46  ;;  %v1478_v61 = vadd.f32 %v6258_v42, %v1386_v28  ;;  %v4327_v46 = vld [vmem:[%s8206_s3 + $0x3c8] sm:$0xff] }
 0x31e   : > { %4251 = vmatmul.msk.f32.gmra.mxu3 %vm8241_vm3, %v6406_v47  ;;  %v1654_v60 = vrot.slane %v6406_v47, 7  ;;  %v1818_v39 = vrot.slane %v6406_v47, 1 }
 0x31f   : > { %v1605_v21 = vpop.f32.mrf.mxu2  ;;  %2138 = vmatpush.msra.mxu0 %v4310_v41  ;;  %2226 = vmatpush.msra.mxu1 %v4330_v57  ;;  %v1536_v31 = vadd.f32 %v1522_v11, %v1478_v61  ;;  %v4326_v41 = vld [vmem:[%s8206_s3 + $0x3c0] sm:$0xff] }
 0x320   : > { %v1621_v24 = vadd.f32 %v1605_v21, %v1535_v0  ;;  %v6443_v10 = vsel %vm8350_vm10, %v1652_v1, %v1654_v60  ;;  %v6446_v36 = vsel %vm8351_vm7, %v1816_v12, %v1818_v39  ;;  %v4347_v12 = vld [vmem:[%s8206_s3 + $0x428] sm:$0xff]  ;;  %v1387_v21 = vadd.f32 %v6218_v45, %v1295_v9 }
 0x321   : > { %v1673_v22 = vsel %vm8344_vm8, %v6443_v10, 0.0  ;;  %v1840_v23 = vsel %vm5745_vm14, %v6446_v36, 0.0  ;;  %v1933_v1 = vsel %vm5366_vm5, %v6443_v10, 0.0  ;;  %2283 = vmatpush.msra.mxu2 %v4347_v12  ;;  %2227 = vmatpush.msra.mxu1 %v4329_v30  ;;  %v1236_v12 = vadd.f32 %v6134_v26, %v6103_v51 }
 0x322   : > { %v1630_v32 = vadd.f32 %v6293_v18, %v1621_v24  ;;  %4258 = vmatmul.msk.f32.gmra.mxu0 %vm8241_vm3, %v1673_v22  ;;  %4273 = vmatmul.msk.f32.gmra.mxu1 %vm8241_vm3, %v1840_v23  ;;  %v4343_v22 = vld [vmem:[%s8206_s3 + $0x408] sm:$0xff]  ;;  %v1479_v23 = vadd.f32 %v6272_v2, %v1387_v21 }
 0x323   : > { %4289 = vmatmul.msk.f32.gmra.mxu2 %vm8241_vm3, %v1933_v1  ;;  %2228 = vmatpush.msra.mxu1 %v4328_v50  ;;  %v4342_v1 = vld [vmem:[%s8206_s3 + $0x400] sm:$0xff]  ;;  %v4362_v2 = vld [vmem:[%s8206_s3 + $0x468] sm:$0xff]  ;;  %v1296_v61 = vadd.f32 %v6185_v49, %v1236_v12  ;;  %v4360_v12 = vld [vmem:[%s8206_s3 + $0x458] sm:$0xff] }
 0x324   : > { %v6475_v35 = vmax.f32 %v1630_v32, 0.0  ;;  %2284 = vmatpush.msra.mxu2 %v4346_v37  ;;  %v1537_v57 = vadd.f32 %v1525_v29, %v1479_v23  ;;  %2369 = vmatpush.msra.mxu3 %v4362_v2 }
 0x325   : > { %2229 = vmatpush.msra.mxu1 %v4327_v46 }
 0x326   : > { %4252 = vmatmul.msk.f32.gmra.mxu3 %vm8241_vm3, %v6475_v35  ;;  %v1656_v42 = vrot.slane %v6475_v35, 7  ;;  %v1820_v38 = vrot.slane %v6475_v35, 1  ;;  %2285 = vmatpush.msra.mxu2 %v4345_v17  ;;  %vm8352_vm3 = vnez %v8308_v58 }
 0x327   : > { %v1608_v0 = vpop.f32.mrf.mxu2  ;;  %2230 = vmatpush.msra.mxu1 %v4326_v41 }
 0x328   : > { %v1622_v59 = vadd.f32 %v1608_v0, %v1536_v31  ;;  %v6497_v44 = vsel %vm8350_vm10, %v1654_v60, %v1656_v42  ;;  %v6500_v40 = vsel %vm8351_vm7, %v1818_v39, %v1820_v38  ;;  %v4344_v39 = vld [vmem:[%s8206_s3 + $0x410] sm:$0xff]  ;;  %vm8353_vm10 = vcmask 523264  }
 0x329   : > { %v1674_v11 = vsel %vm8352_vm3, %v6497_v44, 0.0  ;;  %v1841_v53 = vsel %vm5778_vm15, %v6500_v40, 0.0  ;;  %v1934_v60 = vsel %vm8344_vm8, %v6497_v44, 0.0  ;;  %vm8354_vm7 = vmmov %vm8353_vm10  ;;  %2286 = vmatpush.msra.mxu2 %v4344_v39  ;;  %v1388_v31 = vadd.f32 %v6243_v43, %v1296_v61  ;;  %v8364_v39 = vld [vmem:[#allocation16_spill] sm:$0xff] }
 0x32a   : > { %v1631_v24 = vadd.f32 %v6293_v18, %v1622_v59  ;;  %4259 = vmatmul.msk.f32.gmra.mxu0 %vm8353_vm10, %v1674_v11  ;;  %4274 = vmatmul.msk.f32.gmra.mxu1 %vm8354_vm7, %v1841_v53  ;;  %vm8355_vm5 = vmmov %vm8354_vm7  ;;  %vm8356_vm10 = vcmask 1040384   ;;  %vm8357_vm7 = vcmask 1046528   ;;  %v4361_v59 = vld [vmem:[%s8206_s3 + $0x460] sm:$0xff]  ;;  %v2083_v61 = vsel %vm5703_vm12, %v6383_v4, 0.0 }
 0x32b   : > { %4290 = vmatmul.msk.f32.gmra.mxu2 %vm8355_vm5, %v1934_v60  ;;  %v1480_v50 = vadd.f32 %v6281_v62, %v1388_v31  ;;  %vm8360_vm8 = vmmov %vm8355_vm5  ;;  %2370 = vmatpush.msra.mxu3 %v4361_v59 }
 0x32c   : > { %v6529_v45 = vmax.f32 %v1631_v24, 0.0  ;;  %2287 = vmatpush.msra.mxu2 %v4343_v22 }
 0x32d   : > { %2371 = vmatpush.msra.mxu3 %v4360_v12 }
 0x32e   : > { %4253 = vmatmul.msk.f32.gmra.mxu3 %vm8355_vm5, %v6529_v45  ;;  %v1658_v28 = vrot.slane %v6529_v45, 7  ;;  %v1822_v32 = vrot.slane %v6529_v45, 1  ;;  %2288 = vmatpush.msra.mxu2 %v4342_v1 }
 0x32f   : > { %v1611_v37 = vpop.f32.mrf.mxu2 }
 0x330   : > { %v1623_v30 = vadd.f32 %v1611_v37, %v1537_v57  ;;  %v6545_v51 = vsel %vm8356_vm10, %v1656_v42, %v1658_v28  ;;  %v6548_v26 = vsel %vm8357_vm7, %v1820_v38, %v1822_v32  ;;  %vm8358_vm10 = vmmov %vm8355_vm5  ;;  %v1528_v38 = vpop.f32.mrf.mxu3  ;;  %v2174_v37 = vsel %vm5212_vm1, %v6341_v25, 0.0 }
 0x331   : > { %v1675_v17 = vsel %vm8346_vm6, %v6545_v51, 0.0  ;;  %v1842_v54 = vsel %vm5811_vm0, %v6548_v26, 0.0  ;;  %v1935_v49 = vsel %vm8352_vm3, %v6545_v51, 0.0  ;;  %vm8359_vm7 = vmmov %vm8355_vm5  ;;  %v1538_v0 = vadd.f32 %v1528_v38, %v1480_v50 }
 0x332   : > { %v1632_v42 = vadd.f32 %v6293_v18, %v1623_v30  ;;  %4260 = vmatmul.msk.f32.gmra.mxu0 %vm8355_vm5, %v1675_v17  ;;  %4275 = vmatmul.msk.f32.gmra.mxu1 %vm8358_vm10, %v1842_v54  ;;  %vm8361_vm5 = vcmask 1040384   ;;  %vm8362_vm10 = vcmask 1046528   ;;  %v4358_v30 = vld [vmem:[%s8206_s3 + $0x448] sm:$0xff]  ;;  %v2084_v25 = vsel %vm5724_vm13, %v6446_v36, 0.0 }
 0x333   : > { %4291 = vmatmul.msk.f32.gmra.mxu2 %vm8359_vm7, %v1935_v49  ;;  %v2175_v17 = vsel %vm5261_vm2, %v6380_v19, 0.0  ;;  %v2085_v54 = vsel %vm5745_vm14, %v6500_v40, 0.0  ;;  %v2176_v19 = vsel %vm5301_vm4, %v6443_v10, 0.0 }
 0x334   : > { %v6565_v8 = vmax.f32 %v1632_v42, 0.0  ;;  %v2322_v42 = vsel %vm5680_vm11, %v6383_v4, 0.0 }
 0x336   : > { %4254 = vmatmul.msk.f32.gmra.mxu3 %vm8360_vm8, %v6565_v8  ;;  %v1660_v9 = vrot.slane %v6565_v8, 7  ;;  %v1824_v43 = vrot.slane %v6565_v8, 1  ;;  %vm8365_vm8 = vnez %v8364_v39 }
 0x337   : > { %v1614_v46 = vpop.f32.mrf.mxu2 }
 0x338   : > { %v1624_v29 = vadd.f32 %v1614_v46, %v1538_v0  ;;  %v6575_v11 = vsel %vm8361_vm5, %v1658_v28, %v1660_v9  ;;  %v6578_v62 = vsel %vm8362_vm10, %v1822_v32, %v1824_v43  ;;  %vm8366_vm5 = vmmov %vm8359_vm7  ;;  %v2082_v28 = vsel %vm5680_vm11, %v6344_v63, 0.0  ;;  %v4359_v63 = vld [vmem:[%s8206_s3 + $0x450] sm:$0xff]  ;;  %v6714_v50 = vpop.f32.mrf.mxu3 }
 0x339   : > { %v1676_v60 = vsel %vm5637_vm9, %v6575_v11, 0.0  ;;  %v1843_v21 = vsel %vm8365_vm8, %v6578_v62, 0.0  ;;  %v1936_v24 = vsel %vm8346_vm6, %v6575_v11, 0.0  ;;  %vm8367_vm10 = vmmov %vm8366_vm5  ;;  %vm8369_vm6 = vcmask 1046528   ;;  %2372 = vmatpush.msra.mxu3 %v4359_v63 }
 0x33a   : > { %v1633_v41 = vadd.f32 %v6293_v18, %v1624_v29  ;;  %4261 = vmatmul.msk.f32.gmra.mxu0 %vm8359_vm7, %v1676_v60  ;;  %4276 = vmatmul.msk.f32.gmra.mxu1 %vm8366_vm5, %v1843_v21  ;;  %vm8368_vm3 = vmmov %vm8366_vm5  ;;  %vm8370_vm7 = vcmask 1040384   ;;  %v8407_v0 = vmov 0.0   ;;  %v2325_v46 = vsel %vm5745_vm14, %v6548_v26, 0.0 }
 0x33b   : > { %4292 = vmatmul.msk.f32.gmra.mxu2 %vm8367_vm10, %v1936_v24  ;;  %vm8373_vm10 = vmmov %vm8366_vm5  ;;  %2373 = vmatpush.msra.mxu3 %v4358_v30 }
 0x33c   : > { %v6593_v22 = vmax.f32 %v1633_v41, 0.0  ;;  %vm8374_vm8 = vmmov %vm8366_vm5 }
 0x33d   : > { %vm8386_vm1 = vmmov %vm8366_vm5 }
 0x33e   : > { %4302 = vmatmul.msk.f32.vlgmr.msrb.gmra.mxu3 %vm8368_vm3, %v6302_v48  ;;  %v1826_v23 = vrot.slane %v6593_v22, 1  ;;  %v1927_v1 = vrot.slane %v6593_v22, 7  ;;  %v8371_v48 = vld [vmem:[#allocation17_spill] sm:$0xff]  ;;  %vm8387_vm4 = vmmov %vm8386_vm1 }
 0x33f   : > { %vm8372_vm3 = vnez %v8371_v48  ;;  %vm8396_vm2 = vmmov %vm8386_vm1 }
 0x340   : > { %v6603_v18 = vsel %vm8369_vm6, %v1824_v43, %v1826_v23  ;;  %v1928_v57 = vsel %vm8370_vm7, %v1660_v9, %v1927_v1  ;;  %vm8375_vm6 = vmmov %vm8366_vm5  ;;  %v2323_v9 = vsel %vm5703_vm12, %v6446_v36, 0.0  ;;  %v2324_v43 = vsel %vm5724_vm13, %v6500_v40, 0.0  ;;  %v6738_v36 = vpop.f32.mrf.mxu0 }
 0x341   : > { %v1844_v32 = vsel %vm8372_vm3, %v6603_v18, 0.0  ;;  %v1937_v2 = vsel %vm5637_vm9, %v1928_v57, 0.0  ;;  %vm8376_vm7 = vmmov %vm8366_vm5  ;;  %v2326_v40 = vsel %vm5778_vm15, %v6578_v62, 0.0  ;;  %v2327_v24 = vsel %vm5811_vm0, %v6603_v18, 0.0 }
 0x342   : > { %4277 = vmatmul.msk.f32.gmra.mxu1 %vm8366_vm5, %v1844_v32  ;;  %4318 = vmatmul.msk.f32.vlgmr.msra.gmra.mxu0 %vm8373_vm10, %v2082_v28  ;;  %vm8378_vm10 = vmmov %vm8366_vm5  ;;  %v4385_v32 = vld [vmem:[%s8206_s3 + $0x4e8] sm:$0xff] }
 0x343   : > { %4293 = vmatmul.msk.f32.gmra.mxu2 %vm8374_vm8, %v1937_v2  ;;  %vm8377_vm8 = vmmov %vm8366_vm5 }
 0x346   : > { %4303 = vmatmul.msk.f32.gmra.mxu3 %vm8375_vm6, %v6328_v52  ;;  %vm8379_vm6 = vmmov %vm8366_vm5 }
 0x34a   : > { %4319 = vmatmul.msk.f32.gmra.mxu0 %vm8376_vm7, %v2083_v61  ;;  %4334 = vmatmul.msk.f32.vlgmr.msra.gmra.mxu1 %vm8366_vm5, %v2174_v37  ;;  %vm8380_vm7 = vmmov %vm8366_vm5  ;;  %v4384_v61 = vld [vmem:[%s8206_s3 + $0x4e0] sm:$0xff] }
 0x34b   : > { %4350 = vmatmul.msk.f32.vlgmr.msra.gmra.mxu2 %vm8377_vm8, %v6328_v52  ;;  %vm8381_vm8 = vmmov %vm8366_vm5  ;;  %v4357_v52 = vld [vmem:[%s8206_s3 + $0x440] sm:$0xff] }
 0x34c   : > { %2374 = vmatpush.msra.mxu3 %v4357_v52  ;;  %v4383_v52 = vld [vmem:[%s8206_s3 + $0x4d8] sm:$0xff] }
 0x34e   : > { %4304 = vmatmul.msk.f32.gmra.mxu3 %vm8378_vm10, %v6361_v20  ;;  %vm8382_vm10 = vmmov %vm8366_vm5 }
 0x352   : > { %4320 = vmatmul.msk.f32.gmra.mxu0 %vm8379_vm6, %v2084_v25  ;;  %4335 = vmatmul.msk.f32.gmra.mxu1 %vm8380_vm7, %v2175_v17  ;;  %vm8383_vm6 = vmmov %vm8366_vm5 }
 0x353   : > { %4351 = vmatmul.msk.f32.gmra.mxu2 %vm8366_vm5, %v6361_v20  ;;  %vm8384_vm7 = vmmov %vm8366_vm5  ;;  %v2086_v20 = vsel %vm5778_vm15, %v6548_v26, 0.0  ;;  %v4387_v26 = vld [vmem:[%s8206_s3 + $0x4f8] sm:$0xff] }
 0x354   : > { %2508 = vmatpush.msrb.mxu0 %v4387_v26  ;;  %v4380_v26 = vld [vmem:[%s8206_s3 + $0x4c0] sm:$0xff] }
 0x356   : > { %4305 = vmatmul.msk.f32.gmra.mxu3 %vm8381_vm8, %v6406_v47  ;;  %vm8385_vm8 = vnez %v8302_v27 }
 0x357   : > { %v2177_v49 = vsel %vm8385_vm8, %v6497_v44, 0.0  ;;  %vm8392_vm8 = vmmov %vm8386_vm1 }
 0x35a   : > { %4321 = vmatmul.msk.f32.gmra.mxu0 %vm8382_vm10, %v2085_v54  ;;  %4336 = vmatmul.msk.f32.gmra.mxu1 %vm8383_vm6, %v2176_v19  ;;  %vm8388_vm10 = vmmov %vm8386_vm1 }
 0x35b   : > { %4352 = vmatmul.msk.f32.gmra.mxu2 %vm8384_vm7, %v6406_v47  ;;  %vm8389_vm6 = vmmov %vm8386_vm1  ;;  %v2087_v47 = vsel %vm5811_vm0, %v6578_v62, 0.0  ;;  %vm8390_vm7 = vnez %v8305_v56 }
 0x35c   : > { %v2178_v10 = vsel %vm8390_vm7, %v6545_v51, 0.0  ;;  %vm8397_vm7 = vmmov %vm8386_vm1 }
 0x35e   : > { %4306 = vmatmul.msk.f32.gmra.mxu3 %vm8366_vm5, %v6475_v35  ;;  %vm8391_vm5 = vmmov %vm8386_vm1 }
 0x362   : > { %4322 = vmatmul.msk.f32.gmra.mxu0 %vm8386_vm1, %v2086_v20  ;;  %4337 = vmatmul.msk.f32.gmra.mxu1 %vm8387_vm4, %v2177_v49  ;;  %vm8393_vm4 = vmmov %vm8386_vm1 }
 0x363   : > { %4353 = vmatmul.msk.f32.gmra.mxu2 %vm8388_vm10, %v6475_v35  ;;  %vm8394_vm10 = vnez %v8364_v39 }
 0x364   : > { %v2088_v35 = vsel %vm8394_vm10, %v6603_v18, 0.0  ;;  %vm8402_vm10 = vmmov %vm8396_vm2 }
 0x366   : > { %4307 = vmatmul.msk.f32.gmra.mxu3 %vm8389_vm6, %v6529_v45  ;;  %vm8395_vm6 = vnez %v8308_v58 }
 0x367   : > { %v2179_v44 = vsel %vm8395_vm6, %v6575_v11, 0.0  ;;  %vm8403_vm6 = vmmov %vm8396_vm2 }
 0x36a   : > { %4323 = vmatmul.msk.f32.gmra.mxu0 %vm8391_vm5, %v2087_v47  ;;  %4338 = vmatmul.msk.f32.gmra.mxu1 %vm8392_vm8, %v2178_v10  ;;  %vm8398_vm8 = vmmov %vm8386_vm1  ;;  %v4382_v47 = vld [vmem:[%s8206_s3 + $0x4d0] sm:$0xff] }
 0x36b   : > { %4354 = vmatmul.msk.f32.gmra.mxu2 %vm8386_vm1, %v6529_v45  ;;  %vm8399_vm5 = vmmov %vm8386_vm1  ;;  %vm8400_vm1 = vcmask 1046528  }
 0x36c   : > { %v2081_v45 = vsel %vm8400_vm1, %v1826_v23, 0.0  ;;  %vm8410_vm1 = vmmov %vm8396_vm2 }
 0x36d   : > { %v2089_v51 = vsel %vm8372_vm3, %v2081_v45, 0.0 }
 0x36e   : > { %4308 = vmatmul.msk.f32.gmra.mxu3 %vm8393_vm4, %v6565_v8  ;;  %vm8401_vm4 = vnez %v8311_v55 }
 0x36f   : > { %v2180_v31 = vsel %vm8401_vm4, %v1928_v57, 0.0 }
 0x372   : > { %4324 = vmatmul.msk.f32.gmra.mxu0 %vm8396_vm2, %v2088_v35  ;;  %4339 = vmatmul.msk.f32.gmra.mxu1 %vm8397_vm7, %v2179_v44  ;;  %vm8404_vm7 = vmmov %vm8396_vm2 }
 0x373   : > { %4355 = vmatmul.msk.f32.gmra.mxu2 %vm8398_vm8, %v6565_v8  ;;  %vm8405_vm8 = vcmask 1040384  }
 0x374   : > { %v2173_v38 = vsel %vm8405_vm8, %v1927_v1, 0.0  ;;  %v4386_v1 = vld [vmem:[%s8206_s3 + $0x4f0] sm:$0xff]  ;;  %vm8413_vm8 = vnez %v8364_v39 }
 0x375   : > { %v2181_v8 = vsel %vm5637_vm9, %v2173_v38, 0.0  ;;  %2509 = vmatpush.msrb.mxu0 %v4386_v1  ;;  %v2328_v12 = vsel %vm8413_vm8, %v2081_v45, 0.0 }
 0x376   : > { %4309 = vmatmul.msk.f32.gmra.mxu3 %vm8399_vm5, %v6593_v22  ;;  %vm8406_vm5 = vmmov %vm8396_vm2 }
 0x377   : > { %2510 = vmatpush.msrb.mxu0 %v4385_v32  ;;  %v4374_v32 = vld [vmem:[%s8206_s3 + $0x490] sm:$0xff] }
 0x379   : > { %2511 = vmatpush.msrb.mxu0 %v4384_v61  ;;  %v4373_v61 = vld [vmem:[%s8206_s3 + $0x488] sm:$0xff] }
 0x37a   : > { %4325 = vmatmul.msk.f32.gmra.mxu0 %vm8402_vm10, %v2089_v51  ;;  %4340 = vmatmul.msk.f32.gmra.mxu1 %vm8403_vm6, %v2180_v31  ;;  %vm8408_vm10 = vmmov %vm8396_vm2  ;;  %v4381_v51 = vld [vmem:[%s8206_s3 + $0x4c8] sm:$0xff]  ;;  %v4379_v31 = vld [vmem:[%s8206_s3 + $0x4b8] sm:$0xff] }
 0x37b   : > { %4356 = vmatmul.msk.f32.gmra.mxu2 %vm8396_vm2, %v6593_v22  ;;  %vm8409_vm6 = vmmov %vm8396_vm2  ;;  %2512 = vmatpush.msrb.mxu0 %v4383_v52  ;;  %v4408_v52 = vld [vmem:[%s8206_s3 + $0x530] sm:$0xff] }
 0x37c   : > { %vm8411_vm2 = vmmov %vm8410_vm1  ;;  %2570 = vmatpush.msrb.mxu1 %v4379_v31  ;;  %v4372_v31 = vld [vmem:[%s8206_s3 + $0x480] sm:$0xff] }
 0x37d   : > { %2513 = vmatpush.msrb.mxu0 %v4382_v47 }
 0x37e   : > { %4365 = vmatmul.msk.f32.vlgmr.msra.gmra.mxu3 %vm8404_vm7, %v2322_v42  ;;  %vm8412_vm7 = vmmov %vm8410_vm1  ;;  %v4378_v42 = vld [vmem:[%s8206_s3 + $0x4b0] sm:$0xff] }
 0x37f   : > { %2514 = vmatpush.msrb.mxu0 %v4381_v51  ;;  %2571 = vmatpush.msrb.mxu1 %v4378_v42  ;;  %v4424_v42 = vld [vmem:[%s8206_s3 + $0x570] sm:$0xff] }
 0x381   : > { %2515 = vmatpush.msrb.mxu0 %v4380_v26 }
 0x382   : > { %4341 = vmatmul.msk.f32.gmra.mxu1 %vm8406_vm5, %v2181_v8  ;;  %vm8414_vm5 = vmmov %vm8410_vm1  ;;  %v4377_v8 = vld [vmem:[%s8206_s3 + $0x4a8] sm:$0xff]  ;;  %2516 = vmatmul.f32.vlgmr.msrb.gmra.mxu0 %v8407_v0 }
 0x383   : > { %2310 = vmatmul.f32.gmra.mxu2 %v8407_v0  ;;  %2572 = vmatpush.msrb.mxu1 %v4377_v8 }
 0x386   : > { %4366 = vmatmul.msk.f32.gmra.mxu3 %vm8408_vm10, %v2323_v9  ;;  %v4409_v9 = vld [vmem:[%s8206_s3 + $0x538] sm:$0xff]  ;;  %vm8419_vm10 = vmmov %vm8410_vm1 }
 0x387   : > { %v6740_v11 = vpop.f32.mrf.mxu1  ;;  %v6756_v41 = vpop.f32.mrf.mxu0  ;;  %2677 = vmatpush.msrb.mxu2 %v4409_v9  ;;  %v4407_v9 = vld [vmem:[%s8206_s3 + $0x528] sm:$0xff] }
 0x389   : > { %v6724_v4 = vpop.f32.mrf.mxu3  ;;  %2678 = vmatpush.msrb.mxu2 %v4408_v52  ;;  %v4421_v52 = vld [vmem:[%s8206_s3 + $0x558] sm:$0xff] }
 0x38b   : > { %2679 = vmatpush.msrb.mxu2 %v4407_v9  ;;  %v4420_v9 = vld [vmem:[%s8206_s3 + $0x550] sm:$0xff] }
 0x38e   : > { %4367 = vmatmul.msk.f32.gmra.mxu3 %vm8409_vm6, %v2324_v43  ;;  %v6746_v60 = vpop.f32.mrf.mxu2  ;;  %vm8420_vm6 = vcmask 1040384  }
 0x38f   : > { %v6759_v62 = vpop.f32.mrf.mxu1  ;;  %v6771_v18 = vpop.f32.mrf.mxu0 }
 0x391   : > { %v6730_v59 = vpop.f32.mrf.mxu3 }
 0x396   : > { %4368 = vmatmul.msk.f32.gmra.mxu3 %vm8410_vm1, %v2325_v46  ;;  %v6761_v22 = vpop.f32.mrf.mxu2  ;;  %vm8421_vm1 = vcmask 1046528  }
 0x397   : > { %v6773_v57 = vpop.f32.mrf.mxu1  ;;  %v6785_v37 = vpop.f32.mrf.mxu0 }
 0x399   : > { %v6736_v29 = vpop.f32.mrf.mxu3 }
 0x39e   : > { %4369 = vmatmul.msk.f32.gmra.mxu3 %vm8411_vm2, %v2326_v40  ;;  %v6780_v2 = vpop.f32.mrf.mxu2  ;;  %v4376_v40 = vld [vmem:[%s8206_s3 + $0x4a0] sm:$0xff]  ;;  %vm8422_vm2 = vnez %v8296_v13 }
 0x39f   : > { %v6790_v30 = vpop.f32.mrf.mxu1  ;;  %v6799_v54 = vpop.f32.mrf.mxu0  ;;  %2573 = vmatpush.msrb.mxu1 %v4376_v40  ;;  %v4423_v40 = vld [vmem:[%s8206_s3 + $0x568] sm:$0xff] }
 0x3a1   : > { %v6748_v21 = vpop.f32.mrf.mxu3 }
 0x3a6   : > { %4370 = vmatmul.msk.f32.gmra.mxu3 %vm8412_vm7, %v2327_v24  ;;  %v6792_v25 = vpop.f32.mrf.mxu2  ;;  %v4425_v24 = vld [vmem:[%s8206_s3 + $0x578] sm:$0xff]  ;;  %vm8423_vm7 = vnez %v8294_v6 }
 0x3a7   : > { %v6801_v19 = vpop.f32.mrf.mxu1  ;;  %v6810_v10 = vpop.f32.mrf.mxu0  ;;  %2770 = vmatpush.msrb.mxu3 %v4425_v24  ;;  %v4406_v24 = vld [vmem:[%s8206_s3 + $0x520] sm:$0xff] }
 0x3a8   : > { %2680 = vmatpush.msrb.mxu2 %v4406_v24  ;;  %v4403_v24 = vld [vmem:[%s8206_s3 + $0x508] sm:$0xff] }
 0x3a9   : > { %v6763_v23 = vpop.f32.mrf.mxu3  ;;  %2771 = vmatpush.msrb.mxu3 %v4424_v42  ;;  %v4404_v42 = vld [vmem:[%s8206_s3 + $0x510] sm:$0xff] }
 0x3ab   : > { %2772 = vmatpush.msrb.mxu3 %v4423_v40 }
 0x3ae   : > { %4371 = vmatmul.msk.f32.gmra.mxu3 %vm8414_vm5, %v2328_v12  ;;  %v6803_v20 = vpop.f32.mrf.mxu2  ;;  %v4375_v12 = vld [vmem:[%s8206_s3 + $0x498] sm:$0xff] }
 0x3af   : > { %v6812_v35 = vpop.f32.mrf.mxu1  ;;  %v6827_v38 = vpop.f32.mrf.mxu0  ;;  %2574 = vmatpush.msrb.mxu1 %v4375_v12  ;;  %v4422_v12 = vld [vmem:[%s8206_s3 + $0x560] sm:$0xff] }
 0x3b0   : > { %2773 = vmatpush.msrb.mxu3 %v4422_v12  ;;  %v4419_v12 = vld [vmem:[%s8206_s3 + $0x548] sm:$0xff] }
 0x3b1   : > { %v6775_v28 = vpop.f32.mrf.mxu3  ;;  %2575 = vmatpush.msrb.mxu1 %v4374_v32  ;;  %v4441_v32 = vld [vmem:[%s8206_s3 + $0x5b8] sm:$0xff] }
 0x3b2   : > { %2830 = vmatpush.msra.mxu0 %v4441_v32  ;;  %2774 = vmatpush.msrb.mxu3 %v4421_v52  ;;  %v4418_v52 = vld [vmem:[%s8206_s3 + $0x540] sm:$0xff] }
 0x3b3   : > { %2576 = vmatpush.msrb.mxu1 %v4373_v61  ;;  %v4405_v61 = vld [vmem:[%s8206_s3 + $0x518] sm:$0xff] }
 0x3b4   : > { %2681 = vmatpush.msrb.mxu2 %v4405_v61  ;;  %2775 = vmatpush.msrb.mxu3 %v4420_v9  ;;  %v4402_v61 = vld [vmem:[%s8206_s3 + $0x500] sm:$0xff]  ;;  %v4440_v9 = vld [vmem:[%s8206_s3 + $0x5b0] sm:$0xff] }
 0x3b5   : > { %2577 = vmatpush.msrb.mxu1 %v4372_v31  ;;  %2831 = vmatpush.msra.mxu0 %v4440_v9  ;;  %v1792_v9 = vadd.f32 %v6756_v41, %v6724_v4 }
 0x3b6   : > { %2396 = vmatmul.f32.gmra.mxu3 %v8407_v0  ;;  %v6814_v44 = vpop.f32.mrf.mxu2  ;;  %2578 = vmatmul.f32.vlgmr.msrb.gmra.mxu1 %v8407_v0 }
 0x3b7   : > { %v6835_v43 = vpop.f32.mrf.mxu1  ;;  %v6865_v51 = vpop.f32.mrf.mxu0  ;;  %2682 = vmatpush.msrb.mxu2 %v4404_v42  ;;  %2776 = vmatpush.msrb.mxu3 %v4419_v12 }
 0x3b9   : > { %v6783_v63 = vpop.f32.mrf.mxu3  ;;  %2683 = vmatpush.msrb.mxu2 %v4403_v24  ;;  %2777 = vmatpush.msrb.mxu3 %v4418_v52  ;;  %v1789_v24 = vadd.f32 %v6738_v36, %v6714_v50  ;;  %v1920_v50 = vadd.f32 %v6759_v62, %v1792_v9 }
 0x3bb   : > { %2684 = vmatpush.msrb.mxu2 %v4402_v61  ;;  %v1919_v12 = vadd.f32 %v6740_v11, %v1789_v24  ;;  %v4439_v61 = vld [vmem:[%s8206_s3 + $0x5a8] sm:$0xff]  ;;  %v2013_v11 = vadd.f32 %v6761_v22, %v1920_v50 }
 0x3bc   : > { %2832 = vmatpush.msra.mxu0 %v4439_v61  ;;  %v4438_v61 = vld [vmem:[%s8206_s3 + $0x5a0] sm:$0xff] }
 0x3bd   : > { %v2012_v48 = vadd.f32 %v6746_v60, %v1919_v12  ;;  %v6940_v12 = vperm.slane %v6288_v33, 1 }
 0x3be   : > { %v6848_v1 = vpop.f32.mrf.mxu2  ;;  %2833 = vmatpush.msra.mxu0 %v4438_v61 }
 0x3bf   : > { %v6873_v8 = vpop.f32.mrf.mxu1  ;;  %v2140_v40 = vpop.f32.mrf.mxu0 }
 0x3c1   : > { %v6794_v17 = vpop.f32.mrf.mxu3 }
 0x3c2   : > { %v2072_v5 = vadd.f32 %v6794_v17, %v2012_v48 }
 0x3c4   : > { %v2164_v36 = vadd.f32 %v2140_v40, %v2072_v5  ;;  %v1795_v5 = vadd.f32 %v6771_v18, %v6730_v59  ;;  %v4437_v59 = vld [vmem:[%s8206_s3 + $0x598] sm:$0xff]  ;;  %v1798_v18 = vadd.f32 %v6785_v37, %v6736_v29 }
 0x3c5   : > { %2834 = vmatpush.msra.mxu0 %v4437_v59 }
 0x3c6   : > { %v6882_v26 = vpop.f32.mrf.mxu2  ;;  %v1921_v62 = vadd.f32 %v6773_v57, %v1795_v5 }
 0x3c7   : > { %8415 = vst [vmem:[#allocation18_spill] sm:$0xff] %v6882_v26  ;;  %v2232_v32 = vpop.f32.mrf.mxu1  ;;  %v2143_v39 = vpop.f32.mrf.mxu0 }
 0x3c8   : > { %v2256_v60 = vadd.f32 %v2232_v32, %v2164_v36  ;;  %v2014_v33 = vadd.f32 %v6780_v2, %v1921_v62  ;;  %v8417_v32 = vld [vmem:[#allocation5_spill] sm:$0xff]  ;;  %v1922_v2 = vadd.f32 %v6790_v30, %v1798_v18 }
 0x3c9   : > { %v6805_v49 = vpop.f32.mrf.mxu3 }
 0x3ca   : > { %v2073_v24 = vadd.f32 %v6805_v49, %v2013_v11  ;;  %v2015_v30 = vadd.f32 %v6792_v25, %v1922_v2  ;;  %v1801_v25 = vadd.f32 %v6799_v54, %v6748_v21  ;;  %v8432_v2 = vld [vmem:[#allocation7_spill] sm:$0xff] }
 0x3cc   : > { %v2165_v22 = vadd.f32 %v2143_v39, %v2073_v24 }
 0x3ce   : > { %v2290_v42 = vpop.f32.mrf.mxu2 }
 0x3cf   : > { %v2235_v53 = vpop.f32.mrf.mxu1  ;;  %v2314_v48 = vadd.f32 %v2290_v42, %v2256_v60  ;;  %v2146_v17 = vpop.f32.mrf.mxu0 }
 0x3d0   : > { %v2257_v40 = vadd.f32 %v2235_v53, %v2165_v22 }
 0x3d1   : > { %v6816_v45 = vpop.f32.mrf.mxu3 }
 0x3d2   : > { %v2074_v9 = vadd.f32 %v6816_v45, %v2014_v33 }
 0x3d4   : > { %v2166_v11 = vadd.f32 %v2146_v17, %v2074_v9  ;;  %v8424_v17 = vld [vmem:[#allocation6_spill] sm:$0xff] }
 0x3d6   : > { %v2293_v55 = vpop.f32.mrf.mxu2 }
 0x3d7   : > { %v2315_v50 = vadd.f32 %v2293_v55, %v2257_v40  ;;  %v2149_v57 = vpop.f32.mrf.mxu0  ;;  %v4436_v40 = vld [vmem:[%s8206_s3 + $0x590] sm:$0xff] }
 0x3d8   : > { %2835 = vmatpush.msra.mxu0 %v4436_v40 }
 0x3d9   : > { %v6837_v46 = vpop.f32.mrf.mxu3 }
 0x3da   : > { %v2075_v22 = vadd.f32 %v6837_v46, %v2015_v30 }
 0x3de   : > { %v2296_v41 = vpop.f32.mrf.mxu2 }
 0x3df   : > { %v2152_v9 = vpop.f32.mrf.mxu0 }
 0x3e1   : > { %v6863_v47 = vpop.f32.mrf.mxu3 }
 0x3e6   : > { %v2299_v37 = vpop.f32.mrf.mxu2 }
 0x3e9   : > { %v6899_v31 = vpop.f32.mrf.mxu3 }
 0x3f1   : > { %v6922_v0 = vpop.f32.mrf.mxu3 }
 0x3f9   : > { %v6932_v52 = vpop.f32.mrf.mxu3 }
 0x3fa   : > { %8416 = vst [vmem:[#allocation19_spill] sm:$0xff] %v6932_v52  ;;  %v2238_v52 = vpop.f32.mrf.mxu1 }
 0x401   : > { %v2376_v26 = vpop.f32.mrf.mxu3 }
 0x402   : > { %v2400_v4 = vadd.f32 %v2376_v26, %v2314_v48  ;;  %v2241_v45 = vpop.f32.mrf.mxu1 }
 0x404   : > { %v2409_v49 = vadd.f32 %v6940_v12, %v2400_v4  ;;  %v2258_v4 = vadd.f32 %v2238_v52, %v2166_v11 }
 0x406   : > { %v2417_v42 = vadd.f32 %v2409_v49, %v8417_v32  ;;  %v2316_v49 = vadd.f32 %v2296_v41, %v2258_v4  ;;  %v1923_v41 = vadd.f32 %v6801_v19, %v1801_v25  ;;  %v4456_v4 = vld [vmem:[%s8206_s3 + $0x5f0] sm:$0xff] }
 0x408   : > { %v6952_v36 = vmax.f32 %v2417_v42, 0.0  ;;  %v2016_v19 = vadd.f32 %v6803_v20, %v1923_v41  ;;  %v4435_v20 = vld [vmem:[%s8206_s3 + $0x588] sm:$0xff] }
 0x409   : > { %v2379_v39 = vpop.f32.mrf.mxu3  ;;  %2836 = vmatpush.msra.mxu0 %v4435_v20  ;;  %v4471_v20 = vld [vmem:[%s8206_s3 + $0x628] sm:$0xff] }
 0x40a   : > { %8418 = vst [vmem:[#allocation5_spill] sm:$0xff] %v6952_v36  ;;  %v2401_v26 = vadd.f32 %v2379_v39, %v2315_v50  ;;  %4388 = vmatmul.msk.f32.gmra.mxu0 %vm8419_vm10, %v6952_v36  ;;  %v2440_v53 = vrot.slane %v6952_v36, 7  ;;  %v2604_v55 = vrot.slane %v6952_v36, 1  ;;  %vm8425_vm10 = vmmov %vm8414_vm5  ;;  %v2167_v50 = vadd.f32 %v2149_v57, %v2075_v22  ;;  %v2244_v54 = vpop.f32.mrf.mxu1 }
 0x40c   : > { %v2410_v60 = vadd.f32 %v6940_v12, %v2401_v26  ;;  %v2460_v24 = vsel %vm8420_vm6, 0.0, %v2440_v53  ;;  %v2627_v29 = vsel %vm8421_vm1, 0.0, %v2604_v55  ;;  %vm8426_vm6 = vmmov %vm8414_vm5  ;;  %v2259_v57 = vadd.f32 %v2241_v45, %v2167_v50  ;;  %v4457_v45 = vld [vmem:[%s8206_s3 + $0x5f8] sm:$0xff] }
 0x40d   : > { %v2461_v48 = vsel %vm8422_vm2, %v2460_v24, 0.0  ;;  %v2721_v61 = vsel %vm8423_vm7, %v2460_v24, 0.0  ;;  %v2628_v5 = vsel %vm5680_vm11, %v2627_v29, 0.0  ;;  %vm8428_vm1 = vmmov %vm8414_vm5  ;;  %2922 = vmatpush.msra.mxu1 %v4457_v45 }
 0x40e   : > { %v2418_v62 = vadd.f32 %v2410_v60, %v8424_v17  ;;  %4395 = vmatmul.msk.f32.gmra.mxu1 %vm8414_vm5, %v2461_v48  ;;  %4410 = vmatmul.msk.f32.vlgmr.msrb.gmra.mxu2 %vm8425_vm10, %v2628_v5  ;;  %vm8429_vm5 = vcmask 1040384   ;;  %vm8430_vm10 = vcmask 1046528   ;;  %v2076_v60 = vadd.f32 %v6863_v47, %v2016_v19  ;;  %v4473_v48 = vld [vmem:[%s8206_s3 + $0x638] sm:$0xff] }
 0x40f   : > { %4426 = vmatmul.msk.f32.vlgmr.msrb.gmra.mxu3 %vm8426_vm6, %v2721_v61  ;;  %vm8431_vm6 = vnez %v8299_v34  ;;  %v2317_v24 = vadd.f32 %v2299_v37, %v2259_v57  ;;  %v1804_v61 = vadd.f32 %v6810_v10, %v6763_v23  ;;  %3014 = vmatpush.msra.mxu2 %v4473_v48  ;;  %v4453_v19 = vld [vmem:[%s8206_s3 + $0x5d8] sm:$0xff] }
 0x410   : > { %v6979_v33 = vmax.f32 %v2418_v62, 0.0  ;;  %2923 = vmatpush.msra.mxu1 %v4456_v4  ;;  %v2168_v23 = vadd.f32 %v2152_v9, %v2076_v60 }
 0x411   : > { %v2382_v52 = vpop.f32.mrf.mxu3  ;;  %v1924_v17 = vadd.f32 %v6812_v35, %v1804_v61  ;;  %v4487_v61 = vld [vmem:[%s8206_s3 + $0x668] sm:$0xff] }
 0x412   : > { %8427 = vst [vmem:[#allocation6_spill] sm:$0xff] %v6979_v33  ;;  %v2402_v32 = vadd.f32 %v2382_v52, %v2316_v49  ;;  %4389 = vmatmul.msk.f32.gmra.mxu0 %vm8428_vm1, %v6979_v33  ;;  %v2441_v42 = vrot.slane %v6979_v33, 7  ;;  %v2605_v46 = vrot.slane %v6979_v33, 1  ;;  %v4455_v49 = vld [vmem:[%s8206_s3 + $0x5e8] sm:$0xff]  ;;  %v2247_v50 = vpop.f32.mrf.mxu1 }
 0x413   : > { %v2017_v40 = vadd.f32 %v6814_v44, %v1924_v17  ;;  %2924 = vmatpush.msra.mxu1 %v4455_v49  ;;  %v4454_v44 = vld [vmem:[%s8206_s3 + $0x5e0] sm:$0xff] }
 0x414   : > { %v2411_v59 = vadd.f32 %v6940_v12, %v2402_v32  ;;  %v6993_v18 = vsel %vm8429_vm5, %v2440_v53, %v2441_v42  ;;  %v6996_v21 = vsel %vm8430_vm10, %v2604_v55, %v2605_v46  ;;  %vm8433_vm5 = vmmov %vm8428_vm1  ;;  %v2302_v55 = vpop.f32.mrf.mxu2  ;;  %v2155_v32 = vpop.f32.mrf.mxu0 }
 0x415   : > { %v2462_v39 = vsel %vm8431_vm6, %v6993_v18, 0.0  ;;  %v2629_v26 = vsel %vm5703_vm12, %v6996_v21, 0.0  ;;  %v2722_v53 = vsel %vm8422_vm2, %v6993_v18, 0.0  ;;  %vm8434_vm10 = vmmov %vm8428_vm1  ;;  %v2077_v9 = vadd.f32 %v6899_v31, %v2017_v40  ;;  %2925 = vmatpush.msra.mxu1 %v4454_v44  ;;  %v4485_v44 = vld [vmem:[%s8206_s3 + $0x658] sm:$0xff] }
 0x416   : > { %v2419_v11 = vadd.f32 %v2411_v59, %v8432_v2  ;;  %4396 = vmatmul.msk.f32.gmra.mxu1 %vm8428_vm1, %v2462_v39  ;;  %4411 = vmatmul.msk.f32.gmra.mxu2 %vm8433_vm5, %v2629_v26  ;;  %vm8436_vm5 = vcmask 1040384   ;;  %v4489_v26 = vld [vmem:[%s8206_s3 + $0x678] sm:$0xff]  ;;  %v1807_v31 = vadd.f32 %v6827_v38, %v6775_v28 }
 0x417   : > { %4427 = vmatmul.msk.f32.gmra.mxu3 %vm8434_vm10, %v2722_v53  ;;  %vm8437_vm10 = vcmask 1046528   ;;  %v4452_v53 = vld [vmem:[%s8206_s3 + $0x5d0] sm:$0xff]  ;;  %2926 = vmatpush.msra.mxu1 %v4453_v19  ;;  %v2169_v48 = vadd.f32 %v2155_v32, %v2077_v9  ;;  %v4469_v32 = vld [vmem:[%s8206_s3 + $0x618] sm:$0xff]  ;;  %v1810_v9 = vadd.f32 %v6865_v51, %v6783_v63 }
 0x418   : > { %v7013_v29 = vmax.f32 %v2419_v11, 0.0  ;;  %3072 = vmatpush.msra.mxu3 %v4489_v26  ;;  %v4472_v11 = vld [vmem:[%s8206_s3 + $0x630] sm:$0xff]  ;;  %v1925_v45 = vadd.f32 %v6835_v43, %v1807_v31  ;;  %v4451_v43 = vld [vmem:[%s8206_s3 + $0x5c8] sm:$0xff] }
 0x419   : > { %v2385_v5 = vpop.f32.mrf.mxu3  ;;  %3015 = vmatpush.msra.mxu2 %v4472_v11  ;;  %2927 = vmatpush.msra.mxu1 %v4452_v53  ;;  %v2261_v40 = vadd.f32 %v2247_v50, %v2169_v48  ;;  %v4484_v63 = vld [vmem:[%s8206_s3 + $0x650] sm:$0xff]  ;;  %v1926_v31 = vadd.f32 %v6873_v8, %v1810_v9 }
 0x41a   : > { %8435 = vst [vmem:[#allocation7_spill] sm:$0xff] %v7013_v29  ;;  %v2403_v47 = vadd.f32 %v2385_v5, %v2317_v24  ;;  %4390 = vmatmul.msk.f32.gmra.mxu0 %vm8428_vm1, %v7013_v29  ;;  %v2443_v37 = vrot.slane %v7013_v29, 7  ;;  %v2607_v30 = vrot.slane %v7013_v29, 1  ;;  %vm8438_vm1 = vnez %v8302_v27  ;;  %v4504_v24 = vld [vmem:[%s8206_s3 + $0x6b8] sm:$0xff]  ;;  %v2250_v50 = vpop.f32.mrf.mxu1  ;;  %v4503_v51 = vld [vmem:[%s8206_s3 + $0x6b0] sm:$0xff] }
 0x41b   : > { %3016 = vmatpush.msra.mxu2 %v4471_v20  ;;  %v2018_v49 = vadd.f32 %v6848_v1, %v1925_v45  ;;  %2928 = vmatpush.msra.mxu1 %v4451_v43  ;;  %v8455_v20 = vld [vmem:[#allocation18_spill] sm:$0xff]  ;;  %v4466_v43 = vld [vmem:[%s8206_s3 + $0x600] sm:$0xff] }
 0x41c   : > { %v2412_v10 = vadd.f32 %v6940_v12, %v2403_v47  ;;  %v7036_v62 = vsel %vm8436_vm5, %v2441_v42, %v2443_v37  ;;  %v7039_v22 = vsel %vm8437_vm10, %v2605_v46, %v2607_v30  ;;  %v2260_v42 = vadd.f32 %v2244_v54, %v2168_v23  ;;  %v8439_v46 = vld [vmem:[#allocation8_spill] sm:$0xff]  ;;  %v4434_v54 = vld [vmem:[%s8206_s3 + $0x580] sm:$0xff]  ;;  %v2305_v57 = vpop.f32.mrf.mxu2 }
 0x41d   : > { %v2463_v35 = vsel %vm8438_vm1, %v7036_v62, 0.0  ;;  %v2630_v25 = vsel %vm5724_vm13, %v7039_v22, 0.0  ;;  %v2723_v52 = vsel %vm8431_vm6, %v7036_v62, 0.0  ;;  %vm8440_vm5 = vcmask 523264   ;;  %2837 = vmatpush.msra.mxu0 %v4434_v54  ;;  %v4468_v54 = vld [vmem:[%s8206_s3 + $0x610] sm:$0xff] }
 0x41e   : > { %v2420_v41 = vadd.f32 %v2412_v10, %v8439_v46  ;;  %4397 = vmatmul.msk.f32.gmra.mxu1 %vm8440_vm5, %v2463_v35  ;;  %vm8441_vm10 = vmmov %vm8440_vm5  ;;  %v2318_v59 = vadd.f32 %v2302_v55, %v2260_v42  ;;  %v4488_v55 = vld [vmem:[%s8206_s3 + $0x670] sm:$0xff]  ;;  %v4486_v10 = vld [vmem:[%s8206_s3 + $0x660] sm:$0xff]  ;;  %v2158_v42 = vpop.f32.mrf.mxu0  ;;  %v2078_v1 = vadd.f32 %v6922_v0, %v2018_v49  ;;  %v2319_v46 = vadd.f32 %v2305_v57, %v2261_v40 }
 0x41f   : > { %4412 = vmatmul.msk.f32.gmra.mxu2 %vm8441_vm10, %v2630_v25  ;;  %vm8442_vm2 = vmmov %vm8440_vm5  ;;  %3073 = vmatpush.msra.mxu3 %v4488_v55  ;;  %vm8444_vm5 = vcmask 1040384   ;;  %vm8445_vm10 = vcmask 1046528   ;;  %v8447_v35 = vld [vmem:[#allocation9_spill] sm:$0xff]  ;;  %v2019_v45 = vadd.f32 %v8455_v20, %v1926_v31 }
 0x420   : > { %4428 = vmatmul.msk.f32.gmra.mxu3 %vm8442_vm2, %v2723_v52  ;;  %v7062_v39 = vmax.f32 %v2420_v41, 0.0  ;;  %3158 = vmatpush.msrb.mxu0 %v4504_v24  ;;  %v4450_v52 = vld [vmem:[%s8206_s3 + $0x5c0] sm:$0xff] }
 0x421   : > { %v2388_v2 = vpop.f32.mrf.mxu3  ;;  %3074 = vmatpush.msra.mxu3 %v4487_v61  ;;  %2929 = vmatpush.msra.mxu1 %v4450_v52  ;;  %v8456_v61 = vld [vmem:[#allocation11_spill] sm:$0xff]  ;;  %v4502_v52 = vld [vmem:[%s8206_s3 + $0x6a8] sm:$0xff] }
 0x422   : > { %8443 = vst [vmem:[#allocation8_spill] sm:$0xff] %v7062_v39  ;;  %v2404_v60 = vadd.f32 %v2388_v2, %v2318_v59  ;;  %4391 = vmatmul.msk.f32.gmra.mxu0 %vm8442_vm2, %v7062_v39  ;;  %v2445_v28 = vrot.slane %v7062_v39, 7  ;;  %v2609_v38 = vrot.slane %v7062_v39, 1  ;;  %vm8446_vm2 = vnez %v8305_v56 }
 0x423   : > { %3075 = vmatpush.msra.mxu3 %v4486_v10  ;;  %3159 = vmatpush.msrb.mxu0 %v4503_v51  ;;  %v2170_v2 = vadd.f32 %v2158_v42, %v2078_v1  ;;  %v2253_v42 = vpop.f32.mrf.mxu1 }
 0x424   : > { %v2413_v5 = vadd.f32 %v6940_v12, %v2404_v60  ;;  %v7100_v47 = vsel %vm8444_vm5, %v2443_v37, %v2445_v28  ;;  %v7103_v4 = vsel %vm8445_vm10, %v2607_v30, %v2609_v38  ;;  %v4470_v30 = vld [vmem:[%s8206_s3 + $0x620] sm:$0xff]  ;;  %vm8448_vm5 = vcmask 523264   ;;  %v2308_v57 = vpop.f32.mrf.mxu2  ;;  %v4467_v60 = vld [vmem:[%s8206_s3 + $0x608] sm:$0xff] }
 0x425   : > { %v2464_v17 = vsel %vm8446_vm2, %v7100_v47, 0.0  ;;  %v2631_v23 = vsel %vm5745_vm14, %v7103_v4, 0.0  ;;  %v2724_v37 = vsel %vm8438_vm1, %v7100_v47, 0.0  ;;  %vm8449_vm10 = vmmov %vm8448_vm5  ;;  %3017 = vmatpush.msra.mxu2 %v4470_v30  ;;  %3076 = vmatpush.msra.mxu3 %v4485_v44  ;;  %v2262_v48 = vadd.f32 %v2250_v50, %v2170_v2 }
 0x426   : > { %v2421_v25 = vadd.f32 %v2413_v5, %v8447_v35  ;;  %4398 = vmatmul.msk.f32.gmra.mxu1 %vm8448_vm5, %v2464_v17  ;;  %vm8450_vm1 = vmmov %vm8448_vm5  ;;  %vm8452_vm5 = vcmask 1040384   ;;  %v4482_v17 = vld [vmem:[%s8206_s3 + $0x640] sm:$0xff]  ;;  %3160 = vmatpush.msrb.mxu0 %v4502_v52  ;;  %v2873_v52 = vsel %vm5680_vm11, %v6996_v21, 0.0  ;;  %v4499_v21 = vld [vmem:[%s8206_s3 + $0x690] sm:$0xff] }
 0x427   : > { %4413 = vmatmul.msk.f32.gmra.mxu2 %vm8449_vm10, %v2631_v23  ;;  %vm8453_vm10 = vcmask 1046528   ;;  %3077 = vmatpush.msra.mxu3 %v4484_v63  ;;  %v8460_v23 = vld [vmem:[#allocation19_spill] sm:$0xff]  ;;  %v2320_v30 = vadd.f32 %v2308_v57, %v2262_v48  ;;  %v8466_v57 = vld [vmem:[#allocation13_spill] sm:$0xff] }
 0x428   : > { %4429 = vmatmul.msk.f32.gmra.mxu3 %vm8450_vm1, %v2724_v37  ;;  %v7135_v41 = vmax.f32 %v2421_v25, 0.0  ;;  %3018 = vmatpush.msra.mxu2 %v4469_v32  ;;  %v2079_v37 = vadd.f32 %v8460_v23, %v2019_v45  ;;  %v2161_v32 = vpop.f32.mrf.mxu0  ;;  %v8475_v23 = vld [vmem:[#allocation14_spill] sm:$0xff] }
 0x429   : > { %v2391_v59 = vpop.f32.mrf.mxu3 }
 0x42a   : > { %8451 = vst [vmem:[#allocation9_spill] sm:$0xff] %v7135_v41  ;;  %v2405_v0 = vadd.f32 %v2391_v59, %v2319_v46  ;;  %4392 = vmatmul.msk.f32.gmra.mxu0 %vm8450_vm1, %v7135_v41  ;;  %v2447_v26 = vrot.slane %v7135_v41, 7  ;;  %v2611_v19 = vrot.slane %v7135_v41, 1  ;;  %3019 = vmatpush.msra.mxu2 %v4468_v54  ;;  %vm8454_vm1 = vnez %v8308_v58  ;;  %v8464_v59 = vld [vmem:[#allocation10_spill] sm:$0xff] }
 0x42b   : > { %v2171_v1 = vadd.f32 %v2161_v32, %v2079_v37 }
 0x42c   : > { %v2414_v11 = vadd.f32 %v6940_v12, %v2405_v0  ;;  %v7158_v53 = vsel %vm8452_vm5, %v2445_v28, %v2447_v26  ;;  %v7161_v55 = vsel %vm8453_vm10, %v2609_v38, %v2611_v19  ;;  %v4483_v38 = vld [vmem:[%s8206_s3 + $0x648] sm:$0xff]  ;;  %vm8457_vm5 = vcmask 523264   ;;  %3020 = vmatpush.msra.mxu2 %v4467_v60  ;;  %v2311_v50 = vpop.f32.mrf.mxu2 }
 0x42d   : > { %v2465_v8 = vsel %vm8454_vm1, %v7158_v53, 0.0  ;;  %v2632_v24 = vsel %vm5778_vm15, %v7161_v55, 0.0  ;;  %v2725_v28 = vsel %vm8446_vm2, %v7158_v53, 0.0  ;;  %vm8458_vm10 = vmmov %vm8457_vm5  ;;  %3078 = vmatpush.msra.mxu3 %v4483_v38  ;;  %v2263_v31 = vadd.f32 %v2253_v42, %v2171_v1 }
 0x42e   : > { %v2422_v5 = vadd.f32 %v2414_v11, %v8456_v61  ;;  %4399 = vmatmul.msk.f32.gmra.mxu1 %vm8457_vm5, %v2465_v8  ;;  %vm8459_vm15 = vmmov %vm8457_vm5  ;;  %3021 = vmatpush.msra.mxu2 %v4466_v43 }
 0x42f   : > { %4414 = vmatmul.msk.f32.gmra.mxu2 %vm8458_vm10, %v2632_v24  ;;  %3079 = vmatpush.msra.mxu3 %v4482_v17  ;;  %vm8463_vm10 = vcmask 1046528   ;;  %vm8470_vm2 = vmmov %vm8457_vm5 }
 0x430   : > { %4430 = vmatmul.msk.f32.gmra.mxu3 %vm8459_vm15, %v2725_v28  ;;  %v7190_v10 = vmax.f32 %v2422_v5, 0.0  ;;  %vm8462_vm15 = vcmask 1040384   ;;  %v4501_v28 = vld [vmem:[%s8206_s3 + $0x6a0] sm:$0xff] }
 0x431   : > { %v2394_v49 = vpop.f32.mrf.mxu3  ;;  %3161 = vmatpush.msrb.mxu0 %v4501_v28  ;;  %v3113_v28 = vsel %vm5680_vm11, %v7039_v22, 0.0 }
 0x432   : > { %8461 = vst [vmem:[#allocation18_spill] sm:$0xff] %v7190_v10  ;;  %v2406_v40 = vadd.f32 %v2394_v49, %v2320_v30  ;;  %4393 = vmatmul.msk.f32.gmra.mxu0 %vm8457_vm5, %v7190_v10  ;;  %v2449_v35 = vrot.slane %v7190_v10, 7  ;;  %v2613_v25 = vrot.slane %v7190_v10, 1 }
 0x434   : > { %v2415_v46 = vadd.f32 %v6940_v12, %v2406_v40  ;;  %v7201_v44 = vsel %vm8462_vm15, %v2447_v26, %v2449_v35  ;;  %v7204_v9 = vsel %vm8463_vm10, %v2611_v19, %v2613_v25  ;;  %vm8467_vm15 = vmmov %vm8457_vm5  ;;  %v2321_v19 = vadd.f32 %v2311_v50, %v2263_v31  ;;  %v4500_v40 = vld [vmem:[%s8206_s3 + $0x698] sm:$0xff] }
 0x435   : > { %v2466_v54 = vsel %vm8401_vm4, %v7201_v44, 0.0  ;;  %v2633_v63 = vsel %vm5811_vm0, %v7204_v9, 0.0  ;;  %v2726_v51 = vsel %vm8454_vm1, %v7201_v44, 0.0  ;;  %vm8468_vm10 = vmmov %vm8457_vm5  ;;  %3162 = vmatpush.msrb.mxu0 %v4500_v40  ;;  %v2874_v50 = vsel %vm5703_vm12, %v7039_v22, 0.0  ;;  %v4527_v40 = vld [vmem:[%s8206_s3 + $0x738] sm:$0xff] }
 0x436   : > { %v2423_v26 = vadd.f32 %v2415_v46, %v8466_v57  ;;  %4400 = vmatmul.msk.f32.gmra.mxu1 %vm8457_vm5, %v2466_v54  ;;  %vm8471_vm5 = vcmask 1040384   ;;  %v2965_v46 = vsel %vm8423_vm7, %v6993_v18, 0.0  ;;  %v4498_v54 = vld [vmem:[%s8206_s3 + $0x688] sm:$0xff]  ;;  %v2875_v18 = vsel %vm5724_vm13, %v7103_v4, 0.0 }
 0x437   : > { %4415 = vmatmul.msk.f32.gmra.mxu2 %vm8467_vm15, %v2633_v63  ;;  %vm8472_vm15 = vcmask 1046528   ;;  %3163 = vmatpush.msrb.mxu0 %v4499_v21  ;;  %v2876_v31 = vsel %vm5745_vm14, %v7161_v55, 0.0  ;;  %vm8497_vm7 = vnez %v8331_v15 }
 0x438   : > { %4431 = vmatmul.msk.f32.gmra.mxu3 %vm8468_vm10, %v2726_v51  ;;  %v7219_v2 = vmax.f32 %v2423_v26, 0.0  ;;  %vm8476_vm10 = vmmov %vm8470_vm2  ;;  %v4497_v51 = vld [vmem:[%s8206_s3 + $0x680] sm:$0xff]  ;;  %v2877_v57 = vsel %vm8497_vm7, %v7204_v9, 0.0  ;;  %3291 = vmatpush.msrb.mxu1 %v4527_v40  ;;  %v4517_v40 = vld [vmem:[%s8206_s3 + $0x6e8] sm:$0xff] }
 0x439   : > { %v2397_v11 = vpop.f32.mrf.mxu3  ;;  %3164 = vmatpush.msrb.mxu0 %v4498_v54 }
 0x43a   : > { %8469 = vst [vmem:[#allocation11_spill] sm:$0xff] %v7219_v2  ;;  %v2407_v60 = vadd.f32 %v2397_v11, %v2321_v19  ;;  %4394 = vmatmul.msk.f32.gmra.mxu0 %vm8470_vm2, %v7219_v2  ;;  %v2451_v8 = vrot.slane %v7219_v2, 7  ;;  %v2615_v24 = vrot.slane %v7219_v2, 1 }
 0x43b   : > { %3165 = vmatpush.msrb.mxu0 %v4497_v51 }
 0x43c   : > { %v2416_v38 = vadd.f32 %v6940_v12, %v2407_v60  ;;  %v7230_v20 = vsel %vm8471_vm5, %v2449_v35, %v2451_v8  ;;  %v7233_v45 = vsel %vm8472_vm15, %v2613_v25, %v2615_v24  ;;  %vm8477_vm5 = vmmov %vm8470_vm2 }
 0x43d   : > { %v2467_v61 = vsel %vm5637_vm9, %v7230_v20, 0.0  ;;  %v2634_v43 = vsel %vm8413_vm8, %v7233_v45, 0.0  ;;  %v2727_v17 = vsel %vm8401_vm4, %v7230_v20, 0.0  ;;  %vm8479_vm15 = vmmov %vm8470_vm2  ;;  %vm8480_vm4 = vcmask 1046528  }
 0x43e   : > { %v2424_v12 = vadd.f32 %v2416_v38, %v8475_v23  ;;  %4401 = vmatmul.msk.f32.gmra.mxu1 %vm8470_vm2, %v2467_v61  ;;  %vm8481_vm2 = vcmask 1040384   ;;  %v2970_v11 = vsel %vm8454_vm1, %v7230_v20, 0.0  ;;  %v3115_v23 = vsel %vm5724_vm13, %v7161_v55, 0.0 }
 0x43f   : > { %4416 = vmatmul.msk.f32.gmra.mxu2 %vm8476_vm10, %v2634_v43  ;;  %vm8483_vm10 = vmmov %vm8477_vm5  ;;  %v8518_v43 = vmov 0.0  }
 0x440   : > { %4432 = vmatmul.msk.f32.gmra.mxu3 %vm8477_vm5, %v2727_v17  ;;  %v7248_v37 = vmax.f32 %v2424_v12, 0.0  ;;  %v3114_v17 = vsel %vm5703_vm12, %v7103_v4, 0.0 }
 0x442   : > { %8478 = vst [vmem:[#allocation19_spill] sm:$0xff] %v7248_v37  ;;  %4442 = vmatmul.msk.f32.vlgmr.msra.gmra.mxu0 %vm8479_vm15, %v6952_v36  ;;  %v2617_v30 = vrot.slane %v7248_v37, 1  ;;  %v2718_v49 = vrot.slane %v7248_v37, 7 }
 0x444   : > { %v7258_v35 = vsel %vm8480_vm4, %v2615_v24, %v2617_v30  ;;  %v2719_v25 = vsel %vm8481_vm2, %v2451_v8, %v2718_v49  ;;  %vm8484_vm4 = vmmov %vm8477_vm5  ;;  %v7362_v24 = vpop.f32.mrf.mxu0 }
 0x445   : > { %v2635_v42 = vsel %vm8372_vm3, %v7258_v35, 0.0  ;;  %v2728_v1 = vsel %vm5637_vm9, %v2719_v25, 0.0  ;;  %vm8485_vm15 = vmmov %vm8484_vm4 }
 0x446   : > { %4458 = vmatmul.msk.f32.vlgmr.msra.gmra.mxu1 %vm8477_vm5, %v2873_v52  ;;  %vm8486_vm2 = vmmov %vm8484_vm4 }
 0x447   : > { %4417 = vmatmul.msk.f32.gmra.mxu2 %vm8483_vm10, %v2635_v42  ;;  %vm8487_vm10 = vmmov %vm8486_vm2  ;;  %v3117_v42 = vsel %vm8497_vm7, %v7233_v45, 0.0 }
 0x448   : > { %4433 = vmatmul.msk.f32.gmra.mxu3 %vm8484_vm4, %v2728_v1  ;;  %vm8488_vm5 = vmmov %vm8486_vm2  ;;  %v4526_v1 = vld [vmem:[%s8206_s3 + $0x730] sm:$0xff] }
 0x449   : > { %vm8489_vm4 = vmmov %vm8486_vm2  ;;  %3292 = vmatpush.msrb.mxu1 %v4526_v1 }
 0x44a   : > { %4443 = vmatmul.msk.f32.gmra.mxu0 %vm8485_vm15, %v6979_v33  ;;  %vm8490_vm15 = vnez %v8296_v13  ;;  %vm8499_vm14 = vmmov %vm8486_vm2 }
 0x44b   : > { %v2966_v63 = vsel %vm8490_vm15, %v7036_v62, 0.0  ;;  %v2967_v62 = vsel %vm8431_vm6, %v7100_v47, 0.0  ;;  %vm8498_vm15 = vnez %v8302_v27  ;;  %vm8500_vm6 = vmmov %vm8486_vm2  ;;  %v2878_v47 = vsel %vm5811_vm0, %v7233_v45, 0.0  ;;  %v4525_v45 = vld [vmem:[%s8206_s3 + $0x728] sm:$0xff] }
 0x44c   : > { %v2968_v26 = vsel %vm8498_vm15, %v7158_v53, 0.0  ;;  %vm8504_vm15 = vmmov %vm8486_vm2  ;;  %v2879_v53 = vsel %vm8413_vm8, %v7258_v35, 0.0  ;;  %3293 = vmatpush.msrb.mxu1 %v4525_v45  ;;  %v4548_v45 = vld [vmem:[%s8206_s3 + $0x770] sm:$0xff] }
 0x44d   : > { %vm8512_vm1 = vmmov %vm8486_vm2 }
 0x44e   : > { %4459 = vmatmul.msk.f32.gmra.mxu1 %vm8486_vm2, %v2874_v50  ;;  %v3118_v50 = vsel %vm5811_vm0, %v7258_v35, 0.0 }
 0x44f   : > { %4474 = vmatmul.msk.f32.vlgmr.msra.gmra.mxu2 %vm8487_vm10, %v2965_v46  ;;  %vm8491_vm10 = vmmov %vm8486_vm2 }
 0x450   : > { %4490 = vmatmul.msk.f32.vlgmr.msra.gmra.mxu3 %vm8488_vm5, %v6979_v33  ;;  %vm8492_vm5 = vmmov %vm8486_vm2  ;;  %v4542_v33 = vld [vmem:[%s8206_s3 + $0x740] sm:$0xff] }
 0x452   : > { %4444 = vmatmul.msk.f32.gmra.mxu0 %vm8489_vm4, %v7013_v29  ;;  %vm8493_vm4 = vmmov %vm8486_vm2 }
 0x456   : > { %4460 = vmatmul.msk.f32.gmra.mxu1 %vm8486_vm2, %v2875_v18 }
 0x457   : > { %4475 = vmatmul.msk.f32.gmra.mxu2 %vm8491_vm10, %v2966_v63  ;;  %vm8494_vm10 = vmmov %vm8486_vm2 }
 0x458   : > { %4491 = vmatmul.msk.f32.gmra.mxu3 %vm8492_vm5, %v7013_v29  ;;  %vm8495_vm5 = vmmov %vm8486_vm2 }
 0x45a   : > { %4445 = vmatmul.msk.f32.gmra.mxu0 %vm8493_vm4, %v7062_v39  ;;  %vm8496_vm4 = vmmov %vm8486_vm2 }
 0x45e   : > { %4461 = vmatmul.msk.f32.gmra.mxu1 %vm8486_vm2, %v2876_v31 }
 0x45f   : > { %4476 = vmatmul.msk.f32.gmra.mxu2 %vm8494_vm10, %v2967_v62  ;;  %vm8501_vm10 = vmmov %vm8486_vm2  ;;  %v4524_v62 = vld [vmem:[%s8206_s3 + $0x720] sm:$0xff] }
 0x460   : > { %4492 = vmatmul.msk.f32.gmra.mxu3 %vm8495_vm5, %v7062_v39  ;;  %vm8502_vm5 = vnez %v8305_v56  ;;  %3294 = vmatpush.msrb.mxu1 %v4524_v62  ;;  %v4544_v39 = vld [vmem:[%s8206_s3 + $0x750] sm:$0xff] }
 0x461   : > { %v2969_v19 = vsel %vm8502_vm5, %v7201_v44, 0.0 }
 0x462   : > { %4446 = vmatmul.msk.f32.gmra.mxu0 %vm8496_vm4, %v7135_v41  ;;  %vm8503_vm4 = vmmov %vm8486_vm2 }
 0x466   : > { %4462 = vmatmul.msk.f32.gmra.mxu1 %vm8499_vm14, %v2877_v57  ;;  %vm8505_vm14 = vmmov %vm8486_vm2 }
 0x467   : > { %4477 = vmatmul.msk.f32.gmra.mxu2 %vm8500_vm6, %v2968_v26  ;;  %vm8506_vm6 = vmmov %vm8486_vm2 }
 0x468   : > { %4493 = vmatmul.msk.f32.gmra.mxu3 %vm8486_vm2, %v7135_v41  ;;  %v4562_v41 = vld [vmem:[%s8206_s3 + $0x7a0] sm:$0xff] }
 0x46a   : > { %4447 = vmatmul.msk.f32.gmra.mxu0 %vm8501_vm10, %v7190_v10  ;;  %vm8507_vm10 = vmmov %vm8486_vm2 }
 0x46e   : > { %4463 = vmatmul.msk.f32.gmra.mxu1 %vm8503_vm4, %v2878_v47  ;;  %vm8509_vm4 = vmmov %vm8486_vm2  ;;  %v4523_v47 = vld [vmem:[%s8206_s3 + $0x718] sm:$0xff] }
 0x46f   : > { %4478 = vmatmul.msk.f32.gmra.mxu2 %vm8504_vm15, %v2969_v19  ;;  %vm8508_vm15 = vmmov %vm8486_vm2  ;;  %3295 = vmatpush.msrb.mxu1 %v4523_v47  ;;  %v4515_v47 = vld [vmem:[%s8206_s3 + $0x6d8] sm:$0xff] }
 0x470   : > { %4494 = vmatmul.msk.f32.gmra.mxu3 %vm8505_vm14, %v7190_v10  ;;  %vm8510_vm14 = vcmask 1046528   ;;  %v4546_v10 = vld [vmem:[%s8206_s3 + $0x760] sm:$0xff] }
 0x471   : > { %v2872_v44 = vsel %vm8510_vm14, %v2617_v30, 0.0  ;;  %vm8517_vm14 = vmmov %vm8512_vm1  ;;  %v7393_v30 = vpop.f32.mrf.mxu1 }
 0x472   : > { %4448 = vmatmul.msk.f32.gmra.mxu0 %vm8506_vm6, %v7219_v2  ;;  %v2880_v60 = vsel %vm8372_vm3, %v2872_v44, 0.0  ;;  %vm8511_vm6 = vnez %v8464_v59  ;;  %v3119_v51 = vsel %vm8413_vm8, %v2872_v44, 0.0 }
 0x473   : > { %v2971_v8 = vsel %vm8511_vm6, %v2719_v25, 0.0 }
 0x476   : > { %4464 = vmatmul.msk.f32.gmra.mxu1 %vm8486_vm2, %v2879_v53  ;;  %vm8513_vm2 = vmmov %vm8512_vm1 }
 0x477   : > { %4479 = vmatmul.msk.f32.gmra.mxu2 %vm8507_vm10, %v2970_v11  ;;  %vm8514_vm10 = vmmov %vm8512_vm1 }
 0x478   : > { %4495 = vmatmul.msk.f32.gmra.mxu3 %vm8508_vm15, %v7219_v2  ;;  %vm8515_vm15 = vmmov %vm8512_vm1  ;;  %v4563_v2 = vld [vmem:[%s8206_s3 + $0x7a8] sm:$0xff] }
 0x47a   : > { %4449 = vmatmul.msk.f32.gmra.mxu0 %vm8509_vm4, %v7248_v37  ;;  %vm8516_vm4 = vcmask 1040384  }
 0x47b   : > { %v2964_v38 = vsel %vm8516_vm4, %v2718_v49, 0.0  ;;  %vm8522_vm4 = vmmov %vm8512_vm1 }
 0x47c   : > { %v2972_v20 = vsel %vm5637_vm9, %v2964_v38, 0.0 }
 0x47e   : > { %4465 = vmatmul.msk.f32.gmra.mxu1 %vm8512_vm1, %v2880_v60  ;;  %v4522_v60 = vld [vmem:[%s8206_s3 + $0x710] sm:$0xff] }
 0x47f   : > { %4480 = vmatmul.msk.f32.gmra.mxu2 %vm8513_vm2, %v2971_v8  ;;  %vm8519_vm2 = vmmov %vm8512_vm1  ;;  %v4519_v8 = vld [vmem:[%s8206_s3 + $0x6f8] sm:$0xff]  ;;  %3296 = vmatpush.msrb.mxu1 %v4522_v60  ;;  %v4514_v60 = vld [vmem:[%s8206_s3 + $0x6d0] sm:$0xff] }
 0x480   : > { %4496 = vmatmul.msk.f32.gmra.mxu3 %vm8514_vm10, %v7248_v37  ;;  %vm8520_vm10 = vnez %v8329_v14  ;;  %3353 = vmatpush.msrb.mxu2 %v4519_v8  ;;  %v4513_v8 = vld [vmem:[%s8206_s3 + $0x6c8] sm:$0xff] }
 0x481   : > { %v3116_v4 = vsel %vm8520_vm10, %v7204_v9, 0.0 }
 0x482   : > { %4505 = vmatmul.msk.f32.vlgmr.msrb.gmra.mxu0 %vm8515_vm15, %v3113_v28  ;;  %vm8521_vm15 = vmmov %vm8512_vm1 }
 0x487   : > { %4481 = vmatmul.msk.f32.gmra.mxu2 %vm8517_vm14, %v2972_v20  ;;  %v7378_v61 = vpop.f32.mrf.mxu0  ;;  %vm8523_vm14 = vmmov %vm8512_vm1 }
 0x488   : > { %3101 = vmatmul.f32.gmra.mxu3 %v8518_v43 }
 0x48a   : > { %4506 = vmatmul.msk.f32.gmra.mxu0 %vm8512_vm1, %v3114_v17  ;;  %v4549_v17 = vld [vmem:[%s8206_s3 + $0x778] sm:$0xff] }
 0x48b   : > { %v7408_v52 = vpop.f32.mrf.mxu1  ;;  %3460 = vmatpush.msrb.mxu3 %v4549_v17  ;;  %v4520_v17 = vld [vmem:[%s8206_s3 + $0x700] sm:$0xff] }
 0x48d   : > { %3461 = vmatpush.msrb.mxu3 %v4548_v45 }
 0x48f   : > { %v7385_v22 = vpop.f32.mrf.mxu0 }
 0x491   : > { %v7395_v49 = vpop.f32.mrf.mxu2 }
 0x492   : > { %4507 = vmatmul.msk.f32.gmra.mxu0 %vm8519_vm2, %v3115_v23  ;;  %v7404_v55 = vpop.f32.mrf.mxu3  ;;  %vm8524_vm2 = vmmov %vm8512_vm1 }
 0x493   : > { %v7426_v54 = vpop.f32.mrf.mxu1  ;;  %vm8529_vm3 = vmmov %vm8524_vm2 }
 0x494   : > { %vm8530_vm8 = vmmov %vm8524_vm2 }
 0x497   : > { %v7391_v12 = vpop.f32.mrf.mxu0 }
 0x499   : > { %v7414_v9 = vpop.f32.mrf.mxu2 }
 0x49a   : > { %4508 = vmatmul.msk.f32.gmra.mxu0 %vm8521_vm15, %v3116_v4  ;;  %v7421_v46 = vpop.f32.mrf.mxu3  ;;  %v4518_v4 = vld [vmem:[%s8206_s3 + $0x6f0] sm:$0xff]  ;;  %vm8525_vm15 = vcmask 1040384  }
 0x49b   : > { %v7441_v35 = vpop.f32.mrf.mxu1  ;;  %3354 = vmatpush.msrb.mxu2 %v4518_v4 }
 0x49d   : > { %3355 = vmatpush.msrb.mxu2 %v4517_v40 }
 0x49f   : > { %v7406_v25 = vpop.f32.mrf.mxu0 }
 0x4a2   : > { %4509 = vmatmul.msk.f32.gmra.mxu0 %vm8522_vm4, %v3117_v42  ;;  %v7432_v18 = vpop.f32.mrf.mxu2  ;;  %v4521_v42 = vld [vmem:[%s8206_s3 + $0x708] sm:$0xff]  ;;  %vm8526_vm4 = vcmask 1046528  }
 0x4a3   : > { %v7439_v31 = vpop.f32.mrf.mxu3  ;;  %v7456_v53 = vpop.f32.mrf.mxu1  ;;  %3297 = vmatpush.msrb.mxu1 %v4521_v42  ;;  %v4512_v42 = vld [vmem:[%s8206_s3 + $0x6c0] sm:$0xff] }
 0x4a5   : > { %3298 = vmatpush.msrb.mxu1 %v4520_v17  ;;  %v4581_v17 = vld [vmem:[%s8206_s3 + $0x7f8] sm:$0xff] }
 0x4a6   : > { %3299 = vmatmul.f32.vlgmr.msrb.gmra.mxu1 %v8518_v43 }
 0x4a7   : > { %v7419_v21 = vpop.f32.mrf.mxu0  ;;  %3613 = vmatpush.msra.mxu1 %v4581_v17 }
 0x4aa   : > { %4510 = vmatmul.msk.f32.gmra.mxu0 %vm8523_vm14, %v3118_v50  ;;  %v7446_v57 = vpop.f32.mrf.mxu2  ;;  %v4516_v50 = vld [vmem:[%s8206_s3 + $0x6e0] sm:$0xff]  ;;  %vm8527_vm14 = vnez %v8296_v13 }
 0x4ab   : > { %v7454_v19 = vpop.f32.mrf.mxu3  ;;  %v7472_v20 = vpop.f32.mrf.mxu1  ;;  %3356 = vmatpush.msrb.mxu2 %v4516_v50  ;;  %v4547_v50 = vld [vmem:[%s8206_s3 + $0x768] sm:$0xff] }
 0x4ac   : > { %3462 = vmatpush.msrb.mxu3 %v4547_v50 }
 0x4ad   : > { %3357 = vmatpush.msrb.mxu2 %v4515_v47 }
 0x4ae   : > { %3463 = vmatpush.msrb.mxu3 %v4546_v10  ;;  %v4580_v10 = vld [vmem:[%s8206_s3 + $0x7f0] sm:$0xff] }
 0x4af   : > { %v7434_v63 = vpop.f32.mrf.mxu0  ;;  %3358 = vmatpush.msrb.mxu2 %v4514_v60  ;;  %v4565_v60 = vld [vmem:[%s8206_s3 + $0x7b8] sm:$0xff]  ;;  %3614 = vmatpush.msra.mxu1 %v4580_v10  ;;  %v4579_v10 = vld [vmem:[%s8206_s3 + $0x7e8] sm:$0xff] }
 0x4b0   : > { %3553 = vmatpush.msra.mxu0 %v4565_v60  ;;  %v4545_v60 = vld [vmem:[%s8206_s3 + $0x758] sm:$0xff] }
 0x4b1   : > { %3359 = vmatpush.msrb.mxu2 %v4513_v8  ;;  %v4564_v8 = vld [vmem:[%s8206_s3 + $0x7b0] sm:$0xff]  ;;  %3464 = vmatpush.msrb.mxu3 %v4545_v60  ;;  %v4543_v60 = vld [vmem:[%s8206_s3 + $0x748] sm:$0xff] }
 0x4b2   : > { %4511 = vmatmul.msk.f32.gmra.mxu0 %vm8512_vm1, %v3119_v51  ;;  %v7460_v44 = vpop.f32.mrf.mxu2  ;;  %3615 = vmatpush.msra.mxu1 %v4579_v10  ;;  %vm8528_vm1 = vnez %v8294_v6 }
 0x4b3   : > { %v7468_v28 = vpop.f32.mrf.mxu3  ;;  %v7498_v62 = vpop.f32.mrf.mxu1  ;;  %3360 = vmatpush.msrb.mxu2 %v4512_v42  ;;  %3554 = vmatpush.msra.mxu0 %v4564_v8  ;;  %v4561_v8 = vld [vmem:[%s8206_s3 + $0x798] sm:$0xff] }
 0x4b4   : > { %3361 = vmatmul.f32.vlgmr.msrb.gmra.mxu2 %v8518_v43  ;;  %3465 = vmatpush.msrb.mxu3 %v4544_v39  ;;  %v4558_v39 = vld [vmem:[%s8206_s3 + $0x780] sm:$0xff] }
 0x4b5   : > { %3555 = vmatpush.msra.mxu0 %v4563_v2 }
 0x4b6   : > { %3466 = vmatpush.msrb.mxu3 %v4543_v60 }
 0x4b7   : > { %v7448_v26 = vpop.f32.mrf.mxu0  ;;  %3556 = vmatpush.msra.mxu0 %v4562_v41  ;;  %v4560_v41 = vld [vmem:[%s8206_s3 + $0x790] sm:$0xff] }
 0x4b8   : > { %3467 = vmatpush.msrb.mxu3 %v4542_v33  ;;  %v2583_v33 = vadd.f32 %v7408_v52, %v7378_v61  ;;  %v2586_v61 = vadd.f32 %v7426_v54, %v7385_v22 }
 0x4b9   : > { %3557 = vmatpush.msra.mxu0 %v4561_v8  ;;  %v4559_v8 = vld [vmem:[%s8206_s3 + $0x788] sm:$0xff] }
 0x4ba   : > { %3187 = vmatmul.f32.gmra.mxu0 %v8518_v43  ;;  %v7477_v23 = vpop.f32.mrf.mxu2  ;;  %v2711_v10 = vadd.f32 %v7414_v9, %v2583_v33 }
 0x4bb   : > { %v7496_v51 = vpop.f32.mrf.mxu3  ;;  %v7526_v47 = vpop.f32.mrf.mxu1  ;;  %3558 = vmatpush.msra.mxu0 %v4560_v41  ;;  %v2580_v41 = vadd.f32 %v7393_v30, %v7362_v24  ;;  %v4578_v24 = vld [vmem:[%s8206_s3 + $0x7e0] sm:$0xff] }
 0x4bc   : > { %3616 = vmatpush.msra.mxu1 %v4578_v24 }
 0x4bd   : > { %3559 = vmatpush.msra.mxu0 %v4559_v8  ;;  %v2710_v8 = vadd.f32 %v7395_v49, %v2580_v41 }
 0x4bf   : > { %v7458_v11 = vpop.f32.mrf.mxu0  ;;  %3560 = vmatpush.msra.mxu0 %v4558_v39  ;;  %v2803_v5 = vadd.f32 %v7404_v55, %v2710_v8  ;;  %v2804_v55 = vadd.f32 %v7421_v46, %v2711_v10  ;;  %v2712_v46 = vadd.f32 %v7432_v18, %v2586_v61  ;;  %v2589_v10 = vadd.f32 %v7441_v35, %v7391_v12  ;;  %v4597_v18 = vld [vmem:[%s8206_s3 + $0x838] sm:$0xff] }
 0x4c0   : > { %3705 = vmatpush.msra.mxu2 %v4597_v18 }
 0x4c1   : > { %v2863_v39 = vadd.f32 %v7458_v11, %v2803_v5  ;;  %v7606_v11 = vld [vmem:[%s8207_s4] sm:$0xf]  ;;  %v2805_v33 = vadd.f32 %v7439_v31, %v2712_v46  ;;  %v2713_v12 = vadd.f32 %v7446_v57, %v2589_v10 }
 0x4c2   : > { %v7512_v4 = vpop.f32.mrf.mxu2  ;;  %v7609_v9 = vperm.slane %v7606_v11, 2 }
 0x4c3   : > { %v7524_v45 = vpop.f32.mrf.mxu3  ;;  %v2931_v2 = vpop.f32.mrf.mxu1 }
 0x4c4   : > { %v2955_v48 = vadd.f32 %v2931_v2, %v2863_v39 }
 0x4c7   : > { %v7470_v38 = vpop.f32.mrf.mxu0 }
 0x4c8   : > { %v2864_v5 = vadd.f32 %v7470_v38, %v2804_v55 }
 0x4ca   : > { %v7537_v42 = vpop.f32.mrf.mxu2 }
 0x4cb   : > { %v7556_v17 = vpop.f32.mrf.mxu3  ;;  %v2934_v43 = vpop.f32.mrf.mxu1 }
 0x4cc   : > { %v2956_v22 = vadd.f32 %v2934_v43, %v2864_v5  ;;  %v4576_v43 = vld [vmem:[%s8206_s3 + $0x7d0] sm:$0xff] }
 0x4cf   : > { %v7488_v1 = vpop.f32.mrf.mxu0 }
 0x4d2   : > { %v3023_v29 = vpop.f32.mrf.mxu2 }
 0x4d3   : > { %v3081_v36 = vpop.f32.mrf.mxu3  ;;  %v3047_v41 = vadd.f32 %v3023_v29, %v2955_v48  ;;  %v2937_v0 = vpop.f32.mrf.mxu1  ;;  %v4577_v29 = vld [vmem:[%s8206_s3 + $0x7d8] sm:$0xff] }
 0x4d4   : > { %3617 = vmatpush.msra.mxu1 %v4577_v29 }
 0x4d5   : > { %v3105_v52 = vadd.f32 %v3081_v36, %v3047_v41  ;;  %v2865_v41 = vadd.f32 %v7488_v1, %v2805_v33 }
 0x4d6   : > { %3618 = vmatpush.msra.mxu1 %v4576_v43  ;;  %v4575_v43 = vld [vmem:[%s8206_s3 + $0x7c8] sm:$0xff] }
 0x4d7   : > { %v7515_v40 = vpop.f32.mrf.mxu0  ;;  %v2957_v1 = vadd.f32 %v2937_v0, %v2865_v41  ;;  %v2806_v0 = vadd.f32 %v7454_v19, %v2713_v12 }
 0x4d8   : > { %3619 = vmatpush.msra.mxu1 %v4575_v43 }
 0x4d9   : > { %v2866_v33 = vadd.f32 %v7515_v40, %v2806_v0  ;;  %v4595_v0 = vld [vmem:[%s8206_s3 + $0x828] sm:$0xff] }
 0x4da   : > { %v3026_v32 = vpop.f32.mrf.mxu2 }
 0x4db   : > { %v3084_v49 = vpop.f32.mrf.mxu3  ;;  %v3048_v38 = vadd.f32 %v3026_v32, %v2956_v22  ;;  %v2940_v39 = vpop.f32.mrf.mxu1 }
 0x4dd   : > { %v3106_v55 = vadd.f32 %v3084_v49, %v3048_v38  ;;  %v4613_v38 = vld [vmem:[%s8206_s3 + $0x878] sm:$0xff] }
 0x4de   : > { %3797 = vmatpush.msra.mxu3 %v4613_v38 }
 0x4df   : > { %v7539_v50 = vpop.f32.mrf.mxu0 }
 0x4e2   : > { %v3029_v8 = vpop.f32.mrf.mxu2 }
 0x4e3   : > { %v3087_v2 = vpop.f32.mrf.mxu3  ;;  %v3049_v57 = vadd.f32 %v3029_v8, %v2957_v1  ;;  %v2943_v41 = vpop.f32.mrf.mxu1 }
 0x4e5   : > { %v3107_v10 = vadd.f32 %v3087_v2, %v3049_v57  ;;  %v2958_v2 = vadd.f32 %v2940_v39, %v2866_v33 }
 0x4e7   : > { %v7567_v37 = vpop.f32.mrf.mxu0 }
 0x4ea   : > { %v3032_v31 = vpop.f32.mrf.mxu2 }
 0x4eb   : > { %v3090_v8 = vpop.f32.mrf.mxu3 }
 0x4ef   : > { %v7586_v60 = vpop.f32.mrf.mxu0 }
 0x4f2   : > { %v3035_v1 = vpop.f32.mrf.mxu2 }
 0x4f7   : > { %v7596_v30 = vpop.f32.mrf.mxu0 }
 0x4ff   : > { %v3167_v48 = vpop.f32.mrf.mxu0 }
 0x500   : > { %v3191_v54 = vadd.f32 %v3167_v48, %v3105_v52 }
 0x502   : > { %v3200_v36 = vadd.f32 %v7609_v9, %v3191_v54 }
 0x504   : > { %v7617_v24 = vmax.f32 %v3200_v36, 0.0  ;;  %v2592_v36 = vadd.f32 %v7456_v53, %v7406_v25  ;;  %v4596_v25 = vld [vmem:[%s8206_s3 + $0x830] sm:$0xff] }
 0x505   : > { %3706 = vmatpush.msra.mxu2 %v4596_v25 }
 0x506   : > { %v3387_v29 = vrot.slane %v7617_v24, 1  ;;  %4528 = vmatmul.msk.f32.gmra.mxu1 %vm8524_vm2, %v7617_v24  ;;  %v3223_v32 = vrot.slane %v7617_v24, 7  ;;  %v2714_v53 = vadd.f32 %v7460_v44, %v2592_v36  ;;  %v2946_v36 = vpop.f32.mrf.mxu1 }
 0x507   : > { %v3170_v35 = vpop.f32.mrf.mxu0  ;;  %3707 = vmatpush.msra.mxu2 %v4595_v0 }
 0x508   : > { %v3192_v49 = vadd.f32 %v3170_v35, %v3106_v55  ;;  %v3243_v61 = vsel %vm8525_vm15, 0.0, %v3223_v32  ;;  %v3410_v5 = vsel %vm8526_vm4, 0.0, %v3387_v29 }
 0x509   : > { %v3244_v52 = vsel %vm8527_vm14, %v3243_v61, 0.0  ;;  %v3504_v48 = vsel %vm8528_vm1, %v3243_v61, 0.0  ;;  %v3411_v46 = vsel %vm5680_vm11, %v3410_v5, 0.0  ;;  %v3050_v61 = vadd.f32 %v3032_v31, %v2958_v2  ;;  %v4612_v31 = vld [vmem:[%s8206_s3 + $0x870] sm:$0xff] }
 0x50a   : > { %v3201_v22 = vadd.f32 %v7609_v9, %v3192_v49  ;;  %4535 = vmatmul.msk.f32.gmra.mxu2 %vm8524_vm2, %v3244_v52  ;;  %4550 = vmatmul.msk.f32.vlgmr.msrb.gmra.mxu3 %vm8529_vm3, %v3411_v46  ;;  %vm8531_vm3 = vmmov %vm8524_vm2  ;;  %v2595_v52 = vadd.f32 %v7472_v20, %v7419_v21  ;;  %v3093_v20 = vpop.f32.mrf.mxu3 }
 0x50b   : > { %4566 = vmatmul.msk.f32.vlgmr.msra.gmra.mxu0 %vm8530_vm8, %v3504_v48  ;;  %vm8532_vm8 = vmmov %vm8525_vm15  ;;  %3798 = vmatpush.msra.mxu3 %v4612_v31  ;;  %v3108_v46 = vadd.f32 %v3090_v8, %v3050_v61  ;;  %v4592_v61 = vld [vmem:[%s8206_s3 + $0x810] sm:$0xff] }
 0x50c   : > { %v7646_v54 = vmax.f32 %v3201_v22, 0.0  ;;  %vm8533_vm15 = vmmov %vm8526_vm4  ;;  %vm8534_vm4 = vnez %v8299_v34  ;;  %v4574_v22 = vld [vmem:[%s8206_s3 + $0x7c0] sm:$0xff]  ;;  %v2715_v21 = vadd.f32 %v7477_v23, %v2595_v52 }
 0x50d   : > { %3620 = vmatpush.msra.mxu1 %v4574_v22 }
 0x50e   : > { %4529 = vmatmul.msk.f32.gmra.mxu1 %vm8531_vm3, %v7646_v54  ;;  %v3224_v19 = vrot.slane %v7646_v54, 7  ;;  %v3388_v55 = vrot.slane %v7646_v54, 1  ;;  %vm8535_vm3 = vmmov %vm8524_vm2 }
 0x50f   : > { %v3173_v40 = vpop.f32.mrf.mxu0 }
 0x510   : > { %v3193_v18 = vadd.f32 %v3173_v40, %v3107_v10  ;;  %v7666_v12 = vsel %vm8532_vm8, %v3223_v32, %v3224_v19  ;;  %v7669_v35 = vsel %vm8533_vm15, %v3387_v29, %v3388_v55  ;;  %vm8536_vm8 = vmmov %vm8524_vm2  ;;  %v2807_v29 = vadd.f32 %v7468_v28, %v2714_v53  ;;  %v3038_v40 = vpop.f32.mrf.mxu2 }
 0x511   : > { %v3245_v49 = vsel %vm8534_vm4, %v7666_v12, 0.0  ;;  %v3412_v44 = vsel %vm5703_vm12, %v7669_v35, 0.0  ;;  %v3505_v39 = vsel %vm8527_vm14, %v7666_v12, 0.0  ;;  %vm8537_vm15 = vmmov %vm8524_vm2 }
 0x512   : > { %v3202_v5 = vadd.f32 %v7609_v9, %v3193_v18  ;;  %4536 = vmatmul.msk.f32.gmra.mxu2 %vm8524_vm2, %v3245_v49  ;;  %4551 = vmatmul.msk.f32.gmra.mxu3 %vm8535_vm3, %v3412_v44  ;;  %v2867_v48 = vadd.f32 %v7539_v50, %v2807_v29  ;;  %vm8538_vm2 = vcmask 1040384   ;;  %vm8539_vm3 = vcmask 1046528   ;;  %v4611_v18 = vld [vmem:[%s8206_s3 + $0x868] sm:$0xff]  ;;  %v4629_v49 = vld [vmem:[%s8206_s3 + $0x8b8] sm:$0xff] }
 0x513   : > { %4567 = vmatmul.msk.f32.gmra.mxu0 %vm8536_vm8, %v3505_v39  ;;  %vm8540_vm8 = vnez %v8302_v27  ;;  %3799 = vmatpush.msra.mxu3 %v4611_v18  ;;  %v7809_v18 = vld [vmem:[%s8206_s3 + $0x898] sm:$0xff] }
 0x514   : > { %v7685_v32 = vmax.f32 %v3202_v5, 0.0  ;;  %v2959_v38 = vadd.f32 %v2943_v41, %v2867_v48  ;;  %v4628_v5 = vld [vmem:[%s8206_s3 + $0x8b0] sm:$0xff]  ;;  %3855 = vmatpush.msrb.mxu0 %v4629_v49 }
 0x516   : > { %4530 = vmatmul.msk.f32.gmra.mxu1 %vm8537_vm15, %v7685_v32  ;;  %v3226_v57 = vrot.slane %v7685_v32, 7  ;;  %v3390_v28 = vrot.slane %v7685_v32, 1  ;;  %v3051_v25 = vadd.f32 %v3035_v1, %v2959_v38  ;;  %v4593_v1 = vld [vmem:[%s8206_s3 + $0x818] sm:$0xff]  ;;  %3856 = vmatpush.msrb.mxu0 %v4628_v5 }
 0x517   : > { %v3176_v50 = vpop.f32.mrf.mxu0 }
 0x518   : > { %v3194_v8 = vadd.f32 %v3176_v50, %v3108_v46  ;;  %v7705_v33 = vsel %vm8538_vm2, %v3224_v19, %v3226_v57  ;;  %v7708_v10 = vsel %vm8539_vm3, %v3388_v55, %v3390_v28  ;;  %vm8541_vm2 = vmmov %vm8537_vm15  ;;  %v4594_v19 = vld [vmem:[%s8206_s3 + $0x820] sm:$0xff]  ;;  %v2808_v55 = vadd.f32 %v7496_v51, %v2715_v21 }
 0x519   : > { %v3246_v43 = vsel %vm8540_vm8, %v7705_v33, 0.0  ;;  %v3413_v23 = vsel %vm5724_vm13, %v7708_v10, 0.0  ;;  %v3506_v41 = vsel %vm8534_vm4, %v7705_v33, 0.0  ;;  %vm8542_vm3 = vmmov %vm8541_vm2  ;;  %3708 = vmatpush.msra.mxu2 %v4594_v19  ;;  %v2598_v51 = vadd.f32 %v7498_v62, %v7434_v63  ;;  %v4591_v62 = vld [vmem:[%s8206_s3 + $0x808] sm:$0xff]  ;;  %v4610_v46 = vld [vmem:[%s8206_s3 + $0x860] sm:$0xff] }
 0x51a   : > { %v3203_v53 = vadd.f32 %v7609_v9, %v3194_v8  ;;  %4537 = vmatmul.msk.f32.gmra.mxu2 %vm8537_vm15, %v3246_v43  ;;  %4552 = vmatmul.msk.f32.gmra.mxu3 %vm8541_vm2, %v3413_v23  ;;  %v2868_v44 = vadd.f32 %v7567_v37, %v2808_v55  ;;  %v3109_v39 = vadd.f32 %v3093_v20, %v3051_v25  ;;  %vm8543_vm15 = vmmov %vm8541_vm2  ;;  %v7754_v37 = vld [vmem:[%s8206_s3 + $0x8f8] sm:$0xff]  ;;  %vm8544_vm2 = vcmask 1040384   ;;  %v3096_v20 = vpop.f32.mrf.mxu3 }
 0x51b   : > { %4568 = vmatmul.msk.f32.gmra.mxu0 %vm8542_vm3, %v3506_v41  ;;  %3709 = vmatpush.msra.mxu2 %v4593_v1  ;;  %v2716_v31 = vadd.f32 %v7512_v4, %v2598_v51  ;;  %vm8545_vm3 = vcmask 1046528   ;;  %v4590_v4 = vld [vmem:[%s8206_s3 + $0x800] sm:$0xff]  ;;  %v4609_v25 = vld [vmem:[%s8206_s3 + $0x858] sm:$0xff]  ;;  %v2601_v19 = vadd.f32 %v7526_v47, %v7448_v26  ;;  %v4643_v26 = vld [vmem:[%s8206_s3 + $0x8f0] sm:$0xff] }
 0x51c   : > { %v7727_v2 = vmax.f32 %v3203_v53, 0.0  ;;  %v2960_v52 = vadd.f32 %v2946_v36, %v2868_v44  ;;  %3941 = vmatpush.msrb.mxu1 %v7754_v37  ;;  %3800 = vmatpush.msra.mxu3 %v4610_v46  ;;  %v2949_v36 = vpop.f32.mrf.mxu1  ;;  %v7793_v41 = vld [vmem:[%s8206_s3 + $0x8a0] sm:$0xff]  ;;  %v4607_v47 = vld [vmem:[%s8206_s3 + $0x848] sm:$0xff] }
 0x51d   : > { %3710 = vmatpush.msra.mxu2 %v4592_v61  ;;  %v2809_v23 = vadd.f32 %v7524_v45, %v2716_v31  ;;  %v4608_v45 = vld [vmem:[%s8206_s3 + $0x850] sm:$0xff] }
 0x51e   : > { %4531 = vmatmul.msk.f32.gmra.mxu1 %vm8543_vm15, %v7727_v2  ;;  %v3228_v29 = vrot.slane %v7727_v2, 7  ;;  %v3392_v63 = vrot.slane %v7727_v2, 1  ;;  %v3052_v8 = vadd.f32 %v3038_v40, %v2960_v52  ;;  %3801 = vmatpush.msra.mxu3 %v4609_v25  ;;  %v3041_v40 = vpop.f32.mrf.mxu2  ;;  %v4606_v52 = vld [vmem:[%s8206_s3 + $0x840] sm:$0xff] }
 0x51f   : > { %v3179_v48 = vpop.f32.mrf.mxu0  ;;  %3711 = vmatpush.msra.mxu2 %v4591_v62  ;;  %v2869_v55 = vadd.f32 %v7586_v60, %v2809_v23  ;;  %v2717_v60 = vadd.f32 %v7537_v42, %v2601_v19  ;;  %3942 = vmatpush.msrb.mxu1 %v4643_v26 }
 0x520   : > { %v3195_v22 = vadd.f32 %v3179_v48, %v3109_v39  ;;  %v7765_v0 = vsel %vm8544_vm2, %v3226_v57, %v3228_v29  ;;  %v7768_v21 = vsel %vm8545_vm3, %v3390_v28, %v3392_v63  ;;  %v4627_v28 = vld [vmem:[%s8206_s3 + $0x8a8] sm:$0xff]  ;;  %vm8546_vm2 = vmmov %vm8543_vm15  ;;  %v3110_v1 = vadd.f32 %v3096_v20, %v3052_v8  ;;  %3802 = vmatpush.msra.mxu3 %v4608_v45 }
 0x521   : > { %v3247_v50 = vsel %vm8502_vm5, %v7765_v0, 0.0  ;;  %v3414_v38 = vsel %vm8520_vm10, %v7768_v21, 0.0  ;;  %v3507_v57 = vsel %vm8540_vm8, %v7765_v0, 0.0  ;;  %vm8547_vm3 = vmmov %vm8546_vm2  ;;  %3712 = vmatpush.msra.mxu2 %v4590_v4  ;;  %3857 = vmatpush.msrb.mxu0 %v4627_v28  ;;  %v4623_v20 = vld [vmem:[%s8206_s3 + $0x888] sm:$0xff]  ;;  %v3658_v6 = vsel %vm5724_vm13, %v7768_v21, 0.0 }
 0x522   : > { %v3204_v43 = vadd.f32 %v7609_v9, %v3195_v22  ;;  %4538 = vmatmul.msk.f32.gmra.mxu2 %vm8543_vm15, %v3247_v50  ;;  %4553 = vmatmul.msk.f32.gmra.mxu3 %vm8546_vm2, %v3414_v38  ;;  %vm8548_vm15 = vmmov %vm8546_vm2  ;;  %vm8549_vm2 = vcmask 1040384   ;;  %v2810_v22 = vadd.f32 %v7556_v17, %v2717_v60  ;;  %v3099_v4 = vpop.f32.mrf.mxu3  ;;  %v4622_v17 = vld [vmem:[%s8206_s3 + $0x880] sm:$0xff] }
 0x523   : > { %4569 = vmatmul.msk.f32.gmra.mxu0 %vm8547_vm3, %v3507_v57  ;;  %4659 = vmatpush.msrb.mxu2 %v4629_v49  ;;  %v2961_v49 = vadd.f32 %v2949_v36, %v2869_v55  ;;  %vm8550_vm3 = vcmask 1046528  }
 0x524   : > { %v7798_v53 = vmax.f32 %v3204_v43, 0.0  ;;  %3858 = vmatpush.msrb.mxu0 %v7793_v41  ;;  %3803 = vmatpush.msra.mxu3 %v4607_v47  ;;  %v2952_v50 = vpop.f32.mrf.mxu1  ;;  %v2870_v57 = vadd.f32 %v7596_v30, %v2810_v22 }
 0x525   : > { %4660 = vmatpush.msrb.mxu2 %v4628_v5  ;;  %v3053_v46 = vadd.f32 %v3041_v40, %v2961_v49 }
 0x526   : > { %4532 = vmatmul.msk.f32.gmra.mxu1 %vm8548_vm15, %v7798_v53  ;;  %v3230_v51 = vrot.slane %v7798_v53, 7  ;;  %v3394_v44 = vrot.slane %v7798_v53, 1  ;;  %3859 = vmatpush.msrb.mxu0 %v7809_v18  ;;  %vm8551_vm15 = vnez %v8308_v58  ;;  %v2962_v23 = vadd.f32 %v2952_v50, %v2870_v57  ;;  %v3044_v30 = vpop.f32.mrf.mxu2 }
 0x527   : > { %v3182_v61 = vpop.f32.mrf.mxu0  ;;  %3804 = vmatpush.msra.mxu3 %v4606_v52  ;;  %4661 = vmatpush.msrb.mxu2 %v4627_v28  ;;  %v3111_v36 = vadd.f32 %v3099_v4, %v3053_v46  ;;  %v8565_v46 = vld [vmem:[#allocation16_spill] sm:$0xff] }
 0x528   : > { %v3196_v39 = vadd.f32 %v3182_v61, %v3110_v1  ;;  %v7824_v62 = vsel %vm8549_vm2, %v3228_v29, %v3230_v51  ;;  %v7827_v31 = vsel %vm8550_vm3, %v3392_v63, %v3394_v44  ;;  %v4624_v63 = vld [vmem:[%s8206_s3 + $0x890] sm:$0xff]  ;;  %vm8552_vm2 = vcmask 523264  }
 0x529   : > { %v3248_v42 = vsel %vm8551_vm15, %v7824_v62, 0.0  ;;  %v3415_v48 = vsel %vm8497_vm7, %v7827_v31, 0.0  ;;  %v3508_v29 = vsel %vm8502_vm5, %v7824_v62, 0.0  ;;  %vm8553_vm3 = vmmov %vm8552_vm2  ;;  %3860 = vmatpush.msrb.mxu0 %v4624_v63  ;;  %4667 = vmatpush.msrb.mxu3 %v7754_v37  ;;  %v4642_v37 = vld [vmem:[%s8206_s3 + $0x8e8] sm:$0xff]  ;;  %v3659_v13 = vsel %vm8520_vm10, %v7827_v31, 0.0 }
 0x52a   : > { %v3205_v5 = vadd.f32 %v7609_v9, %v3196_v39  ;;  %4539 = vmatmul.msk.f32.gmra.mxu2 %vm8552_vm2, %v3248_v42  ;;  %4554 = vmatmul.msk.f32.gmra.mxu3 %vm8553_vm3, %v3415_v48  ;;  %vm8554_vm8 = vmmov %vm8552_vm2  ;;  %vm8557_vm3 = vcmask 1046528   ;;  %v4641_v39 = vld [vmem:[%s8206_s3 + $0x8e0] sm:$0xff] }
 0x52b   : > { %4570 = vmatmul.msk.f32.gmra.mxu0 %vm8554_vm8, %v3508_v29  ;;  %vm8555_vm8 = vmmov %vm8552_vm2  ;;  %3943 = vmatpush.msrb.mxu1 %v4642_v37  ;;  %vm8556_vm2 = vcmask 1040384  }
 0x52c   : > { %v7853_v38 = vmax.f32 %v3205_v5, 0.0  ;;  %3861 = vmatpush.msrb.mxu0 %v4623_v20  ;;  %4668 = vmatpush.msrb.mxu3 %v4643_v26 }
 0x52d   : > { %4662 = vmatpush.msrb.mxu2 %v7793_v41  ;;  %v3102_v41 = vpop.f32.mrf.mxu3  ;;  %3944 = vmatpush.msrb.mxu1 %v4641_v39 }
 0x52e   : > { %4533 = vmatmul.msk.f32.gmra.mxu1 %vm8555_vm8, %v7853_v38  ;;  %v3232_v8 = vrot.slane %v7853_v38, 7  ;;  %v3396_v43 = vrot.slane %v7853_v38, 1  ;;  %3862 = vmatpush.msrb.mxu0 %v4622_v17 }
 0x52f   : > { %v3185_v25 = vpop.f32.mrf.mxu0  ;;  %4669 = vmatpush.msrb.mxu3 %v4642_v37  ;;  %4663 = vmatpush.msrb.mxu2 %v7809_v18 }
 0x530   : > { %v3197_v45 = vadd.f32 %v3185_v25, %v3111_v36  ;;  %v7868_v28 = vsel %vm8556_vm2, %v3230_v51, %v3232_v8  ;;  %v7871_v19 = vsel %vm8557_vm3, %v3394_v44, %v3396_v43  ;;  %v3054_v51 = vadd.f32 %v3044_v30, %v2962_v23  ;;  %vm8559_vm2 = vmmov %vm8555_vm8  ;;  %v4638_v25 = vld [vmem:[%s8206_s3 + $0x8c8] sm:$0xff] }
 0x531   : > { %v3249_v55 = vsel %vm8511_vm6, %v7868_v28, 0.0  ;;  %v3416_v1 = vsel %vm5811_vm0, %v7871_v19, 0.0  ;;  %v3509_v26 = vsel %vm8551_vm15, %v7868_v28, 0.0  ;;  %vm8560_vm3 = vmmov %vm8559_vm2  ;;  %4664 = vmatpush.msrb.mxu2 %v4624_v63  ;;  %4670 = vmatpush.msrb.mxu3 %v4641_v39  ;;  %v3748_v23 = vsel %vm8528_vm1, %v7666_v12, 0.0 }
 0x532   : > { %v3206_v44 = vadd.f32 %v7609_v9, %v3197_v45  ;;  %4540 = vmatmul.msk.f32.gmra.mxu2 %vm8555_vm8, %v3249_v55  ;;  %4555 = vmatmul.msk.f32.gmra.mxu3 %vm8559_vm2, %v3416_v1  ;;  %v3112_v60 = vadd.f32 %v3102_v41, %v3054_v51  ;;  %vm8561_vm5 = vmmov %vm8559_vm2  ;;  %vm8562_vm8 = vcmask 1040384   ;;  %vm8563_vm2 = vcmask 1046528  }
 0x533   : > { %4571 = vmatmul.msk.f32.gmra.mxu0 %vm8560_vm3, %v3509_v26  ;;  %4665 = vmatpush.msrb.mxu2 %v4623_v20  ;;  %v3657_v30 = vsel %vm5703_vm12, %v7708_v10, 0.0  ;;  %v3749_v12 = vsel %vm8527_vm14, %v7705_v33, 0.0  ;;  %v3750_v33 = vsel %vm8534_vm4, %v7765_v0, 0.0  ;;  %v3660_v1 = vsel %vm8497_vm7, %v7871_v19, 0.0 }
 0x534   : > { %v7888_v47 = vmax.f32 %v3206_v44, 0.0  ;;  %vm8587_vm4 = vnez %v8302_v27  ;;  %v8609_v26 = vmov 0.0   ;;  %v3897_v44 = vsel %vm5703_vm12, %v7768_v21, 0.0 }
 0x535   : > { %4666 = vmatpush.msrb.mxu2 %v4622_v17  ;;  %v3751_v34 = vsel %vm8587_vm4, %v7824_v62, 0.0  ;;  %v3899_v21 = vsel %vm8520_vm10, %v7871_v19, 0.0 }
 0x536   : > { %4534 = vmatmul.msk.f32.gmra.mxu1 %vm8561_vm5, %v7888_v47  ;;  %v3234_v49 = vrot.slane %v7888_v47, 7  ;;  %v3398_v61 = vrot.slane %v7888_v47, 1  ;;  %vm8566_vm5 = vnez %v8565_v46 }
 0x537   : > { %v3188_v52 = vpop.f32.mrf.mxu0  ;;  %v3362_v45 = vpop.f32.mrf.mxu2 }
 0x538   : > { %v3198_v42 = vadd.f32 %v3188_v52, %v3112_v60  ;;  %v7898_v18 = vsel %vm8562_vm8, %v3232_v8, %v3234_v49  ;;  %v7901_v48 = vsel %vm8563_vm2, %v3396_v43, %v3398_v61  ;;  %vm8567_vm8 = vmmov %vm8560_vm3  ;;  %v8572_v8 = vld [vmem:[#allocation17_spill] sm:$0xff] }
 0x539   : > { %v3250_v63 = vsel %vm5637_vm9, %v7898_v18, 0.0  ;;  %v3417_v5 = vsel %vm8566_vm5, %v7901_v48, 0.0  ;;  %v3510_v22 = vsel %vm8511_vm6, %v7898_v18, 0.0  ;;  %vm8568_vm2 = vmmov %vm8560_vm3 }
 0x53a   : > { %v3207_v4 = vadd.f32 %v7609_v9, %v3198_v42  ;;  %4541 = vmatmul.msk.f32.gmra.mxu2 %vm8560_vm3, %v3250_v63  ;;  %4556 = vmatmul.msk.f32.gmra.mxu3 %vm8567_vm8, %v3417_v5  ;;  %vm8569_vm15 = vmmov %vm8568_vm2  ;;  %v4640_v9 = vld [vmem:[%s8206_s3 + $0x8d8] sm:$0xff]  ;;  %vm8570_vm3 = vcmask 1046528   ;;  %vm8571_vm8 = vcmask 1040384   ;;  %v3900_v63 = vsel %vm8497_vm7, %v7901_v48, 0.0 }
 0x53b   : > { %4572 = vmatmul.msk.f32.gmra.mxu0 %vm8568_vm2, %v3510_v22  ;;  %3945 = vmatpush.msrb.mxu1 %v4640_v9  ;;  %vm8574_vm6 = vmmov %vm8568_vm2  ;;  %vm8615_vm7 = vnez %v8565_v46 }
 0x53c   : > { %v7916_v20 = vmax.f32 %v3207_v4, 0.0  ;;  %4671 = vmatpush.msrb.mxu3 %v4640_v9  ;;  %vm8576_vm5 = vmmov %vm8568_vm2 }
 0x53d   : > { %vm8580_vm1 = vmmov %vm8568_vm2 }
 0x53e   : > { %4582 = vmatmul.msk.f32.vlgmr.msra.gmra.mxu1 %vm8569_vm15, %v7617_v24  ;;  %v3400_v50 = vrot.slane %v7916_v20, 1  ;;  %v3501_v57 = vrot.slane %v7916_v20, 7  ;;  %v3656_v24 = vsel %vm5680_vm11, %v7669_v35, 0.0  ;;  %vm8573_vm15 = vnez %v8572_v8  ;;  %v4639_v35 = vld [vmem:[%s8206_s3 + $0x8d0] sm:$0xff]  ;;  %vm8584_vm14 = vmmov %vm8580_vm1 }
 0x53f   : > { %3946 = vmatpush.msrb.mxu1 %v4639_v35  ;;  %4672 = vmatpush.msrb.mxu3 %v4639_v35  ;;  %vm8594_vm4 = vmmov %vm8580_vm1 }
 0x540   : > { %v7926_v36 = vsel %vm8570_vm3, %v3398_v61, %v3400_v50  ;;  %v3502_v17 = vsel %vm8571_vm8, %v3234_v49, %v3501_v57  ;;  %vm8575_vm3 = vmmov %vm8568_vm2 }
 0x541   : > { %v3418_v43 = vsel %vm8573_vm15, %v7926_v36, 0.0  ;;  %v3511_v37 = vsel %vm5637_vm9, %v3502_v17, 0.0  ;;  %vm8578_vm8 = vmmov %vm8568_vm2  ;;  %3947 = vmatpush.msrb.mxu1 %v4638_v25  ;;  %4673 = vmatpush.msrb.mxu3 %v4638_v25 }
 0x542   : > { %4557 = vmatmul.msk.f32.gmra.mxu3 %vm8568_vm2, %v3418_v43  ;;  %4598 = vmatmul.msk.f32.vlgmr.msra.gmra.mxu2 %vm8574_vm6, %v3656_v24  ;;  %vm8577_vm6 = vmmov %vm8568_vm2 }
 0x543   : > { %4573 = vmatmul.msk.f32.gmra.mxu0 %vm8575_vm3, %v3511_v37  ;;  %vm8581_vm3 = vmmov %vm8580_vm1 }
 0x544   : > { %vm8613_vm12 = vmmov %vm8580_vm1 }
 0x545   : > { %vm8616_vm10 = vmmov %vm8580_vm1 }
 0x546   : > { %4583 = vmatmul.msk.f32.gmra.mxu1 %vm8576_vm5, %v7646_v54  ;;  %vm8579_vm5 = vmmov %vm8568_vm2 }
 0x54a   : > { %4599 = vmatmul.msk.f32.gmra.mxu2 %vm8577_vm6, %v3657_v30  ;;  %4614 = vmatmul.msk.f32.vlgmr.msra.gmra.mxu3 %vm8578_vm8, %v3748_v23  ;;  %vm8582_vm6 = vmmov %vm8580_vm1 }
 0x54b   : > { %4630 = vmatmul.msk.f32.vlgmr.msrb.gmra.mxu0 %vm8579_vm5, %v7646_v54  ;;  %vm8583_vm8 = vmmov %vm8580_vm1  ;;  %v4637_v54 = vld [vmem:[%s8206_s3 + $0x8c0] sm:$0xff] }
 0x54c   : > { %3948 = vmatpush.msrb.mxu1 %v4637_v54  ;;  %4674 = vmatpush.msrb.mxu3 %v4637_v54  ;;  %vm8585_vm5 = vmmov %vm8580_vm1 }
 0x54e   : > { %4584 = vmatmul.msk.f32.gmra.mxu1 %vm8568_vm2, %v7685_v32  ;;  %vm8586_vm2 = vmmov %vm8580_vm1 }
 0x552   : > { %4600 = vmatmul.msk.f32.gmra.mxu2 %vm8580_vm1, %v3658_v6  ;;  %4615 = vmatmul.msk.f32.gmra.mxu3 %vm8581_vm3, %v3749_v12  ;;  %vm8588_vm3 = vmmov %vm8580_vm1 }
 0x553   : > { %4631 = vmatmul.msk.f32.gmra.mxu0 %vm8582_vm6, %v7685_v32  ;;  %v3300_v32 = vpop.f32.mrf.mxu1  ;;  %vm8589_vm6 = vmmov %vm8580_vm1 }
 0x554   : > { %v3363_v55 = vadd.f32 %v3362_v45, %v3300_v32 }
 0x556   : > { %4585 = vmatmul.msk.f32.gmra.mxu1 %vm8583_vm8, %v7727_v2  ;;  %vm8590_vm8 = vmmov %vm8580_vm1 }
 0x55a   : > { %4601 = vmatmul.msk.f32.gmra.mxu2 %vm8584_vm14, %v3659_v13  ;;  %4616 = vmatmul.msk.f32.gmra.mxu3 %vm8585_vm5, %v3750_v33  ;;  %vm8591_vm14 = vmmov %vm8580_vm1  ;;  %vm8592_vm5 = vnez %v8305_v56 }
 0x55b   : > { %4632 = vmatmul.msk.f32.gmra.mxu0 %vm8586_vm2, %v7727_v2  ;;  %v3661_v2 = vsel %vm5811_vm0, %v7901_v48, 0.0  ;;  %v3752_v0 = vsel %vm8592_vm5, %v7868_v28, 0.0  ;;  %vm8593_vm2 = vmmov %vm8580_vm1 }
 0x55c   : > { %vm8599_vm5 = vmmov %vm8580_vm1 }
 0x55e   : > { %4586 = vmatmul.msk.f32.gmra.mxu1 %vm8580_vm1, %v7798_v53 }
 0x562   : > { %4602 = vmatmul.msk.f32.gmra.mxu2 %vm8588_vm3, %v3660_v1  ;;  %4617 = vmatmul.msk.f32.gmra.mxu3 %vm8589_vm6, %v3751_v34  ;;  %vm8595_vm3 = vmmov %vm8580_vm1  ;;  %vm8596_vm6 = vnez %v8565_v46 }
 0x563   : > { %4633 = vmatmul.msk.f32.gmra.mxu0 %vm8590_vm8, %v7798_v53  ;;  %v3662_v27 = vsel %vm8596_vm6, %v7926_v36, 0.0  ;;  %vm8597_vm8 = vnez %v8308_v58  ;;  %vm8603_vm6 = vmmov %vm8580_vm1  ;;  %v3896_v58 = vsel %vm5680_vm11, %v7708_v10, 0.0 }
 0x564   : > { %v3753_v53 = vsel %vm8597_vm8, %v7898_v18, 0.0  ;;  %vm8604_vm8 = vmmov %vm8580_vm1 }
 0x565   : > { %vm8612_vm11 = vmmov %vm8580_vm1 }
 0x566   : > { %4587 = vmatmul.msk.f32.gmra.mxu1 %vm8591_vm14, %v7853_v38  ;;  %vm8598_vm14 = vmmov %vm8580_vm1 }
 0x56a   : > { %4603 = vmatmul.msk.f32.gmra.mxu2 %vm8593_vm2, %v3661_v2  ;;  %4618 = vmatmul.msk.f32.gmra.mxu3 %vm8580_vm1, %v3752_v0  ;;  %vm8600_vm2 = vmmov %vm8580_vm1 }
 0x56b   : > { %4634 = vmatmul.msk.f32.gmra.mxu0 %vm8594_vm4, %v7853_v38  ;;  %vm8601_vm4 = vcmask 1046528  }
 0x56c   : > { %v3655_v56 = vsel %vm8601_vm4, %v3400_v50, 0.0 }
 0x56d   : > { %v3663_v62 = vsel %vm8573_vm15, %v3655_v56, 0.0  ;;  %vm8608_vm15 = vmmov %vm8580_vm1  ;;  %v3902_v24 = vsel %vm8615_vm7, %v3655_v56, 0.0 }
 0x56e   : > { %4588 = vmatmul.msk.f32.gmra.mxu1 %vm8595_vm3, %v7888_v47  ;;  %vm8602_vm3 = vnez %v8464_v59 }
 0x56f   : > { %v3754_v38 = vsel %vm8602_vm3, %v3502_v17, 0.0 }
 0x572   : > { %4604 = vmatmul.msk.f32.gmra.mxu2 %vm8598_vm14, %v3662_v27  ;;  %4619 = vmatmul.msk.f32.gmra.mxu3 %vm8599_vm5, %v3753_v53  ;;  %vm8605_vm14 = vmmov %vm8580_vm1 }
 0x573   : > { %4635 = vmatmul.msk.f32.gmra.mxu0 %vm8600_vm2, %v7888_v47  ;;  %vm8606_vm5 = vmmov %vm8580_vm1  ;;  %vm8607_vm2 = vcmask 1040384   ;;  %v3898_v47 = vsel %vm5724_vm13, %v7827_v31, 0.0 }
 0x574   : > { %v3747_v28 = vsel %vm8607_vm2, %v3501_v57, 0.0  ;;  %vm8614_vm13 = vmmov %vm8580_vm1 }
 0x575   : > { %v3755_v59 = vsel %vm5637_vm9, %v3747_v28, 0.0  ;;  %vm8611_vm9 = vmmov %vm8580_vm1 }
 0x576   : > { %4589 = vmatmul.msk.f32.gmra.mxu1 %vm8580_vm1, %v7916_v20 }
 0x57a   : > { %4605 = vmatmul.msk.f32.gmra.mxu2 %vm8603_vm6, %v3663_v62  ;;  %4620 = vmatmul.msk.f32.gmra.mxu3 %vm8604_vm8, %v3754_v38  ;;  %vm8610_vm6 = vmmov %vm8580_vm1 }
 0x57b   : > { %4636 = vmatmul.msk.f32.gmra.mxu0 %vm8605_vm14, %v7916_v20  ;;  %v3901_v20 = vsel %vm5811_vm0, %v7926_v36, 0.0  ;;  %vm8618_vm0 = vmmov %vm8580_vm1 }
 0x57c   : > { %vm8620_vm1 = vmmov %vm8618_vm0 }
 0x57d   : > { %vm8623_vm4 = vmmov %vm8618_vm0 }
 0x57e   : > { %4645 = vmatmul.msk.f32.vlgmr.msrb.gmra.mxu1 %vm8606_vm5, %v3896_v58  ;;  %vm8624_vm3 = vmmov %vm8618_vm0 }
 0x57f   : > { %vm8626_vm8 = vmmov %vm8618_vm0 }
 0x580   : > { %vm8628_vm14 = vmmov %vm8618_vm0 }
 0x581   : > { %vm8630_vm5 = vmmov %vm8618_vm0 }
 0x582   : > { %4621 = vmatmul.msk.f32.gmra.mxu3 %vm8608_vm15, %v3755_v59  ;;  %3884 = vmatmul.f32.vlgmr.msrb.gmra.mxu2 %v8609_v26  ;;  %vm8632_vm2 = vmmov %vm8618_vm0 }
 0x583   : > { %v3303_v51 = vpop.f32.mrf.mxu1 }
 0x586   : > { %4646 = vmatmul.msk.f32.gmra.mxu1 %vm8610_vm6, %v3897_v44 }
 0x588   : > { %v3562_v16 = vpop.f32.mrf.mxu0 }
 0x58a   : > { %3970 = vmatmul.f32.vlgmr.msrb.gmra.mxu3 %v8609_v26 }
 0x58b   : > { %v3306_v7 = vpop.f32.mrf.mxu1 }
 0x58d   : > { %v3365_v10 = vpop.f32.mrf.mxu2  ;;  %v3469_v41 = vpop.f32.mrf.mxu3 }
 0x58e   : > { %v3366_v60 = vadd.f32 %v3365_v10, %v3303_v51  ;;  %v8053_v49 = vadd.f32 %v3469_v41, %v3363_v55  ;;  %4647 = vmatmul.msk.f32.gmra.mxu1 %vm8611_vm9, %v3898_v47 }
 0x590   : > { %v3565_v50 = vpop.f32.mrf.mxu0  ;;  %v3586_v47 = vadd.f32 %v3562_v16, %v8053_v49 }
 0x593   : > { %v3309_v61 = vpop.f32.mrf.mxu1 }
 0x595   : > { %v3368_v39 = vpop.f32.mrf.mxu2  ;;  %v3472_v3 = vpop.f32.mrf.mxu3 }
 0x596   : > { %v3369_v52 = vadd.f32 %v3368_v39, %v3306_v7  ;;  %v8059_v42 = vadd.f32 %v3472_v3, %v3366_v60  ;;  %4648 = vmatmul.msk.f32.gmra.mxu1 %vm8612_vm11, %v3899_v21 }
 0x598   : > { %v3568_v37 = vpop.f32.mrf.mxu0 }
 0x59b   : > { %v3312_v18 = vpop.f32.mrf.mxu1 }
 0x59d   : > { %v3371_v31 = vpop.f32.mrf.mxu2  ;;  %v3475_v29 = vpop.f32.mrf.mxu3 }
 0x59e   : > { %v3372_v5 = vadd.f32 %v3371_v31, %v3309_v61  ;;  %v8065_v22 = vadd.f32 %v3475_v29, %v3369_v52  ;;  %4649 = vmatmul.msk.f32.gmra.mxu1 %vm8613_vm12, %v3900_v63  ;;  %v3587_v31 = vadd.f32 %v3565_v50, %v8059_v42  ;;  %v8617_v50 = vld [vmem:[#allocation5_spill] sm:$0xff] }
 0x5a0   : > { %v8081_v25 = vpop.f32.mrf.mxu0  ;;  %v3588_v42 = vadd.f32 %v3568_v37, %v8065_v22 }
 0x5a3   : > { %v3315_v14 = vpop.f32.mrf.mxu1 }
 0x5a5   : > { %v3374_v19 = vpop.f32.mrf.mxu2  ;;  %v3478_v4 = vpop.f32.mrf.mxu3 }
 0x5a6   : > { %v3375_v57 = vadd.f32 %v3374_v19, %v3312_v18  ;;  %v8071_v9 = vadd.f32 %v3478_v4, %v3372_v5  ;;  %4650 = vmatmul.msk.f32.gmra.mxu1 %vm8614_vm13, %v3901_v20  ;;  %v8110_v5 = vperm.slane %v7606_v11, 3 }
 0x5a8   : > { %v8085_v33 = vpop.f32.mrf.mxu0 }
 0x5ab   : > { %v3318_v15 = vpop.f32.mrf.mxu1 }
 0x5ad   : > { %v3377_v48 = vpop.f32.mrf.mxu2  ;;  %v3481_v17 = vpop.f32.mrf.mxu3 }
 0x5ae   : > { %v3378_v8 = vadd.f32 %v3377_v48, %v3315_v14  ;;  %v8076_v43 = vadd.f32 %v3481_v17, %v3375_v57  ;;  %4651 = vmatmul.msk.f32.gmra.mxu1 %vm8616_vm10, %v3902_v24 }
 0x5b0   : > { %v8087_v2 = vpop.f32.mrf.mxu0 }
 0x5b3   : > { %v3321_v40 = vpop.f32.mrf.mxu1 }
 0x5b5   : > { %v3380_v36 = vpop.f32.mrf.mxu2  ;;  %v3484_v35 = vpop.f32.mrf.mxu3 }
 0x5b6   : > { %v3381_v23 = vadd.f32 %v3380_v36, %v3318_v15  ;;  %v8079_v30 = vadd.f32 %v3484_v35, %v3378_v8 }
 0x5b8   : > { %v8089_v56 = vpop.f32.mrf.mxu0 }
 0x5bb   : > { %v3622_v6 = vpop.f32.mrf.mxu1 }
 0x5bc   : > { %v3646_v60 = vadd.f32 %v3622_v6, %v3586_v47 }
 0x5bd   : > { %v3383_v12 = vpop.f32.mrf.mxu2  ;;  %v3487_v54 = vpop.f32.mrf.mxu3 }
 0x5be   : > { %v8083_v13 = vadd.f32 %v3487_v54, %v3381_v23  ;;  %v3384_v49 = vadd.f32 %v3383_v12, %v3321_v40 }
 0x5c0   : > { %v3583_v28 = vpop.f32.mrf.mxu0 }
 0x5c3   : > { %v3625_v46 = vpop.f32.mrf.mxu1 }
 0x5c4   : > { %v3647_v29 = vadd.f32 %v3625_v46, %v3587_v31 }
 0x5c5   : > { %v3490_v32 = vpop.f32.mrf.mxu3  ;;  %v3714_v45 = vpop.f32.mrf.mxu2 }
 0x5c6   : > { %v3738_v39 = vadd.f32 %v3714_v45, %v3646_v60  ;;  %v3500_v20 = vadd.f32 %v3490_v32, %v3384_v49  ;;  %v3589_v32 = vadd.f32 %v8081_v25, %v8071_v9  ;;  %v8619_v45 = vld [vmem:[#allocation6_spill] sm:$0xff]  ;;  %v3590_v25 = vadd.f32 %v8085_v33, %v8076_v43 }
 0x5c8   : > { %v3864_v7 = vpop.f32.mrf.mxu0  ;;  %v3593_v8 = vadd.f32 %v3583_v28, %v3500_v20 }
 0x5cb   : > { %v3628_v55 = vpop.f32.mrf.mxu1 }
 0x5cc   : > { %v3648_v24 = vadd.f32 %v3628_v55, %v3588_v42  ;;  %v8625_v42 = vld [vmem:[#allocation8_spill] sm:$0xff] }
 0x5cd   : > { %v3717_v1 = vpop.f32.mrf.mxu2  ;;  %v3806_v34 = vpop.f32.mrf.mxu3 }
 0x5ce   : > { %v3830_v21 = vadd.f32 %v3806_v34, %v3738_v39  ;;  %v3739_v16 = vadd.f32 %v3717_v1, %v3647_v29 }
 0x5d0   : > { %v3867_v52 = vpop.f32.mrf.mxu0  ;;  %v3888_v63 = vadd.f32 %v3864_v7, %v3830_v21 }
 0x5d3   : > { %v3631_v0 = vpop.f32.mrf.mxu1 }
 0x5d5   : > { %v3720_v27 = vpop.f32.mrf.mxu2  ;;  %v3809_v53 = vpop.f32.mrf.mxu3 }
 0x5d6   : > { %v3831_v57 = vadd.f32 %v3809_v53, %v3739_v16  ;;  %v3740_v23 = vadd.f32 %v3720_v27, %v3648_v24  ;;  %v3649_v27 = vadd.f32 %v3631_v0, %v3589_v32  ;;  %v8621_v0 = vld [vmem:[#allocation7_spill] sm:$0xff] }
 0x5d8   : > { %v3870_v17 = vpop.f32.mrf.mxu0  ;;  %v3889_v40 = vadd.f32 %v3867_v52, %v3831_v57 }
 0x5db   : > { %v8091_v62 = vpop.f32.mrf.mxu1 }
 0x5dd   : > { %v3723_v38 = vpop.f32.mrf.mxu2  ;;  %v3812_v58 = vpop.f32.mrf.mxu3 }
 0x5de   : > { %v3832_v22 = vadd.f32 %v3812_v58, %v3740_v23  ;;  %v3741_v60 = vadd.f32 %v3723_v38, %v3649_v27  ;;  %v3650_v38 = vadd.f32 %v8091_v62, %v3590_v25  ;;  %v3591_v62 = vadd.f32 %v8087_v2, %v8079_v30  ;;  %v8627_v2 = vld [vmem:[#allocation9_spill] sm:$0xff] }
 0x5df   : > { %v3592_v30 = vadd.f32 %v8089_v56, %v8083_v13 }
 0x5e0   : > { %v3890_v28 = vadd.f32 %v3870_v17, %v3832_v22  ;;  %v3873_v7 = vpop.f32.mrf.mxu0 }
 0x5e3   : > { %v8093_v59 = vpop.f32.mrf.mxu1 }
 0x5e5   : > { %v8095_v26 = vpop.f32.mrf.mxu2  ;;  %v3815_v51 = vpop.f32.mrf.mxu3 }
 0x5e6   : > { %v3833_v21 = vadd.f32 %v3815_v51, %v3741_v60  ;;  %v3742_v51 = vadd.f32 %v8095_v26, %v3650_v38 }
 0x5e8   : > { %v3891_v16 = vadd.f32 %v3873_v7, %v3833_v21 }
 0x5eb   : > { %v8097_v44 = vpop.f32.mrf.mxu1 }
 0x5ed   : > { %v8099_v10 = vpop.f32.mrf.mxu2  ;;  %v8101_v41 = vpop.f32.mrf.mxu3 }
 0x5ee   : > { %v3834_v43 = vadd.f32 %v8101_v41, %v3742_v51 }
 0x5f3   : > { %v3643_v61 = vpop.f32.mrf.mxu1 }
 0x5f4   : > { %v3653_v6 = vadd.f32 %v3643_v61, %v3593_v8 }
 0x5f5   : > { %v8104_v3 = vpop.f32.mrf.mxu3  ;;  %v8106_v18 = vpop.f32.mrf.mxu2 }
 0x5fb   : > { %v3950_v14 = vpop.f32.mrf.mxu1 }
 0x5fc   : > { %v3974_v19 = vadd.f32 %v3950_v14, %v3888_v63  ;;  %v8622_v14 = vld [vmem:[#allocation19_spill] sm:$0xff] }
 0x5fd   : > { %v8113_v4 = vpop.f32.mrf.mxu3  ;;  %v3735_v11 = vpop.f32.mrf.mxu2 }
 0x5fe   : > { %v3983_v15 = vadd.f32 %v8110_v5, %v3974_v19  ;;  %v3745_v37 = vadd.f32 %v3735_v11, %v3653_v6 }
 0x600   : > { %v3991_v48 = vadd.f32 %v3983_v15, %v8617_v50  ;;  %v3876_v15 = vpop.f32.mrf.mxu0 }
 0x601   : > { %v3892_v26 = vadd.f32 %v3876_v15, %v3834_v43 }
 0x602   : > { %v3999_v36 = vmax.f32 %v3991_v48, 0.0  ;;  %v3651_v48 = vadd.f32 %v8093_v59, %v3591_v62 }
 0x603   : > { %v3953_v35 = vpop.f32.mrf.mxu1 }
 0x604   : > { %4007 = vst.msk [vmem:[%s8120_s25] sm:$0xff] %vm8618_vm0, %v3999_v36  ;;  %v3975_v12 = vadd.f32 %v3953_v35, %v3889_v40  ;;  %v3743_v24 = vadd.f32 %v8099_v10, %v3651_v48  ;;  %v3652_v35 = vadd.f32 %v8097_v44, %v3592_v30 }
 0x605   : > { %v3827_v54 = vpop.f32.mrf.mxu3  ;;  %v3885_v34 = vpop.f32.mrf.mxu2 }
 0x606   : > { %v3984_v46 = vadd.f32 %v8110_v5, %v3975_v12  ;;  %v3837_v1 = vadd.f32 %v3827_v54, %v3745_v37  ;;  %v3835_v8 = vadd.f32 %v8104_v3, %v3743_v24  ;;  %v3744_v12 = vadd.f32 %v8106_v18, %v3652_v35  ;;  %v8629_v37 = vld [vmem:[#allocation18_spill] sm:$0xff] }
 0x608   : > { %v3992_v55 = vadd.f32 %v3984_v46, %v8619_v45  ;;  %v3895_v58 = vadd.f32 %v3885_v34, %v3837_v1  ;;  %v3879_v40 = vpop.f32.mrf.mxu0  ;;  %v3836_v54 = vadd.f32 %v8113_v4, %v3744_v12  ;;  %v8631_v45 = vld [vmem:[#allocation11_spill] sm:$0xff] }
 0x609   : > { %v3893_v6 = vadd.f32 %v3879_v40, %v3835_v8 }
 0x60a   : > { %v4000_v53 = vmax.f32 %v3992_v55, 0.0 }
 0x60b   : > { %v3956_v47 = vpop.f32.mrf.mxu1 }
 0x60c   : > { %4008 = vst.msk [vmem:[%s8120_s25 + $0x8] sm:$0xff] %vm8620_vm1, %v4000_v53  ;;  %v3976_v61 = vadd.f32 %v3956_v47, %v3890_v28 }
 0x60d   : > { %v3971_v39 = vpop.f32.mrf.mxu3 }
 0x60e   : > { %v3985_v52 = vadd.f32 %v8110_v5, %v3976_v61  ;;  %v3981_v9 = vadd.f32 %v3971_v39, %v3895_v58 }
 0x610   : > { %v3993_v31 = vadd.f32 %v3985_v52, %v8621_v0  ;;  %v3990_v29 = vadd.f32 %v8110_v5, %v3981_v9  ;;  %v3882_v56 = vpop.f32.mrf.mxu0 }
 0x611   : > { %v3894_v46 = vadd.f32 %v3882_v56, %v3836_v54 }
 0x612   : > { %v4001_v63 = vmax.f32 %v3993_v31, 0.0  ;;  %v3998_v49 = vadd.f32 %v3990_v29, %v8622_v14 }
 0x613   : > { %v3959_v19 = vpop.f32.mrf.mxu1 }
 0x614   : > { %4009 = vst.msk [vmem:[%s8120_s25 + $0x10] sm:$0xff] %vm8623_vm4, %v4001_v63  ;;  %v4006_v20 = vmax.f32 %v3998_v49, 0.0  ;;  %v3977_v57 = vadd.f32 %v3959_v19, %v3891_v16 }
 0x616   : > { %4014 = vst.msk [vmem:[%s8120_s25 + $0x38] sm:$0xff] %vm8624_vm3, %v4006_v20  ;;  %v3986_v33 = vadd.f32 %v8110_v5, %v3977_v57 }
 0x618   : > { %v3994_v50 = vadd.f32 %v3986_v33, %v8625_v42 }
 0x61a   : > { %v4002_v17 = vmax.f32 %v3994_v50, 0.0 }
 0x61b   : > { %v3962_v11 = vpop.f32.mrf.mxu1 }
 0x61c   : > { %4010 = vst.msk [vmem:[%s8120_s25 + $0x18] sm:$0xff] %vm8626_vm8, %v4002_v17  ;;  %v3978_v41 = vadd.f32 %v3962_v11, %v3892_v26 }
 0x61e   : > { %v3987_v36 = vadd.f32 %v8110_v5, %v3978_v41 }
 0x620   : > { %v3995_v59 = vadd.f32 %v3987_v36, %v8627_v2 }
 0x622   : > { %v4003_v23 = vmax.f32 %v3995_v59, 0.0 }
 0x623   : > { %v3965_v10 = vpop.f32.mrf.mxu1 }
 0x624   : > { %4011 = vst.msk [vmem:[%s8120_s25 + $0x20] sm:$0xff] %vm8628_vm14, %v4003_v23  ;;  %v3979_v3 = vadd.f32 %v3965_v10, %v3893_v6 }
 0x626   : > { %v3988_v22 = vadd.f32 %v8110_v5, %v3979_v3 }
 0x628   : > { %v3996_v13 = vadd.f32 %v3988_v22, %v8629_v37 }
 0x62a   : > { %v4004_v44 = vmax.f32 %v3996_v13, 0.0 }
 0x62b   : > { %v3968_v32 = vpop.f32.mrf.mxu1 }
 0x62c   : > { %4012 = vst.msk [vmem:[%s8120_s25 + $0x28] sm:$0xff] %vm8630_vm5, %v4004_v44  ;;  %v3980_v18 = vadd.f32 %v3968_v32, %v3894_v46 }
 0x62e   : > { %v3989_v4 = vadd.f32 %v8110_v5, %v3980_v18 }
 0x630   : > { %v3997_v55 = vadd.f32 %v3989_v4, %v8631_v45 }
 0x632   : > { %v4005_v1 = vmax.f32 %v3997_v55, 0.0 }
 0x634   : > { %4013 = vst.msk [vmem:[%s8120_s25 + $0x30] sm:$0xff] %vm8632_vm2, %v4005_v1 }
 0x635   : > { %4746 = shalt.err (!%p4743_p3)
}
 0x636   : > { %s4784_s16 = smov 128   ;;  %s4785_s23 = smov 8  }
 0x637   : > { %4675 = dma.vmem_to_hbm [thread:$0]  (%p4854_p5), %s4029_s7, 1024, %s4031_s8, %s4016_s22, %s4784_s16, %s4784_s16, %s4785_s23  }
 0x638 PF: > { %p4681_p4 = scmp.ge.s32.totalorder %s4781_s21, 2  ;;  %s4045_s25 = sand.u32 1, %s4769_s18  }
 0x639   : > { %s4046_s26 = scalar_lea.sflag [#allocation3], %s4045_s25 }
 0x63a   : > { %p4678_p7 = pnand %p4681_p4, %p4858_p6 }
 0x63c   : > { %p4679_p8 = pneg %p4678_p7 }
 0x63e   : > { %4764 = dma.done.wait (%p4679_p8), %s4046_s26, 1024  }
 0x63f   : > { %4766 = vsyncadd (%p4679_p8), %s4046_s26, 4294966272  ;;  %p15_p9 = scmp.ge.s32.totalorder %s4841_s24, 4   ;;  %s8633_s18 = smov %s4773_s19 }
 0x640   : > { %s8634_s19 = smov %s4777_s20  ;;  %s8635_s20 = smov %s4852_s27 }
 0x641   : > { %s8636_s21 = smov %s4841_s24  ;;  %17 = sbr.rel (!%p15_p9) target bundleno = 3 (0x3), region = 110 }
 0x646   :  { %4052 = vsyncpa [#allocation3], 1 }
 0x647   :  { %4054 = vsyncpa [#allocation3 + $0x1], 1 }

</bundles_post_ra>
